<compile_context>
chip_gen: v7x
topology: tpu7x:2x2x1
jax: 0.10.0
libtpu: 0.0.40
codegen_flags: <defaults>
</compile_context>

<pallas_src>
import functools

import jax
import jax.numpy as jnp
from jax.experimental import pallas as pl
from jax.experimental.pallas import tpu as pltpu


# ---------------------------------------------------------------------------
# config (mirrors the torch-side `cfg` object)
# ---------------------------------------------------------------------------
class cfg:
    px_num = 1
    use_sigma = True


N_MUL = 4
CIN = (21 if cfg.use_sigma else 20) * N_MUL   # 84
CIN_PAD = 128                                 # lane-dense channel pad (layer 1)
CMID = 16 * N_MUL                             # 64
COUT = 16 * N_MUL                             # 64


# ---------------------------------------------------------------------------
# fused kernel: one grid step = one image through all three layers
# ---------------------------------------------------------------------------
def _denoise_kernel(x_ref, w1_ref, w2_ref, w3_ref, b1_ref, b2_ref, b3_ref,
                    o_ref, slab1, pad_mid, slab_mid, *, H, W):
    # x_ref   : (1, H+2, W+2, CIN_PAD) f32, pre-padded (spatial halo + chan pad)
    # wN_ref  : (3*cin, 3*cout) bf16   -- dw folded into K, dh folded into N
    # bN_ref  : (1, cout) f32
    # o_ref   : (1, H, W, COUT) f32
    # slab1   : (H+2, W, 3*CIN_PAD) bf16 scratch (layer-1 im2col slab)
    # pad_mid : (H+2, W+2, CMID) f32 scratch (zero-halo buffer, reused h1/h2)
    # slab_mid: (H+2, W, 3*CMID) bf16 scratch (layer-2/3 im2col slab)
    HP, WP = H + 2, W + 2

    def conv_wide(slab_ref, w_ref, b_ref, cout):
        """dw-K-folded / dh-N-folded 3x3 conv.

        One wide MXU dot (M=(H+2)*W, K=3*cin, N=3*cout) replaces nine narrow
        N=64 dots; per-dh realignment is a free leading-dim shift of the f32
        result plus two VPU adds.  Returns (H, W, cout) f32 with bias.
        """
        k3 = slab_ref.shape[-1]
        lhs = slab_ref[...].reshape(HP * W, k3)
        y = jnp.dot(lhs, w_ref[...], preferred_element_type=jnp.float32)
        y = y.reshape(HP, W, 3 * cout)
        return (y[0:H, :, 0:cout]
                + y[1:H + 1, :, cout:2 * cout]
                + y[2:H + 2, :, 2 * cout:3 * cout]
                + b_ref[...].reshape(1, 1, cout))

    # ---- layer 1: relu(conv(x)) ------------------------------------------
    # Input already carries the zero halo + channel pad, so only the im2col
    # slab is built here (3 lane-aligned 128-wide copies; dw=1,2 sources are
    # the only sublane-offset reads left for this layer).
    for dw in range(3):
        slab1[:, :, dw * CIN_PAD:(dw + 1) * CIN_PAD] = (
            x_ref[0, :, dw:dw + W, :].astype(jnp.bfloat16))
    h = jnp.maximum(conv_wide(slab1, w1_ref, b1_ref, CMID), 0.0)

    # ---- zero ONLY the halo ring of the shared mid pad buffer -------------
    # (re-zeroed every grid step: scratch persists across steps/cores; the
    # interior is fully overwritten below so it is never zero-filled.)
    pad_mid[0:1, :, :] = jnp.zeros((1, WP, CMID), jnp.float32)
    pad_mid[H + 1:H + 2, :, :] = jnp.zeros((1, WP, CMID), jnp.float32)
    pad_mid[:, 0:1, :] = jnp.zeros((HP, 1, CMID), jnp.float32)
    pad_mid[:, W + 1:W + 2, :] = jnp.zeros((HP, 1, CMID), jnp.float32)

    # ---- layer 2: relu(conv(h1))   -- h1 never leaves VMEM ----------------
    pad_mid[1:H + 1, 1:W + 1, :] = h
    for dw in range(3):
        slab_mid[:, :, dw * CMID:(dw + 1) * CMID] = (
            pad_mid[:, dw:dw + W, :].astype(jnp.bfloat16))
    h = jnp.maximum(conv_wide(slab_mid, w2_ref, b2_ref, CMID), 0.0)

    # ---- layer 3: conv(h2)   -- pad/slab buffers reused --------------------
    pad_mid[1:H + 1, 1:W + 1, :] = h
    for dw in range(3):
        slab_mid[:, :, dw * CMID:(dw + 1) * CMID] = (
            pad_mid[:, dw:dw + W, :].astype(jnp.bfloat16))
    o_ref[0] = conv_wide(slab_mid, w3_ref, b3_ref, COUT).astype(o_ref.dtype)


# ---------------------------------------------------------------------------
# weight folding: (3,3,cin,cout) HWIO -> (3*cin, 3*cout) bf16
#   K index = dw*cin + c   (dw taps folded into the contraction)
#   N index = dh*cout + o  (dh taps folded into the output width)
# ---------------------------------------------------------------------------
def _fold_weights(w, cin_pad=None):
    cin, cout = w.shape[2], w.shape[3]
    if cin_pad is not None and cin_pad > cin:
        # padded K rows are zero so results are unchanged
        w = jnp.pad(w, ((0, 0), (0, 0), (0, cin_pad - cin), (0, 0)))
        cin = cin_pad
    wk = w.reshape(3, 3 * cin, cout)                       # [dh, dw*cin+c, o]
    ww = jnp.transpose(wk, (1, 0, 2)).reshape(3 * cin, 3 * cout)
    return ww.astype(jnp.bfloat16)


# ---------------------------------------------------------------------------
# wrapper: one fused pallas_call for the whole module
# ---------------------------------------------------------------------------
@jax.jit
def denoise_forward(params, x_nchw):
    """Forward pass.  x_nchw: (N, CIN, H, W) like the PyTorch module."""
    N, _, H, W = x_nchw.shape
    x = jnp.transpose(x_nchw, (0, 2, 3, 1))                # NCHW -> NHWC
    # One pad: spatial "same" halo for layer 1 + channel pad 84 -> 128 so the
    # layer-1 block/slab are lane-dense and all slab stores lane-aligned.
    xp = jnp.pad(x, ((0, 0), (1, 1), (1, 1), (0, CIN_PAD - CIN)))

    w1, b1 = params["net1"]
    w2, b2 = params["net2"]
    w3, b3 = params["net3"]
    w1w = _fold_weights(w1, CIN_PAD)        # (384, 192) bf16
    w2w = _fold_weights(w2)                 # (192, 192) bf16
    w3w = _fold_weights(w3)                 # (192, 192) bf16
    b1 = b1.reshape(1, CMID)
    b2 = b2.reshape(1, CMID)
    b3 = b3.reshape(1, COUT)

    # VMEM budget: double-buffered blocks + persistent scratch + headroom.
    blk_bytes = ((H + 2) * (W + 2) * CIN_PAD * 4            # input block
                 + H * W * COUT * 4                          # output block
                 + (w1w.size + w2w.size + w3w.size) * 2      # weights (bf16)
                 + 3 * COUT * 4)                             # biases
    scratch_bytes = ((H + 2) * W * 3 * CIN_PAD * 2           # slab1 bf16
                     + (H + 2) * (W + 2) * CMID * 4          # pad_mid f32
                     + (H + 2) * W * 3 * CMID * 2)           # slab_mid bf16
    vmem_limit = int(min(64 << 20, 2 * blk_bytes + scratch_bytes + (16 << 20)))

    # MXU work (includes the halo rows / padded K actually issued).
    flops = 2 * N * (H + 2) * W * (3 * CIN_PAD * 3 * CMID
                                   + 3 * CMID * 3 * CMID
                                   + 3 * CMID * 3 * COUT)
    bytes_accessed = (xp.size * 4
                      + (w1w.size + w2w.size + w3w.size) * 2
                      + 3 * COUT * 4
                      + N * H * W * COUT * 4)

    kernel = functools.partial(_denoise_kernel, H=H, W=W)

    out_nhwc = pl.pallas_call(
        kernel,
        out_shape=jax.ShapeDtypeStruct((N, H, W, COUT), jnp.float32),
        grid_spec=pltpu.PrefetchScalarGridSpec(
            num_scalar_prefetch=0,
            grid=(N,),
            in_specs=[
                pl.BlockSpec((1, H + 2, W + 2, CIN_PAD), lambda n: (n, 0, 0, 0)),
                pl.BlockSpec((3 * CIN_PAD, 3 * CMID), lambda n: (0, 0)),
                pl.BlockSpec((3 * CMID, 3 * CMID), lambda n: (0, 0)),
                pl.BlockSpec((3 * CMID, 3 * COUT), lambda n: (0, 0)),
                pl.BlockSpec((1, CMID), lambda n: (0, 0)),
                pl.BlockSpec((1, CMID), lambda n: (0, 0)),
                pl.BlockSpec((1, COUT), lambda n: (0, 0)),
            ],
            out_specs=pl.BlockSpec((1, H, W, COUT), lambda n: (n, 0, 0, 0)),
            scratch_shapes=[
                pltpu.VMEM((H + 2, W, 3 * CIN_PAD), jnp.bfloat16),
                pltpu.VMEM((H + 2, W + 2, CMID), jnp.float32),
                pltpu.VMEM((H + 2, W, 3 * CMID), jnp.bfloat16),
            ],
        ),
        compiler_params=pltpu.CompilerParams(
            dimension_semantics=("parallel",),
            vmem_limit_bytes=vmem_limit),
        cost_estimate=pl.CostEstimate(
            flops=flops, transcendentals=0, bytes_accessed=bytes_accessed),
    )(xp, w1w, w2w, w3w, b1, b2, b3)

    return jnp.transpose(out_nhwc, (0, 3, 1, 2))            # NHWC -> NCHW


# ---------------------------------------------------------------------------
# parameter init (deterministic, matches the Conv2d shapes of Denoise)
# ---------------------------------------------------------------------------
def init_denoise_params(key):
    def conv_init(k, cin, cout):
        kw, kb = jax.random.split(k)
        fan_in = cin * 3 * 3
        bound = 1.0 / jnp.sqrt(fan_in)
        # weights stored HWIO: (3, 3, Cin, Cout)
        w = jax.random.uniform(kw, (3, 3, cin, cout), jnp.float32,
                               -bound, bound)
        b = jax.random.uniform(kb, (cout,), jnp.float32, -bound, bound)
        return w, b

    k1, k2, k3 = jax.random.split(key, 3)
    return {
        "net1": conv_init(k1, CIN, CMID),
        "net2": conv_init(k2, CMID, CMID),
        "net3": conv_init(k3, CMID, COUT),
    }


# ---------------------------------------------------------------------------
# Pure-JAX f32 reference (for correctness check)
# ---------------------------------------------------------------------------
def _conv_ref(x_nhwc, w_hwio, b, relu):
    y = jax.lax.conv_general_dilated(
        x_nhwc, w_hwio, window_strides=(1, 1), padding="SAME",
        dimension_numbers=("NHWC", "HWIO", "NHWC"))
    y = y + b[None, None, None, :]
    return jnp.maximum(y, 0.0) if relu else y


def denoise_ref(params, x_nchw):
    x = jnp.transpose(x_nchw, (0, 2, 3, 1))
    w1, b1 = params["net1"]
    w2, b2 = params["net2"]
    w3, b3 = params["net3"]
    h1 = _conv_ref(x, w1, b1, True)
    h2 = _conv_ref(h1, w2, b2, True)
    out = _conv_ref(h2, w3, b3, False)
    return jnp.transpose(out, (0, 3, 1, 2))


if __name__ == "__main__":
    key = jax.random.PRNGKey(0)
    kp, kx = jax.random.split(key)

    params = init_denoise_params(kp)

    N, H, W = 2, 16, 16
    x = jax.random.normal(kx, (N, CIN, H, W), jnp.float32)

    out = jax.block_until_ready(denoise_forward(params, x))
    ref = jax.block_until_ready(denoise_ref(params, x))

    assert out.shape == (N, COUT, H, W)
    max_err = float(jnp.max(jnp.abs(out - ref)))
    # bf16 MXU inputs with f32 accumulation vs pure-f32 reference
    # (intentional approximation).
    assert jnp.allclose(out, ref, atol=5e-2, rtol=5e-2), max_err

    print("KERNEL_OK")
</pallas_src>

<mosaic_0001>
module attributes {stable_mosaic.version = 11 : i64} {
  func.func @_denoise_kernel(%arg0: i32, %arg1: memref<1x18x18x128xf32, #tpu.memory_space<vmem>>, %arg2: memref<384x192xbf16, #tpu.memory_space<vmem>>, %arg3: memref<192x192xbf16, #tpu.memory_space<vmem>>, %arg4: memref<192x192xbf16, #tpu.memory_space<vmem>>, %arg5: memref<1x64xf32, #tpu.memory_space<vmem>>, %arg6: memref<1x64xf32, #tpu.memory_space<vmem>>, %arg7: memref<1x64xf32, #tpu.memory_space<vmem>>, %arg8: memref<1x16x16x64xf32, #tpu.memory_space<vmem>>, %arg9: memref<18x16x384xbf16, #tpu.memory_space<vmem>>, %arg10: memref<18x18x64xf32, #tpu.memory_space<vmem>>, %arg11: memref<18x16x192xbf16, #tpu.memory_space<vmem>>) attributes {dimension_semantics = [#tpu.dimension_semantics<parallel>], iteration_bounds = array<i64: 2>, scalar_prefetch = 0 : i64, scratch_operands = 3 : i64, tpu.core_type = #tpu.core_type<tc>, window_params = [{transform_indices = @transform_0, window_bounds = array<i64: 1, 18, 18, 128>}, {pipeline_mode = #tpu.pipeline_mode<synchronous>, transform_indices = @transform_1, window_bounds = array<i64: 384, 192>}, {pipeline_mode = #tpu.pipeline_mode<synchronous>, transform_indices = @transform_2, window_bounds = array<i64: 192, 192>}, {pipeline_mode = #tpu.pipeline_mode<synchronous>, transform_indices = @transform_3, window_bounds = array<i64: 192, 192>}, {pipeline_mode = #tpu.pipeline_mode<synchronous>, transform_indices = @transform_4, window_bounds = array<i64: 1, 64>}, {pipeline_mode = #tpu.pipeline_mode<synchronous>, transform_indices = @transform_5, window_bounds = array<i64: 1, 64>}, {pipeline_mode = #tpu.pipeline_mode<synchronous>, transform_indices = @transform_6, window_bounds = array<i64: 1, 64>}, {transform_indices = @transform_7, window_bounds = array<i64: 1, 16, 16, 64>}]} {
    %c0 = arith.constant 0 : index
    %c0_0 = arith.constant 0 : index
    %c0_1 = arith.constant 0 : index
    %c0_2 = arith.constant 0 : index
    %0 = vector.load %arg1[%c0, %c0_0, %c0_1, %c0_2] : memref<1x18x18x128xf32, #tpu.memory_space<vmem>>, vector<1x18x16x128xf32>
    %1 = vector.shape_cast %0 : vector<1x18x16x128xf32> to vector<18x16x128xf32>
    %2 = arith.truncf %1 : vector<18x16x128xf32> to vector<18x16x128xbf16>
    %c0_3 = arith.constant 0 : index
    %c0_4 = arith.constant 0 : index
    %c0_5 = arith.constant 0 : index
    %3 = vector.load %arg9[%c0_3, %c0_4, %c0_5] : memref<18x16x384xbf16, #tpu.memory_space<vmem>>, vector<18x16x128xbf16>
    tpu.vector_store %arg9[%c0_3, %c0_4, %c0_5], %2 {strides = array<i32>} : memref<18x16x384xbf16, #tpu.memory_space<vmem>>, vector<18x16x128xbf16>,
    %c0_6 = arith.constant 0 : index
    %c0_7 = arith.constant 0 : index
    %c1 = arith.constant 1 : index
    %c0_8 = arith.constant 0 : index
    %4 = vector.load %arg1[%c0_6, %c0_7, %c1, %c0_8] : memref<1x18x18x128xf32, #tpu.memory_space<vmem>>, vector<1x18x16x128xf32>
    %5 = vector.shape_cast %4 : vector<1x18x16x128xf32> to vector<18x16x128xf32>
    %6 = arith.truncf %5 : vector<18x16x128xf32> to vector<18x16x128xbf16>
    %c0_9 = arith.constant 0 : index
    %c0_10 = arith.constant 0 : index
    %c128 = arith.constant 128 : index
    %7 = vector.load %arg9[%c0_9, %c0_10, %c128] : memref<18x16x384xbf16, #tpu.memory_space<vmem>>, vector<18x16x128xbf16>
    tpu.vector_store %arg9[%c0_9, %c0_10, %c128], %6 {strides = array<i32>} : memref<18x16x384xbf16, #tpu.memory_space<vmem>>, vector<18x16x128xbf16>,
    %c0_11 = arith.constant 0 : index
    %c0_12 = arith.constant 0 : index
    %c2 = arith.constant 2 : index
    %c0_13 = arith.constant 0 : index
    %8 = vector.load %arg1[%c0_11, %c0_12, %c2, %c0_13] : memref<1x18x18x128xf32, #tpu.memory_space<vmem>>, vector<1x18x16x128xf32>
    %9 = vector.shape_cast %8 : vector<1x18x16x128xf32> to vector<18x16x128xf32>
    %10 = arith.truncf %9 : vector<18x16x128xf32> to vector<18x16x128xbf16>
    %c0_14 = arith.constant 0 : index
    %c0_15 = arith.constant 0 : index
    %c256 = arith.constant 256 : index
    %11 = vector.load %arg9[%c0_14, %c0_15, %c256] : memref<18x16x384xbf16, #tpu.memory_space<vmem>>, vector<18x16x128xbf16>
    tpu.vector_store %arg9[%c0_14, %c0_15, %c256], %10 {strides = array<i32>} : memref<18x16x384xbf16, #tpu.memory_space<vmem>>, vector<18x16x128xbf16>,
    %c0_16 = arith.constant 0 : index
    %c0_17 = arith.constant 0 : index
    %c0_18 = arith.constant 0 : index
    %12 = vector.load %arg9[%c0_16, %c0_17, %c0_18] : memref<18x16x384xbf16, #tpu.memory_space<vmem>>, vector<18x16x384xbf16>
    %13 = vector.shape_cast %12 : vector<18x16x384xbf16> to vector<288x384xbf16>
    %c0_19 = arith.constant 0 : index
    %c0_20 = arith.constant 0 : index
    %14 = vector.load %arg2[%c0_19, %c0_20] : memref<384x192xbf16, #tpu.memory_space<vmem>>, vector<384x192xbf16>
    %cst = arith.constant dense<0.000000e+00> : vector<288x192xf32>
    %15 = tpu.matmul %13, %14, %cst {dimension_numbers = #tpu.dot_dimension_numbers<[1], [0], [0], [1], [0, 0, 1, 1], [], []>} : vector<288x384xbf16>, vector<384x192xbf16>, vector<288x192xf32> -> vector<288x192xf32>
    %16 = vector.shape_cast %15 : vector<288x192xf32> to vector<18x16x192xf32>
    %17 = vector.extract_strided_slice %16 {offsets = [0, 0, 0], sizes = [16, 16, 64], strides = [1, 1, 1]} : vector<18x16x192xf32> to vector<16x16x64xf32>
    %18 = vector.extract_strided_slice %16 {offsets = [1, 0, 64], sizes = [16, 16, 64], strides = [1, 1, 1]} : vector<18x16x192xf32> to vector<16x16x64xf32>
    %19 = arith.addf %17, %18 : vector<16x16x64xf32>
    %20 = vector.extract_strided_slice %16 {offsets = [2, 0, 128], sizes = [16, 16, 64], strides = [1, 1, 1]} : vector<18x16x192xf32> to vector<16x16x64xf32>
    %21 = arith.addf %19, %20 : vector<16x16x64xf32>
    %c0_21 = arith.constant 0 : index
    %c0_22 = arith.constant 0 : index
    %22 = vector.load %arg5[%c0_21, %c0_22] : memref<1x64xf32, #tpu.memory_space<vmem>>, vector<1x64xf32>
    %23 = vector.shape_cast %22 : vector<1x64xf32> to vector<1x1x64xf32>
    %24 = vector.broadcast %23 : vector<1x1x64xf32> to vector<16x16x64xf32>
    %25 = arith.addf %21, %24 : vector<16x16x64xf32>
    %cst_23 = arith.constant 0.000000e+00 : f32
    %26 = vector.broadcast %cst_23 : f32 to vector<16x16x64xf32>
    %27 = arith.maximumf %25, %26 : vector<16x16x64xf32>
    %cst_24 = arith.constant 0.000000e+00 : f32
    %28 = vector.broadcast %cst_24 : f32 to vector<1x18x64xf32>
    %c0_25 = arith.constant 0 : index
    %c0_26 = arith.constant 0 : index
    %c0_27 = arith.constant 0 : index
    %29 = vector.load %arg10[%c0_25, %c0_26, %c0_27] : memref<18x18x64xf32, #tpu.memory_space<vmem>>, vector<1x18x64xf32>
    tpu.vector_store %arg10[%c0_25, %c0_26, %c0_27], %28 {strides = array<i32>} : memref<18x18x64xf32, #tpu.memory_space<vmem>>, vector<1x18x64xf32>,
    %cst_28 = arith.constant 0.000000e+00 : f32
    %30 = vector.broadcast %cst_28 : f32 to vector<1x18x64xf32>
    %c17 = arith.constant 17 : index
    %c0_29 = arith.constant 0 : index
    %c0_30 = arith.constant 0 : index
    %31 = vector.load %arg10[%c17, %c0_29, %c0_30] : memref<18x18x64xf32, #tpu.memory_space<vmem>>, vector<1x18x64xf32>
    tpu.vector_store %arg10[%c17, %c0_29, %c0_30], %30 {strides = array<i32>} : memref<18x18x64xf32, #tpu.memory_space<vmem>>, vector<1x18x64xf32>,
    %cst_31 = arith.constant 0.000000e+00 : f32
    %32 = vector.broadcast %cst_31 : f32 to vector<18x1x64xf32>
    %c0_32 = arith.constant 0 : index
    %c0_33 = arith.constant 0 : index
    %c0_34 = arith.constant 0 : index
    %33 = vector.load %arg10[%c0_32, %c0_33, %c0_34] : memref<18x18x64xf32, #tpu.memory_space<vmem>>, vector<18x1x64xf32>
    tpu.vector_store %arg10[%c0_32, %c0_33, %c0_34], %32 {strides = array<i32>} : memref<18x18x64xf32, #tpu.memory_space<vmem>>, vector<18x1x64xf32>,
    %cst_35 = arith.constant 0.000000e+00 : f32
    %34 = vector.broadcast %cst_35 : f32 to vector<18x1x64xf32>
    %c0_36 = arith.constant 0 : index
    %c17_37 = arith.constant 17 : index
    %c0_38 = arith.constant 0 : index
    %35 = vector.load %arg10[%c0_36, %c17_37, %c0_38] : memref<18x18x64xf32, #tpu.memory_space<vmem>>, vector<18x1x64xf32>
    tpu.vector_store %arg10[%c0_36, %c17_37, %c0_38], %34 {strides = array<i32>} : memref<18x18x64xf32, #tpu.memory_space<vmem>>, vector<18x1x64xf32>,
    %c1_39 = arith.constant 1 : index
    %c1_40 = arith.constant 1 : index
    %c0_41 = arith.constant 0 : index
    %36 = vector.load %arg10[%c1_39, %c1_40, %c0_41] : memref<18x18x64xf32, #tpu.memory_space<vmem>>, vector<16x16x64xf32>
    tpu.vector_store %arg10[%c1_39, %c1_40, %c0_41], %27 {strides = array<i32>} : memref<18x18x64xf32, #tpu.memory_space<vmem>>, vector<16x16x64xf32>,
    %c0_42 = arith.constant 0 : index
    %c0_43 = arith.constant 0 : index
    %c0_44 = arith.constant 0 : index
    %37 = vector.load %arg10[%c0_42, %c0_43, %c0_44] : memref<18x18x64xf32, #tpu.memory_space<vmem>>, vector<18x16x64xf32>
    %38 = arith.truncf %37 : vector<18x16x64xf32> to vector<18x16x64xbf16>
    %c0_45 = arith.constant 0 : index
    %c0_46 = arith.constant 0 : index
    %c0_47 = arith.constant 0 : index
    %39 = vector.load %arg11[%c0_45, %c0_46, %c0_47] : memref<18x16x192xbf16, #tpu.memory_space<vmem>>, vector<18x16x64xbf16>
    tpu.vector_store %arg11[%c0_45, %c0_46, %c0_47], %38 {strides = array<i32>} : memref<18x16x192xbf16, #tpu.memory_space<vmem>>, vector<18x16x64xbf16>,
    %c0_48 = arith.constant 0 : index
    %c1_49 = arith.constant 1 : index
    %c0_50 = arith.constant 0 : index
    %40 = vector.load %arg10[%c0_48, %c1_49, %c0_50] : memref<18x18x64xf32, #tpu.memory_space<vmem>>, vector<18x16x64xf32>
    %41 = arith.truncf %40 : vector<18x16x64xf32> to vector<18x16x64xbf16>
    %c0_51 = arith.constant 0 : index
    %c0_52 = arith.constant 0 : index
    %c64 = arith.constant 64 : index
    %42 = vector.load %arg11[%c0_51, %c0_52, %c64] : memref<18x16x192xbf16, #tpu.memory_space<vmem>>, vector<18x16x64xbf16>
    tpu.vector_store %arg11[%c0_51, %c0_52, %c64], %41 {strides = array<i32>} : memref<18x16x192xbf16, #tpu.memory_space<vmem>>, vector<18x16x64xbf16>,
    %c0_53 = arith.constant 0 : index
    %c2_54 = arith.constant 2 : index
    %c0_55 = arith.constant 0 : index
    %43 = vector.load %arg10[%c0_53, %c2_54, %c0_55] : memref<18x18x64xf32, #tpu.memory_space<vmem>>, vector<18x16x64xf32>
    %44 = arith.truncf %43 : vector<18x16x64xf32> to vector<18x16x64xbf16>
    %c0_56 = arith.constant 0 : index
    %c0_57 = arith.constant 0 : index
    %c128_58 = arith.constant 128 : index
    %45 = vector.load %arg11[%c0_56, %c0_57, %c128_58] : memref<18x16x192xbf16, #tpu.memory_space<vmem>>, vector<18x16x64xbf16>
    tpu.vector_store %arg11[%c0_56, %c0_57, %c128_58], %44 {strides = array<i32>} : memref<18x16x192xbf16, #tpu.memory_space<vmem>>, vector<18x16x64xbf16>,
    %c0_59 = arith.constant 0 : index
    %c0_60 = arith.constant 0 : index
    %c0_61 = arith.constant 0 : index
    %46 = vector.load %arg11[%c0_59, %c0_60, %c0_61] : memref<18x16x192xbf16, #tpu.memory_space<vmem>>, vector<18x16x192xbf16>
    %47 = vector.shape_cast %46 : vector<18x16x192xbf16> to vector<288x192xbf16>
    %c0_62 = arith.constant 0 : index
    %c0_63 = arith.constant 0 : index
    %48 = vector.load %arg3[%c0_62, %c0_63] : memref<192x192xbf16, #tpu.memory_space<vmem>>, vector<192x192xbf16>
    %cst_64 = arith.constant dense<0.000000e+00> : vector<288x192xf32>
    %49 = tpu.matmul %47, %48, %cst_64 {dimension_numbers = #tpu.dot_dimension_numbers<[1], [0], [0], [1], [0, 0, 1, 1], [], []>} : vector<288x192xbf16>, vector<192x192xbf16>, vector<288x192xf32> -> vector<288x192xf32>
    %50 = vector.shape_cast %49 : vector<288x192xf32> to vector<18x16x192xf32>
    %51 = vector.extract_strided_slice %50 {offsets = [0, 0, 0], sizes = [16, 16, 64], strides = [1, 1, 1]} : vector<18x16x192xf32> to vector<16x16x64xf32>
    %52 = vector.extract_strided_slice %50 {offsets = [1, 0, 64], sizes = [16, 16, 64], strides = [1, 1, 1]} : vector<18x16x192xf32> to vector<16x16x64xf32>
    %53 = arith.addf %51, %52 : vector<16x16x64xf32>
    %54 = vector.extract_strided_slice %50 {offsets = [2, 0, 128], sizes = [16, 16, 64], strides = [1, 1, 1]} : vector<18x16x192xf32> to vector<16x16x64xf32>
    %55 = arith.addf %53, %54 : vector<16x16x64xf32>
    %c0_65 = arith.constant 0 : index
    %c0_66 = arith.constant 0 : index
    %56 = vector.load %arg6[%c0_65, %c0_66] : memref<1x64xf32, #tpu.memory_space<vmem>>, vector<1x64xf32>
    %57 = vector.shape_cast %56 : vector<1x64xf32> to vector<1x1x64xf32>
    %58 = vector.broadcast %57 : vector<1x1x64xf32> to vector<16x16x64xf32>
    %59 = arith.addf %55, %58 : vector<16x16x64xf32>
    %cst_67 = arith.constant 0.000000e+00 : f32
    %60 = vector.broadcast %cst_67 : f32 to vector<16x16x64xf32>
    %61 = arith.maximumf %59, %60 : vector<16x16x64xf32>
    %c1_68 = arith.constant 1 : index
    %c1_69 = arith.constant 1 : index
    %c0_70 = arith.constant 0 : index
    %62 = vector.load %arg10[%c1_68, %c1_69, %c0_70] : memref<18x18x64xf32, #tpu.memory_space<vmem>>, vector<16x16x64xf32>
    tpu.vector_store %arg10[%c1_68, %c1_69, %c0_70], %61 {strides = array<i32>} : memref<18x18x64xf32, #tpu.memory_space<vmem>>, vector<16x16x64xf32>,
    %c0_71 = arith.constant 0 : index
    %c0_72 = arith.constant 0 : index
    %c0_73 = arith.constant 0 : index
    %63 = vector.load %arg10[%c0_71, %c0_72, %c0_73] : memref<18x18x64xf32, #tpu.memory_space<vmem>>, vector<18x16x64xf32>
    %64 = arith.truncf %63 : vector<18x16x64xf32> to vector<18x16x64xbf16>
    %c0_74 = arith.constant 0 : index
    %c0_75 = arith.constant 0 : index
    %c0_76 = arith.constant 0 : index
    %65 = vector.load %arg11[%c0_74, %c0_75, %c0_76] : memref<18x16x192xbf16, #tpu.memory_space<vmem>>, vector<18x16x64xbf16>
    tpu.vector_store %arg11[%c0_74, %c0_75, %c0_76], %64 {strides = array<i32>} : memref<18x16x192xbf16, #tpu.memory_space<vmem>>, vector<18x16x64xbf16>,
    %c0_77 = arith.constant 0 : index
    %c1_78 = arith.constant 1 : index
    %c0_79 = arith.constant 0 : index
    %66 = vector.load %arg10[%c0_77, %c1_78, %c0_79] : memref<18x18x64xf32, #tpu.memory_space<vmem>>, vector<18x16x64xf32>
    %67 = arith.truncf %66 : vector<18x16x64xf32> to vector<18x16x64xbf16>
    %c0_80 = arith.constant 0 : index
    %c0_81 = arith.constant 0 : index
    %c64_82 = arith.constant 64 : index
    %68 = vector.load %arg11[%c0_80, %c0_81, %c64_82] : memref<18x16x192xbf16, #tpu.memory_space<vmem>>, vector<18x16x64xbf16>
    tpu.vector_store %arg11[%c0_80, %c0_81, %c64_82], %67 {strides = array<i32>} : memref<18x16x192xbf16, #tpu.memory_space<vmem>>, vector<18x16x64xbf16>,
    %c0_83 = arith.constant 0 : index
    %c2_84 = arith.constant 2 : index
    %c0_85 = arith.constant 0 : index
    %69 = vector.load %arg10[%c0_83, %c2_84, %c0_85] : memref<18x18x64xf32, #tpu.memory_space<vmem>>, vector<18x16x64xf32>
    %70 = arith.truncf %69 : vector<18x16x64xf32> to vector<18x16x64xbf16>
    %c0_86 = arith.constant 0 : index
    %c0_87 = arith.constant 0 : index
    %c128_88 = arith.constant 128 : index
    %71 = vector.load %arg11[%c0_86, %c0_87, %c128_88] : memref<18x16x192xbf16, #tpu.memory_space<vmem>>, vector<18x16x64xbf16>
    tpu.vector_store %arg11[%c0_86, %c0_87, %c128_88], %70 {strides = array<i32>} : memref<18x16x192xbf16, #tpu.memory_space<vmem>>, vector<18x16x64xbf16>,
    %c0_89 = arith.constant 0 : index
    %c0_90 = arith.constant 0 : index
    %c0_91 = arith.constant 0 : index
    %72 = vector.load %arg11[%c0_89, %c0_90, %c0_91] : memref<18x16x192xbf16, #tpu.memory_space<vmem>>, vector<18x16x192xbf16>
    %73 = vector.shape_cast %72 : vector<18x16x192xbf16> to vector<288x192xbf16>
    %c0_92 = arith.constant 0 : index
    %c0_93 = arith.constant 0 : index
    %74 = vector.load %arg4[%c0_92, %c0_93] : memref<192x192xbf16, #tpu.memory_space<vmem>>, vector<192x192xbf16>
    %cst_94 = arith.constant dense<0.000000e+00> : vector<288x192xf32>
    %75 = tpu.matmul %73, %74, %cst_94 {dimension_numbers = #tpu.dot_dimension_numbers<[1], [0], [0], [1], [0, 0, 1, 1], [], []>} : vector<288x192xbf16>, vector<192x192xbf16>, vector<288x192xf32> -> vector<288x192xf32>
    %76 = vector.shape_cast %75 : vector<288x192xf32> to vector<18x16x192xf32>
    %77 = vector.extract_strided_slice %76 {offsets = [0, 0, 0], sizes = [16, 16, 64], strides = [1, 1, 1]} : vector<18x16x192xf32> to vector<16x16x64xf32>
    %78 = vector.extract_strided_slice %76 {offsets = [1, 0, 64], sizes = [16, 16, 64], strides = [1, 1, 1]} : vector<18x16x192xf32> to vector<16x16x64xf32>
    %79 = arith.addf %77, %78 : vector<16x16x64xf32>
    %80 = vector.extract_strided_slice %76 {offsets = [2, 0, 128], sizes = [16, 16, 64], strides = [1, 1, 1]} : vector<18x16x192xf32> to vector<16x16x64xf32>
    %81 = arith.addf %79, %80 : vector<16x16x64xf32>
    %c0_95 = arith.constant 0 : index
    %c0_96 = arith.constant 0 : index
    %82 = vector.load %arg7[%c0_95, %c0_96] : memref<1x64xf32, #tpu.memory_space<vmem>>, vector<1x64xf32>
    %83 = vector.shape_cast %82 : vector<1x64xf32> to vector<1x1x64xf32>
    %84 = vector.broadcast %83 : vector<1x1x64xf32> to vector<16x16x64xf32>
    %85 = arith.addf %81, %84 : vector<16x16x64xf32>
    %c0_97 = arith.constant 0 : index
    %c0_98 = arith.constant 0 : index
    %c0_99 = arith.constant 0 : index
    %c0_100 = arith.constant 0 : index
    %86 = vector.load %arg8[%c0_97, %c0_98, %c0_99, %c0_100] : memref<1x16x16x64xf32, #tpu.memory_space<vmem>>, vector<1x16x16x64xf32>
    %87 = vector.shape_cast %86 : vector<1x16x16x64xf32> to vector<16x16x64xf32>
    %88 = vector.shape_cast %85 : vector<16x16x64xf32> to vector<1x16x16x64xf32>
    tpu.vector_store %arg8[%c0_97, %c0_98, %c0_99, %c0_100], %88 {strides = array<i32>} : memref<1x16x16x64xf32, #tpu.memory_space<vmem>>, vector<1x16x16x64xf32>,
    return
  }
  func.func @transform_0(%arg0: i32) -> (i32, i32, i32, i32) {
    %c0_i32 = arith.constant 0 : i32
    %c0_i32_0 = arith.constant 0 : i32
    %c0_i32_1 = arith.constant 0 : i32
    %c0_i32_2 = arith.constant 0 : i32
    return %arg0, %c0_i32, %c0_i32_0, %c0_i32_1 : i32, i32, i32, i32
  }
  func.func @transform_1(%arg0: i32) -> (i32, i32) {
    %c0_i32 = arith.constant 0 : i32
    %c0_i32_0 = arith.constant 0 : i32
    %c0_i32_1 = arith.constant 0 : i32
    return %c0_i32, %c0_i32_0 : i32, i32
  }
  func.func @transform_2(%arg0: i32) -> (i32, i32) {
    %c0_i32 = arith.constant 0 : i32
    %c0_i32_0 = arith.constant 0 : i32
    %c0_i32_1 = arith.constant 0 : i32
    return %c0_i32, %c0_i32_0 : i32, i32
  }
  func.func @transform_3(%arg0: i32) -> (i32, i32) {
    %c0_i32 = arith.constant 0 : i32
    %c0_i32_0 = arith.constant 0 : i32
    %c0_i32_1 = arith.constant 0 : i32
    return %c0_i32, %c0_i32_0 : i32, i32
  }
  func.func @transform_4(%arg0: i32) -> (i32, i32) {
    %c0_i32 = arith.constant 0 : i32
    %c0_i32_0 = arith.constant 0 : i32
    %c0_i32_1 = arith.constant 0 : i32
    return %c0_i32, %c0_i32_0 : i32, i32
  }
  func.func @transform_5(%arg0: i32) -> (i32, i32) {
    %c0_i32 = arith.constant 0 : i32
    %c0_i32_0 = arith.constant 0 : i32
    %c0_i32_1 = arith.constant 0 : i32
    return %c0_i32, %c0_i32_0 : i32, i32
  }
  func.func @transform_6(%arg0: i32) -> (i32, i32) {
    %c0_i32 = arith.constant 0 : i32
    %c0_i32_0 = arith.constant 0 : i32
    %c0_i32_1 = arith.constant 0 : i32
    return %c0_i32, %c0_i32_0 : i32, i32
  }
  func.func @transform_7(%arg0: i32) -> (i32, i32, i32, i32) {
    %c0_i32 = arith.constant 0 : i32
    %c0_i32_0 = arith.constant 0 : i32
    %c0_i32_1 = arith.constant 0 : i32
    %c0_i32_2 = arith.constant 0 : i32
    return %arg0, %c0_i32, %c0_i32_0, %c0_i32_1 : i32, i32, i32, i32
  }
}

</mosaic_0001>

<bundles_post_ra>
// kernel: denoise_forward.1
= control target key start
LH: loop header
LB: loop body
LE: loop exit
PB: predicated region body
PF: predicated region fallthrough
CT: control target
= control target key end

     0   :  { %12 = vsyncpa [#allocation6], 0  ;;  %s5954_s0 = inlined_call_operand.vmem [shape: f32[2,18,18,128], index: 0, kind: input, shape index: {}]   ;;  %s5955_s1 = inlined_call_operand.vmem [shape: bf16[384,192], index: 1, kind: input, shape index: {}]   ;;  %s5956_s2 = inlined_call_operand.vmem [shape: bf16[192,192], index: 2, kind: input, shape index: {}]   ;;  %s5957_s3 = inlined_call_operand.vmem [shape: bf16[192,192], index: 3, kind: input, shape index: {}]   ;;  %s5958_s4 = inlined_call_operand.vmem [shape: f32[1,64], index: 4, kind: input, shape index: {}]   ;;  %s5959_s5 = inlined_call_operand.vmem [shape: f32[1,64], index: 5, kind: input, shape index: {}]   ;;  %s5960_s6 = inlined_call_operand.vmem [shape: f32[1,64], index: 6, kind: input, shape index: {}]   ;;  %s5961_s7 = inlined_call_operand.hbm [shape: f32[2,16,16,64], index: 7, kind: output, shape index: {}]  }
   0x1   :  { %14 = vsyncpa [#allocation6 + $0x1], 0  ;;  %s4195_s24 = smov 0   ;;  %s4197_s25 = smov 0  }
   0x2   :  { %s4199_s26 = smov 0   ;;  %s4201_s27 = smov 0  }
   0x3 LB: > { %s4216_s28 = sadd.s32 4294967295, %s4147_s27   ;;  %s3685_s29 = sadd.s32 4294967294, %s4147_s27   ;;  %s4147_s27 = sphi %s4201_s27, %s5996_s27   ;;  %s4143_s26 = sphi %s4199_s26, %s5995_s26   ;;  %s4139_s25 = sphi %s4197_s25, %s5994_s25   ;;  %s4135_s24 = sphi %s4195_s24, %s5993_s24  }
   0x4   : > { %s4220_s30 = sadd.s32 1, %s4147_s27   ;;  %s179_s8 = sadd.s32 1, %s4143_s26 }
   0x5   : > { %s176_s9 = ssub.s32 %s4147_s27, %s4220_s30  ;;  %p189_p0 = scmp.ne.s32.totalorder %s4143_s26, %s4139_s25 }
   0x6   : > { %p177_p1 = scmp.eq.s32.totalorder %s176_s9, 0  ;;  %p190_p2 = scmp.eq.s32.totalorder %s4216_s28, 1 }
   0x7   : > { %p195_p3 = scmp.ne.s32.totalorder %s4139_s25, %s4135_s24  ;;  %p196_p4 = scmp.eq.s32.totalorder %s3685_s29, 1 }
   0x8   : > { %s4231_s10 = scalar_select %p177_p1, %s4143_s26, %s179_s8  }
   0x9   : > { %p4233_p5 = por %p190_p2, %p189_p0  ;;  %p4237_p6 = por %p196_p4, %p195_p3 }
   0xa   : > { %p3688_p7 = scmp.ge.s32.totalorder %s4147_s27, 1  ;;  %p240_p8 = scmp.lt.s32.totalorder %s4147_s27, 3 }
   0xc   : > { %p241_p9 = pnand %p3688_p7, %p240_p8 }
   0xe   : > { %244 = sbr.rel (%p241_p9) target bundleno = 1707 (0x6ab), region = 48 }
  0x15   : > { %v3941_v0 = vld [vmem:[%s5955_s1 + $0x4] ss:$8 sps:$4 sm:$0xff]   ;;  %v3943_v1 = vld [vmem:[%s5955_s1] ss:$8 sps:$4 sm:$0xff]   ;;  %v3944_v2 = vld [vmem:[%s5955_s1 + $0x14] ss:$8 sps:$4 sm:$0xff]  }
  0x16   : > { %836 = vmatprep.subr.bf16.mxu0 %v3941_v0  ;;  %v3946_v3 = vld [vmem:[%s5955_s1 + $0x10] ss:$8 sps:$4 sm:$0xff]   ;;  %v3947_v4 = vld [vmem:[%s5955_s1 + $0x24] ss:$8 sps:$4 sm:$0xff]   ;;  %p272_p10 = scmp.lt.s32.totalorder %s4216_s28, 1  ;;  %vm1513_vm0 = vcmask 523264  }
  0x17   : > { %837 = vmatpush1.bf16.msra.mxu0 %v3943_v1  ;;  %v3949_v5 = vld [vmem:[%s5955_s1 + $0x20] ss:$8 sps:$4 sm:$0xff]   ;;  %v3950_v6 = vld [vmem:[%s5955_s1 + $0x34] ss:$8 sps:$4 sm:$0xff]   ;;  %v3952_v7 = vld [vmem:[%s5955_s1 + $0x30] ss:$8 sps:$4 sm:$0xff]  }
  0x18   : > { %838 = vmatprep.subr.bf16.mxu0 %v3944_v2  ;;  %s273_s13 = scalar_select %p272_p10, %s4216_s28, 1  ;;  %v3953_v8 = vld [vmem:[%s5955_s1 + $0x44] ss:$8 sps:$4 sm:$0xff]   ;;  %v3955_v9 = vld [vmem:[%s5955_s1 + $0x40] ss:$8 sps:$4 sm:$0xff]   ;;  %vm1516_vm1 = vcmask 517120  }
  0x19   : > { %v3956_v10 = vld [vmem:[%s5955_s1 + $0x54] ss:$8 sps:$4 sm:$0xff]   ;;  %v3958_v11 = vld [vmem:[%s5955_s1 + $0x50] ss:$8 sps:$4 sm:$0xff]   ;;  %v3959_v12 = vld [vmem:[%s5955_s1 + $0x64] ss:$8 sps:$4 sm:$0xff]  }
  0x1a   : > { %s3896_s18 = smul.u32 432, %s273_s13  ;;  %v3961_v16 = vld [vmem:[%s5955_s1 + $0x60] ss:$8 sps:$4 sm:$0xff]   ;;  %v3962_v17 = vld [vmem:[%s5955_s1 + $0x74] ss:$8 sps:$4 sm:$0xff]   ;;  %vm1522_vm2 = vcmask 516096  }
  0x1b   : > { %839 = vmatpush1.bf16.msra.mxu0 %v3946_v3  ;;  %v3964_v18 = vld [vmem:[%s5955_s1 + $0x70] ss:$8 sps:$4 sm:$0xff]   ;;  %v3965_v19 = vld [vmem:[%s5955_s1 + $0x84] ss:$8 sps:$4 sm:$0xff]   ;;  %v3967_v20 = vld [vmem:[%s5955_s1 + $0x80] ss:$8 sps:$4 sm:$0xff]  }
  0x1c   : > { %840 = vmatprep.subr.bf16.mxu0 %v3947_v4  ;;  %s4281_s8 = scalar_lea.vmem %s5954_s0, %s3896_s18  ;;  %v3968_v21 = vld [vmem:[%s5955_s1 + $0x94] ss:$8 sps:$4 sm:$0xff]   ;;  %v3970_v22 = vld [vmem:[%s5955_s1 + $0x90] ss:$8 sps:$4 sm:$0xff]   ;;  %v3971_v23 = vld [vmem:[%s5955_s1 + $0xa4] ss:$8 sps:$4 sm:$0xff]  }
  0x1d   : > { %v350_v13 = vld [vmem:[%s4281_s8 + $0x1] sm:$0xff]  ;;  %v351_v14 = vld [vmem:[%s4281_s8 + $0x9] sm:$0xff]  ;;  %v3974_v25 = vld [vmem:[%s5955_s1 + $0xb4] ss:$8 sps:$4 sm:$0xff]   ;;  %vm1790_vm3 = vcmask 1048064   ;;  %s269_s17 = sand.u32 1, %s4139_s25  }
  0x1e   : > { %v386_v15 = vpack.c.bf16 %v351_v14, %v350_v13  ;;  %v3973_v24 = vld [vmem:[%s5955_s1 + $0xa0] ss:$8 sps:$4 sm:$0xff]   ;;  %v3976_v26 = vld [vmem:[%s5955_s1 + $0xb0] ss:$8 sps:$4 sm:$0xff]   ;;  %v3977_v27 = vld [vmem:[%s5955_s1 + $0xc4] ss:$8 sps:$4 sm:$0xff]  }
  0x1f   : > { %841 = vmatpush1.bf16.msra.mxu0 %v3949_v5  ;;  %v3979_v28 = vld [vmem:[%s5955_s1 + $0xc0] ss:$8 sps:$4 sm:$0xff]   ;;  %v3980_v29 = vld [vmem:[%s5955_s1 + $0xd4] ss:$8 sps:$4 sm:$0xff]   ;;  %v3982_v30 = vld [vmem:[%s5955_s1 + $0xd0] ss:$8 sps:$4 sm:$0xff]  }
  0x20   : > { %842 = vmatprep.subr.bf16.mxu0 %v3950_v6  ;;  %868 = vmatprep.mubr.bf16.mxu0 %v386_v15  ;;  %v3983_v31 = vld [vmem:[%s5955_s1 + $0xe4] ss:$8 sps:$4 sm:$0xff]   ;;  %v3985_v32 = vld [vmem:[%s5955_s1 + $0xe0] ss:$8 sps:$4 sm:$0xff]   ;;  %v3986_v33 = vld [vmem:[%s5955_s1 + $0xf4] ss:$8 sps:$4 sm:$0xff]  }
  0x21   : > { %v3988_v34 = vld [vmem:[%s5955_s1 + $0xf0] ss:$8 sps:$4 sm:$0xff]   ;;  %v278_v35 = vld [vmem:[%s4281_s8] sm:$0xff]  ;;  %v279_v36 = vld [vmem:[%s4281_s8 + $0x8] sm:$0xff]  ;;  %s3689_s18 = sshll.u32 %s269_s17, 8  ;;  %s4152_s14 = smov [#allocation5]  }
  0x22   : > { %v3991_v37 = vld [vmem:[%s5955_s1 + $0x104] ss:$8 sps:$4 sm:$0xff]   ;;  %v352_v38 = vld [vmem:[%s4281_s8 + $0x19] sm:$0xff]  ;;  %v314_v41 = vpack.c.bf16 %v279_v36, %v278_v35  ;;  %v354_v46 = vld [vmem:[%s4281_s8 + $0x31] sm:$0xff]  ;;  %s5675_s21 = scalar_lea.vmem [#allocation5], %s3689_s18  ;;  %s4089_s15 = sshll.u32 %s4152_s14, 4  ;;  %s4090_s15 = int_to_ptr.vmem [resolvable:$false] %s4089_s15 }
  0x23   : > { %843 = vmatpush1.bf16.msra.mxu0 %v3952_v7  ;;  %v353_v39 = vld [vmem:[%s4281_s8 + $0x21] sm:$0xff]  ;;  %v3994_v42 = vld [vmem:[%s5955_s1 + $0x114] ss:$8 sps:$4 sm:$0xff]   ;;  %v3992_v48 = vld [vmem:[%s5955_s1 + $0x110] ss:$8 sps:$4 sm:$0xff]   ;;  %s3623_s22 = sshll.u32 %s5675_s21, 4  ;;  %s5904_s22 = int_to_ptr.vmem [resolvable:$true] %s3623_s22 }
  0x24   : > { %844 = vmatprep.subr.bf16.mxu0 %v3953_v8  ;;  %v3989_v40 = vld [vmem:[%s5955_s1 + $0x100] ss:$8 sps:$4 sm:$0xff]   ;;  %v387_v43 = vpack.c.bf16 %v353_v39, %v352_v38  ;;  %v280_v44 = vld [vmem:[%s4281_s8 + $0x18] sm:$0xff]  ;;  %v3997_v49 = vld [vmem:[%s5955_s1 + $0x124] ss:$8 sps:$4 sm:$0xff]   ;;  %s4085_s13 = scalar_lea.vmem %s5904_s22, 4096  ;;  %p4092_p0 = scmp.lt.s32.totalorder %s5904_s22, %s4090_s15 }
  0x25   : > { %v281_v45 = vld [vmem:[%s4281_s8 + $0x20] sm:$0xff]  ;;  %v4000_v53 = vld [vmem:[%s5955_s1 + $0x134] ss:$8 sps:$4 sm:$0xff]   ;;  %v3998_v56 = vld [vmem:[%s5955_s1 + $0x130] ss:$8 sps:$4 sm:$0xff]   ;;  %p4086_p11 = scmp.ne.s32.totalorder %s5904_s22, %s4085_s13  ;;  %s4091_s16 = scalar_lea.vmem %s4090_s15, 8192 }
  0x26   : > { %v355_v47 = vld [vmem:[%s4281_s8 + $0x39] sm:$0xff]  ;;  %v315_v51 = vpack.c.bf16 %v281_v45, %v280_v44  ;;  %v282_v54 = vld [vmem:[%s4281_s8 + $0x30] sm:$0xff]  ;;  %v4003_v59 = vld [vmem:[%s5955_s1 + $0x144] ss:$8 sps:$4 sm:$0xff]   ;;  %p4093_p1 = scmp.lt.s32.totalorder %s4091_s16, %s4085_s13 }
  0x27   : > { %845 = vmatpush1.bf16.msra.mxu0 %v3955_v9  ;;  %v3995_v50 = vld [vmem:[%s5955_s1 + $0x120] ss:$8 sps:$4 sm:$0xff]   ;;  %v388_v52 = vpack.c.bf16 %v355_v47, %v354_v46  ;;  %v283_v55 = vld [vmem:[%s4281_s8 + $0x38] sm:$0xff]  ;;  %v285_v1 = vld [vmem:[%s4281_s8 + $0x50] sm:$0xff]  ;;  %p4087_p12 = pnand %p4086_p11, %p4233_p5 }
  0x28   : > { %846 = vmatprep.subr.bf16.mxu0 %v3956_v10  ;;  %v356_v57 = vld [vmem:[%s4281_s8 + $0x49] sm:$0xff]  ;;  %v357_v58 = vld [vmem:[%s4281_s8 + $0x51] sm:$0xff]  ;;  %v316_v60 = vpack.c.bf16 %v283_v55, %v282_v54  ;;  %v358_v3 = vld [vmem:[%s4281_s8 + $0x61] sm:$0xff]  ;;  %p4094_p2 = por %p4093_p1, %p4092_p0 }
  0x29   : > { %v389_v61 = vpack.c.bf16 %v357_v58, %v356_v57  ;;  %v4001_v62 = vld [vmem:[%s5955_s1 + $0x140] ss:$8 sps:$4 sm:$0xff]   ;;  %v4006_v63 = vld [vmem:[%s5955_s1 + $0x154] ss:$8 sps:$4 sm:$0xff]   ;;  %v4004_v2 = vld [vmem:[%s5955_s1 + $0x150] ss:$8 sps:$4 sm:$0xff]   ;;  %p4088_p13 = pneg %p4087_p12 }
  0x2a   : > { %v284_v0 = vld [vmem:[%s4281_s8 + $0x48] sm:$0xff]  ;;  %v4012_v9 = vld [vmem:[%s5955_s1 + $0x174] ss:$8 sps:$4 sm:$0xff]   ;;  %v286_v10 = vld [vmem:[%s4281_s8 + $0x60] sm:$0xff] }
  0x2b   : > { %847 = vmatpush1.bf16.msra.mxu0 %v3958_v11  ;;  %v359_v4 = vld [vmem:[%s4281_s8 + $0x69] sm:$0xff]  ;;  %v317_v6 = vpack.c.bf16 %v285_v1, %v284_v0  ;;  %v360_v13 = vld [vmem:[%s4281_s8 + $0x79] sm:$0xff]  ;;  %v361_v14 = vld [vmem:[%s4281_s8 + $0x81] sm:$0xff]  ;;  %p4095_p3 = pnand %p4094_p2, %p4088_p13 }
  0x2c   : > { %848 = vmatprep.subr.bf16.mxu0 %v3959_v12  ;;  %v4009_v5 = vld [vmem:[%s5955_s1 + $0x164] ss:$8 sps:$4 sm:$0xff]   ;;  %v390_v7 = vpack.c.bf16 %v359_v4, %v358_v3  ;;  %v4007_v8 = vld [vmem:[%s5955_s1 + $0x160] ss:$8 sps:$4 sm:$0xff]   ;;  %v4010_v12 = vld [vmem:[%s5955_s1 + $0x170] ss:$8 sps:$4 sm:$0xff]  }
  0x2d   : > { %v287_v11 = vld [vmem:[%s4281_s8 + $0x68] sm:$0xff]  ;;  %v294_v35 = vld [vmem:[%s4281_s8 + $0xc0] sm:$0xff]  ;;  %v298_v47 = vld [vmem:[%s4281_s8 + $0xf0] sm:$0xff] }
  0x2e   : > { %v318_v15 = vpack.c.bf16 %v287_v11, %v286_v10  ;;  %v295_v36 = vld [vmem:[%s4281_s8 + $0xc8] sm:$0xff]  ;;  %v371_v44 = vld [vmem:[%s4281_s8 + $0xf9] sm:$0xff]  ;;  %v301_v54 = vld [vmem:[%s4281_s8 + $0x110] sm:$0xff] }
  0x2f   : > { %849 = vmatpush1.bf16.msra.mxu0 %v3961_v16  ;;  %v391_v16 = vpack.c.bf16 %v361_v14, %v360_v13  ;;  %v369_v38 = vld [vmem:[%s4281_s8 + $0xe1] sm:$0xff]  ;;  %v322_v39 = vpack.c.bf16 %v295_v36, %v294_v35  ;;  %v304_v1 = vld [vmem:[%s4281_s8 + $0x138] sm:$0xff]  ;;  %v309_v14 = vld [vmem:[%s4281_s8 + $0x170] sm:$0xff] }
  0x30   : > { %850 = vmatprep.subr.bf16.mxu0 %v3962_v17  ;;  %v288_v17 = vld [vmem:[%s4281_s8 + $0x78] sm:$0xff]  ;;  %v374_v55 = vld [vmem:[%s4281_s8 + $0x121] sm:$0xff] }
  0x31   : > { %v378_v3 = vld [vmem:[%s4281_s8 + $0x151] sm:$0xff]  ;;  %v379_v4 = vld [vmem:[%s4281_s8 + $0x159] sm:$0xff]  ;;  %v308_v13 = vld [vmem:[%s4281_s8 + $0x168] sm:$0xff] }
  0x32   : > { %v381_v10 = vld [vmem:[%s4281_s8 + $0x171] sm:$0xff]  ;;  %v427_v36 = vld [vmem:[%s4281_s8 + $0x3a] sm:$0xff] }
  0x33   : > { %851 = vmatpush1.bf16.msra.mxu0 %v3964_v18  ;;  %v289_v18 = vld [vmem:[%s4281_s8 + $0x80] sm:$0xff]  ;;  %v426_v35 = vld [vmem:[%s4281_s8 + $0x32] sm:$0xff] }
  0x34   : > { %852 = vmatprep.subr.bf16.mxu0 %v3965_v19  ;;  %v362_v19 = vld [vmem:[%s4281_s8 + $0x91] sm:$0xff] }
  0x37   : > { %853 = vmatpush1.bf16.msra.mxu0 %v3967_v20  ;;  %v363_v20 = vld [vmem:[%s4281_s8 + $0x99] sm:$0xff] }
  0x38   : > { %854 = vmatprep.subr.bf16.mxu0 %v3968_v21  ;;  %v319_v21 = vpack.c.bf16 %v289_v18, %v288_v17  ;;  %v329_v17 = vpack.c.bf16 %v309_v14, %v308_v13  ;;  %v452_v14 = vld [vmem:[%s4281_s8 + $0x16a] sm:$0xff] }
  0x3b   : > { %855 = vmatpush1.bf16.msra.mxu0 %v3970_v22  ;;  %v392_v22 = vpack.c.bf16 %v363_v20, %v362_v19  ;;  %v310_v19 = vld [vmem:[%s4281_s8 + $0x180] sm:$0xff]  ;;  %v311_v20 = vld [vmem:[%s4281_s8 + $0x188] sm:$0xff] }
  0x3c   : > { %856 = vmatprep.subr.bf16.mxu0 %v3971_v23  ;;  %v290_v23 = vld [vmem:[%s4281_s8 + $0x90] sm:$0xff] }
  0x3f   : > { %857 = vmatpush1.bf16.msra.mxu0 %v3973_v24  ;;  %v291_v24 = vld [vmem:[%s4281_s8 + $0x98] sm:$0xff] }
  0x40   : > { %858 = vmatprep.subr.bf16.mxu0 %v3974_v25  ;;  %v364_v25 = vld [vmem:[%s4281_s8 + $0xa9] sm:$0xff] }
  0x43   : > { %859 = vmatpush1.bf16.msra.mxu0 %v3976_v26  ;;  %v365_v26 = vld [vmem:[%s4281_s8 + $0xb1] sm:$0xff] }
  0x44   : > { %860 = vmatprep.subr.bf16.mxu0 %v3977_v27  ;;  %v320_v27 = vpack.c.bf16 %v291_v24, %v290_v23  ;;  %v330_v23 = vpack.c.bf16 %v311_v20, %v310_v19  ;;  %v456_v20 = vld [vmem:[%s4281_s8 + $0x19a] sm:$0xff] }
  0x47   : > { %861 = vmatpush1.bf16.msra.mxu0 %v3979_v28  ;;  %v393_v28 = vpack.c.bf16 %v365_v26, %v364_v25  ;;  %v312_v25 = vld [vmem:[%s4281_s8 + $0x198] sm:$0xff]  ;;  %v313_v26 = vld [vmem:[%s4281_s8 + $0x1a0] sm:$0xff] }
  0x48   : > { %862 = vmatprep.subr.bf16.mxu0 %v3980_v29  ;;  %v292_v29 = vld [vmem:[%s4281_s8 + $0xa8] sm:$0xff] }
  0x4b   : > { %863 = vmatpush1.bf16.msra.mxu0 %v3982_v30  ;;  %v293_v30 = vld [vmem:[%s4281_s8 + $0xb0] sm:$0xff] }
  0x4c   : > { %864 = vmatprep.subr.bf16.mxu0 %v3983_v31  ;;  %v366_v31 = vld [vmem:[%s4281_s8 + $0xc1] sm:$0xff] }
  0x4f   : > { %865 = vmatpush1.bf16.msra.mxu0 %v3985_v32  ;;  %v367_v32 = vld [vmem:[%s4281_s8 + $0xc9] sm:$0xff] }
  0x50   : > { %866 = vmatprep.subr.bf16.mxu0 %v3986_v33  ;;  %v321_v33 = vpack.c.bf16 %v293_v30, %v292_v29  ;;  %v422_v29 = vld [vmem:[%s4281_s8 + $0x2] sm:$0xff]  ;;  %v423_v30 = vld [vmem:[%s4281_s8 + $0xa] sm:$0xff] }
  0x53   : > { %867 = vmatpush1.bf16.msra.mxu0 %v3988_v34  ;;  %v394_v34 = vpack.c.bf16 %v367_v32, %v366_v31  ;;  %v458_v31 = vpack.c.bf16 %v423_v30, %v422_v29  ;;  %v424_v32 = vld [vmem:[%s4281_s8 + $0x1a] sm:$0xff] }
  0x54   : > { %1043 = vmatprep.subr.bf16.mxu0 %v3991_v37  ;;  %v368_v37 = vld [vmem:[%s4281_s8 + $0xd9] sm:$0xff] }
  0x56   : > { %869 = vmatmul.mubr.bf16.vlgmr.msra.gmra.mrb[0].mxu0 %v314_v41  ;;  %v296_v41 = vld [vmem:[%s4281_s8 + $0xd8] sm:$0xff] }
  0x57   : > { %1044 = vmatpush1.bf16.msra.mxu0 %v3989_v40  ;;  %876 = vmatprep.mubr.bf16.mxu0 %v387_v43  ;;  %v395_v40 = vpack.c.bf16 %v369_v38, %v368_v37  ;;  %v370_v43 = vld [vmem:[%s4281_s8 + $0xf1] sm:$0xff]  ;;  %v460_v37 = vpack.c.bf16 %v427_v36, %v426_v35 }
  0x58   : > { %1045 = vmatprep.subr.bf16.mxu0 %v3994_v42  ;;  %v297_v42 = vld [vmem:[%s4281_s8 + $0xe0] sm:$0xff]  ;;  %v396_v46 = vpack.c.bf16 %v371_v44, %v370_v43  ;;  %v428_v38 = vld [vmem:[%s4281_s8 + $0x4a] sm:$0xff] }
  0x59   : > { %v323_v45 = vpack.c.bf16 %v297_v42, %v296_v41  ;;  %v430_v41 = vld [vmem:[%s4281_s8 + $0x62] sm:$0xff]  ;;  %v431_v42 = vld [vmem:[%s4281_s8 + $0x6a] sm:$0xff]  ;;  %v432_v44 = vld [vmem:[%s4281_s8 + $0x7a] sm:$0xff] }
  0x5a   : > { %v462_v43 = vpack.c.bf16 %v431_v42, %v430_v41  ;;  %v4013_v42 = vld [vmem:[%s5956_s2 + $0x4] ss:$8 sps:$4 sm:$0xff]  }
  0x5b   : > { %1046 = vmatpush1.bf16.msra.mxu0 %v3992_v48  ;;  %v299_v48 = vld [vmem:[%s4281_s8 + $0xf8] sm:$0xff]  ;;  %2115 = vmatprep.subr.bf16.mxu1 %v4013_v42 }
  0x5c   : > { %1047 = vmatprep.subr.bf16.mxu0 %v3997_v49  ;;  %v372_v49 = vld [vmem:[%s4281_s8 + $0x109] sm:$0xff] }
  0x5e   : > { %877 = vmatmul.mubr.bf16.gmra.mrb[4].mxu0 %v315_v51  ;;  %v324_v51 = vpack.c.bf16 %v299_v48, %v298_v47  ;;  %v434_v47 = vld [vmem:[%s4281_s8 + $0x92] sm:$0xff]  ;;  %v435_v48 = vld [vmem:[%s4281_s8 + $0x9a] sm:$0xff] }
  0x5f   : > { %884 = vmatprep.mubr.bf16.mxu0 %v388_v52  ;;  %1048 = vmatpush1.bf16.msra.mxu0 %v3995_v50  ;;  %v373_v50 = vld [vmem:[%s4281_s8 + $0x111] sm:$0xff] }
  0x60   : > { %1049 = vmatprep.subr.bf16.mxu0 %v4000_v53  ;;  %v397_v52 = vpack.c.bf16 %v373_v50, %v372_v49  ;;  %v300_v53 = vld [vmem:[%s4281_s8 + $0x108] sm:$0xff]  ;;  %v464_v49 = vpack.c.bf16 %v435_v48, %v434_v47  ;;  %v4016_v47 = vld [vmem:[%s5956_s2 + $0x14] ss:$8 sps:$4 sm:$0xff]  }
  0x61   : > { %v325_v57 = vpack.c.bf16 %v301_v54, %v300_v53  ;;  %v436_v50 = vld [vmem:[%s4281_s8 + $0xaa] sm:$0xff]  ;;  %v438_v53 = vld [vmem:[%s4281_s8 + $0xc2] sm:$0xff] }
  0x62   : > { %v439_v54 = vld [vmem:[%s4281_s8 + $0xca] sm:$0xff] }
  0x63   : > { %1050 = vmatpush1.bf16.msra.mxu0 %v3998_v56  ;;  %v375_v56 = vld [vmem:[%s4281_s8 + $0x129] sm:$0xff] }
  0x64   : > { %1051 = vmatprep.subr.bf16.mxu0 %v4003_v59  ;;  %v398_v58 = vpack.c.bf16 %v375_v56, %v374_v55  ;;  %v302_v59 = vld [vmem:[%s4281_s8 + $0x120] sm:$0xff]  ;;  %v466_v55 = vpack.c.bf16 %v439_v54, %v438_v53 }
  0x65   : > { %v440_v56 = vld [vmem:[%s4281_s8 + $0xda] sm:$0xff] }
  0x66   : > { %885 = vmatmul.mubr.bf16.gmra.mrb[8].mxu0 %v316_v60  ;;  %v303_v60 = vld [vmem:[%s4281_s8 + $0x128] sm:$0xff] }
  0x67   : > { %894 = vmatprep.mubr.bf16.mxu0 %v389_v61  ;;  %1052 = vmatpush1.bf16.msra.mxu0 %v4001_v62  ;;  %v376_v61 = vld [vmem:[%s4281_s8 + $0x139] sm:$0xff]  ;;  %v377_v62 = vld [vmem:[%s4281_s8 + $0x141] sm:$0xff] }
  0x68   : > { %1053 = vmatprep.subr.bf16.mxu0 %v4006_v63  ;;  %v326_v63 = vpack.c.bf16 %v303_v60, %v302_v59  ;;  %v399_v0 = vpack.c.bf16 %v377_v62, %v376_v61 }
  0x6b   : > { %1054 = vmatpush1.bf16.msra.mxu0 %v4004_v2  ;;  %v305_v2 = vld [vmem:[%s4281_s8 + $0x140] sm:$0xff] }
  0x6c   : > { %1055 = vmatprep.subr.bf16.mxu0 %v4009_v5  ;;  %v327_v5 = vpack.c.bf16 %v305_v2, %v304_v1  ;;  %v444_v2 = vld [vmem:[%s4281_s8 + $0x10a] sm:$0xff] }
  0x6e   : > { %895 = vmatmul.mubr.bf16.gmra.mrb[12].mxu0 %v317_v6  ;;  %v400_v6 = vpack.c.bf16 %v379_v4, %v378_v3  ;;  %v445_v3 = vld [vmem:[%s4281_s8 + $0x112] sm:$0xff] }
  0x6f   : > { %904 = vmatprep.mubr.bf16.mxu0 %v390_v7  ;;  %1056 = vmatpush1.bf16.msra.mxu0 %v4007_v8  ;;  %v306_v7 = vld [vmem:[%s4281_s8 + $0x150] sm:$0xff]  ;;  %v307_v8 = vld [vmem:[%s4281_s8 + $0x158] sm:$0xff]  ;;  %v469_v4 = vpack.c.bf16 %v445_v3, %v444_v2  ;;  %v4031_v2 = vld [vmem:[%s5956_s2 + $0x64] ss:$8 sps:$4 sm:$0xff]  }
  0x70   : > { %1057 = vmatprep.subr.bf16.mxu0 %v4012_v9  ;;  %v380_v9 = vld [vmem:[%s4281_s8 + $0x169] sm:$0xff]  ;;  %v328_v11 = vpack.c.bf16 %v307_v8, %v306_v7  ;;  %v448_v8 = vld [vmem:[%s4281_s8 + $0x13a] sm:$0xff] }
  0x71   : > { %v4033_v3 = vld [vmem:[%s5956_s2 + $0x60] ss:$8 sps:$4 sm:$0xff]  }
  0x73   : > { %1058 = vmatpush1.bf16.msra.mxu0 %v4010_v12  ;;  %v401_v12 = vpack.c.bf16 %v381_v10, %v380_v9  ;;  %v449_v9 = vld [vmem:[%s4281_s8 + $0x142] sm:$0xff] }
  0x74   : > { %v471_v10 = vpack.c.bf16 %v449_v9, %v448_v8  ;;  %v4036_v9 = vld [vmem:[%s5956_s2 + $0x70] ss:$8 sps:$4 sm:$0xff]  }
  0x76   : > { %905 = vmatmul.mubr.bf16.gmra.mrb[16].mxu0 %v318_v15  ;;  %v382_v15 = vld [vmem:[%s4281_s8 + $0x181] sm:$0xff] }
  0x77   : > { %914 = vmatprep.mubr.bf16.mxu0 %v391_v16  ;;  %v383_v16 = vld [vmem:[%s4281_s8 + $0x189] sm:$0xff] }
  0x78   : > { %v402_v18 = vpack.c.bf16 %v383_v16, %v382_v15  ;;  %v453_v15 = vld [vmem:[%s4281_s8 + $0x172] sm:$0xff] }
  0x79   : > { %v473_v16 = vpack.c.bf16 %v453_v15, %v452_v14  ;;  %v4040_v15 = vld [vmem:[%s5956_s2 + $0x94] ss:$8 sps:$4 sm:$0xff]  }
  0x7e   : > { %915 = vmatmul.mubr.bf16.gmra.mrb[20].mxu0 %v319_v21  ;;  %v384_v21 = vld [vmem:[%s4281_s8 + $0x199] sm:$0xff] }
  0x7f   : > { %924 = vmatprep.mubr.bf16.mxu0 %v392_v22  ;;  %v385_v22 = vld [vmem:[%s4281_s8 + $0x1a1] sm:$0xff] }
  0x80   : > { %v403_v24 = vpack.c.bf16 %v385_v22, %v384_v21  ;;  %v457_v21 = vld [vmem:[%s4281_s8 + $0x1a2] sm:$0xff] }
  0x81   : > { %v475_v22 = vpack.c.bf16 %v457_v21, %v456_v20 }
  0x86   : > { %925 = vmatmul.mubr.bf16.gmra.mrb[24].mxu0 %v320_v27  ;;  %v331_v27 = vpack.c.bf16 %v313_v26, %v312_v25 }
  0x87   : > { %934 = vmatprep.mubr.bf16.mxu0 %v393_v28  ;;  %v4149_v28 = vmov 0  }
  0x8e   : > { %935 = vmatmul.mubr.bf16.gmra.mrb[28].mxu0 %v321_v33  ;;  %v425_v33 = vld [vmem:[%s4281_s8 + $0x22] sm:$0xff] }
  0x8f   : > { %944 = vmatprep.mubr.bf16.mxu0 %v394_v34  ;;  %v459_v34 = vpack.c.bf16 %v425_v33, %v424_v32 }
  0x96   : > { %945 = vmatmul.mubr.bf16.gmra.mrb[32].mxu0 %v322_v39  ;;  %v429_v39 = vld [vmem:[%s4281_s8 + $0x52] sm:$0xff] }
  0x97   : > { %954 = vmatprep.mubr.bf16.mxu0 %v395_v40  ;;  %v461_v40 = vpack.c.bf16 %v429_v39, %v428_v38 }
  0x9e   : > { %955 = vmatmul.mubr.bf16.gmra.mrb[36].mxu0 %v323_v45  ;;  %v433_v45 = vld [vmem:[%s4281_s8 + $0x82] sm:$0xff] }
  0x9f   : > { %964 = vmatprep.mubr.bf16.mxu0 %v396_v46  ;;  %v463_v46 = vpack.c.bf16 %v433_v45, %v432_v44 }
  0xa6   : > { %965 = vmatmul.mubr.bf16.gmra.mrb[40].mxu0 %v324_v51  ;;  %v437_v51 = vld [vmem:[%s4281_s8 + $0xb2] sm:$0xff] }
  0xa7   : > { %974 = vmatprep.mubr.bf16.mxu0 %v397_v52  ;;  %v465_v52 = vpack.c.bf16 %v437_v51, %v436_v50  ;;  %v4019_v50 = vld [vmem:[%s5956_s2 + $0x24] ss:$8 sps:$4 sm:$0xff]   ;;  %v4021_v51 = vld [vmem:[%s5956_s2 + $0x20] ss:$8 sps:$4 sm:$0xff]  }
  0xae   : > { %975 = vmatmul.mubr.bf16.gmra.mrb[44].mxu0 %v325_v57  ;;  %v441_v57 = vld [vmem:[%s4281_s8 + $0xe2] sm:$0xff] }
  0xaf   : > { %984 = vmatprep.mubr.bf16.mxu0 %v398_v58  ;;  %v467_v60 = vpack.c.bf16 %v441_v57, %v440_v56  ;;  %v4024_v57 = vld [vmem:[%s5956_s2 + $0x30] ss:$8 sps:$4 sm:$0xff]  }
  0xb6   : > { %985 = vmatmul.mubr.bf16.gmra.mrb[48].mxu0 %v326_v63  ;;  %v442_v63 = vld [vmem:[%s4281_s8 + $0xf2] sm:$0xff] }
  0xb7   : > { %994 = vmatprep.mubr.bf16.mxu0 %v399_v0  ;;  %v443_v0 = vld [vmem:[%s4281_s8 + $0xfa] sm:$0xff] }
  0xb8   : > { %v468_v1 = vpack.c.bf16 %v443_v0, %v442_v63  ;;  %v4028_v63 = vld [vmem:[%s5956_s2 + $0x54] ss:$8 sps:$4 sm:$0xff]  }
  0xbe   : > { %995 = vmatmul.mubr.bf16.gmra.mrb[52].mxu0 %v327_v5  ;;  %v446_v5 = vld [vmem:[%s4281_s8 + $0x122] sm:$0xff] }
  0xbf   : > { %1004 = vmatprep.mubr.bf16.mxu0 %v400_v6  ;;  %v447_v6 = vld [vmem:[%s4281_s8 + $0x12a] sm:$0xff] }
  0xc0   : > { %v470_v7 = vpack.c.bf16 %v447_v6, %v446_v5 }
  0xc6   : > { %1005 = vmatmul.mubr.bf16.gmra.mrb[56].mxu0 %v328_v11  ;;  %v450_v11 = vld [vmem:[%s4281_s8 + $0x152] sm:$0xff] }
  0xc7   : > { %1014 = vmatprep.mubr.bf16.mxu0 %v401_v12  ;;  %v451_v12 = vld [vmem:[%s4281_s8 + $0x15a] sm:$0xff] }
  0xc8   : > { %v472_v13 = vpack.c.bf16 %v451_v12, %v450_v11  ;;  %v4039_v11 = vld [vmem:[%s5956_s2 + $0x80] ss:$8 sps:$4 sm:$0xff]  }
  0xce   : > { %1015 = vmatmul.mubr.bf16.gmra.mrb[60].mxu0 %v329_v17  ;;  %v454_v17 = vld [vmem:[%s4281_s8 + $0x182] sm:$0xff] }
  0xcf   : > { %1024 = vmatprep.mubr.bf16.mxu0 %v402_v18  ;;  %v455_v18 = vld [vmem:[%s4281_s8 + $0x18a] sm:$0xff]  ;;  %s4151_s8 = smov 64  }
  0xd0   : > { %v474_v19 = vpack.c.bf16 %v455_v18, %v454_v17  ;;  %v4042_v17 = vld [vmem:[%s5956_s2 + $0x90] ss:$8 sps:$4 sm:$0xff]  }
  0xd6   : > { %1025 = vmatmul.mubr.bf16.gmra.mrb[64].mxu0 %v330_v23  ;;  %v4150_v23 = vmov 0.0  }
  0xd7   : > { %1034 = vmatprep.mubr.bf16.mxu0 %v403_v24  ;;  %1514 = vst.msk [vmem:[#allocation3] sm:$0xff] %vm1513_vm0, %v4150_v23  ;;  %1515 = vst.msk [vmem:[#allocation3 + $0x8] sm:$0xff] %vm1513_vm0, %v4150_v23 }
  0xd8   : > { %1517 = vst.msk [vmem:[#allocation3 + $0x10] sm:$0x3] %vm1516_vm1, %v4150_v23  ;;  %1521 = vst.msk [vmem:[#allocation3 + $0x1a8] sm:$0x3] %vm1516_vm1, %v4150_v23 }
  0xd9   : > { %1519 = vst.msk [vmem:[#allocation3 + $0x198] sm:$0xff] %vm1513_vm0, %v4150_v23  ;;  %1520 = vst.msk [vmem:[#allocation3 + $0x1a0] sm:$0xff] %vm1513_vm0, %v4150_v23 }
  0xda   : > { %1541 = vst.msk [vmem:[#allocation3 + $0x11] sm:$0x1] %vm1522_vm2, %v4150_v23  ;;  %1523 = vst.msk [vmem:[#allocation3] sm:$0x1] %vm1522_vm2, %v4150_v23 }
  0xdb   : > { %1524 = vst.msk [vmem:[#allocation3 + $0x18] sm:$0x1] %vm1522_vm2, %v4150_v23  ;;  %1525 = vst.msk [vmem:[#allocation3 + $0x30] sm:$0x1] %vm1522_vm2, %v4150_v23 }
  0xdc   : > { %1526 = vst.msk [vmem:[#allocation3 + $0x48] sm:$0x1] %vm1522_vm2, %v4150_v23  ;;  %1527 = vst.msk [vmem:[#allocation3 + $0x60] sm:$0x1] %vm1522_vm2, %v4150_v23 }
  0xdd   : > { %1528 = vst.msk [vmem:[#allocation3 + $0x78] sm:$0x1] %vm1522_vm2, %v4150_v23  ;;  %1529 = vst.msk [vmem:[#allocation3 + $0x90] sm:$0x1] %vm1522_vm2, %v4150_v23 }
  0xde   : > { %1035 = vmatmul.mubr.bf16.gmra.mrb[68].mxu0 %v331_v27  ;;  %1530 = vst.msk [vmem:[#allocation3 + $0xa8] sm:$0x1] %vm1522_vm2, %v4150_v23  ;;  %1531 = vst.msk [vmem:[#allocation3 + $0xc0] sm:$0x1] %vm1522_vm2, %v4150_v23  ;;  %v1809_v20 = vld [vmem:[#allocation3 + $0x2] sm:$0xff] }
  0xdf   : > { %1075 = vmatprep.mubr.bf16.mxu0 %v4149_v28  ;;  %1532 = vst.msk [vmem:[#allocation3 + $0xd8] sm:$0x1] %vm1522_vm2, %v4150_v23  ;;  %1533 = vst.msk [vmem:[#allocation3 + $0xf0] sm:$0x1] %vm1522_vm2, %v4150_v23  ;;  %v1664_v42 = vld [vmem:[#allocation3 + $0x1] sm:$0xff] }
  0xe0   : > { %1534 = vst.msk [vmem:[#allocation3 + $0x108] sm:$0x1] %vm1522_vm2, %v4150_v23  ;;  %1535 = vst.msk [vmem:[#allocation3 + $0x120] sm:$0x1] %vm1522_vm2, %v4150_v23 }
  0xe1   : > { %1536 = vst.msk [vmem:[#allocation3 + $0x138] sm:$0x1] %vm1522_vm2, %v4150_v23  ;;  %1537 = vst.msk [vmem:[#allocation3 + $0x150] sm:$0x1] %vm1522_vm2, %v4150_v23  ;;  %v1592_v18 = vld [vmem:[#allocation3] sm:$0xff] }
  0xe2   : > { %1538 = vst.msk [vmem:[#allocation3 + $0x168] sm:$0x1] %vm1522_vm2, %v4150_v23  ;;  %1539 = vst.msk [vmem:[#allocation3 + $0x180] sm:$0x1] %vm1522_vm2, %v4150_v23 }
  0xe3   : > { %1542 = vst.msk [vmem:[#allocation3 + $0x29] sm:$0x1] %vm1522_vm2, %v4150_v23  ;;  %1543 = vst.msk [vmem:[#allocation3 + $0x41] sm:$0x1] %vm1522_vm2, %v4150_v23 }
  0xe4   : > { %1544 = vst.msk [vmem:[#allocation3 + $0x59] sm:$0x1] %vm1522_vm2, %v4150_v23  ;;  %1545 = vst.msk [vmem:[#allocation3 + $0x71] sm:$0x1] %vm1522_vm2, %v4150_v23 }
  0xe5   : > { %1546 = vst.msk [vmem:[#allocation3 + $0x89] sm:$0x1] %vm1522_vm2, %v4150_v23  ;;  %1547 = vst.msk [vmem:[#allocation3 + $0xa1] sm:$0x1] %vm1522_vm2, %v4150_v23 }
  0xe6   : > { %1076 = vmatmul.mubr.bf16.vlgmr.msra.gmra.mrb[72].mxu0 %v458_v31  ;;  %1548 = vst.msk [vmem:[#allocation3 + $0xb9] sm:$0x1] %vm1522_vm2, %v4150_v23  ;;  %1549 = vst.msk [vmem:[#allocation3 + $0xd1] sm:$0x1] %vm1522_vm2, %v4150_v23 }
  0xe7   : > { %1083 = vmatprep.mubr.bf16.mxu0 %v4149_v28  ;;  %1550 = vst.msk [vmem:[#allocation3 + $0xe9] sm:$0x1] %vm1522_vm2, %v4150_v23  ;;  %1551 = vst.msk [vmem:[#allocation3 + $0x101] sm:$0x1] %vm1522_vm2, %v4150_v23 }
  0xe8   : > { %1552 = vst.msk [vmem:[#allocation3 + $0x119] sm:$0x1] %vm1522_vm2, %v4150_v23  ;;  %1553 = vst.msk [vmem:[#allocation3 + $0x131] sm:$0x1] %vm1522_vm2, %v4150_v23 }
  0xe9   : > { %1554 = vst.msk [vmem:[#allocation3 + $0x149] sm:$0x1] %vm1522_vm2, %v4150_v23  ;;  %1555 = vst.msk [vmem:[#allocation3 + $0x161] sm:$0x1] %vm1522_vm2, %v4150_v23 }
  0xea   : > { %1556 = vst.msk [vmem:[#allocation3 + $0x179] sm:$0x1] %vm1522_vm2, %v4150_v23  ;;  %1557 = vst.msk [vmem:[#allocation3 + $0x191] sm:$0x1] %vm1522_vm2, %v4150_v23 }
  0xeb   : > { %1540 = vst.msk [vmem:[#allocation3 + $0x198] sm:$0x1] %vm1522_vm2, %v4150_v23  ;;  %1558 = vst.msk [vmem:[#allocation3 + $0x1a9] sm:$0x1] %vm1522_vm2, %v4150_v23  ;;  %v4043_v23 = vld [vmem:[%s5956_s2 + $0xa4] ss:$8 sps:$4 sm:$0xff]  }
  0xee   : > { %1084 = vmatmul.mubr.bf16.gmra.mrb[4].mxu0 %v459_v34 }
  0xef   : > { %1091 = vmatprep.mubr.bf16.mxu0 %v4149_v28 }
  0xf6   : > { %1092 = vmatmul.mubr.bf16.gmra.mrb[8].mxu0 %v460_v37 }
  0xf7   : > { %1101 = vmatprep.mubr.bf16.mxu0 %v4149_v28 }
  0xfe   : > { %1102 = vmatmul.mubr.bf16.gmra.mrb[12].mxu0 %v461_v40 }
  0xff   : > { %1111 = vmatprep.mubr.bf16.mxu0 %v4149_v28 }
 0x106   : > { %1112 = vmatmul.mubr.bf16.gmra.mrb[16].mxu0 %v462_v43  ;;  %v4015_v43 = vld [vmem:[%s5956_s2] ss:$8 sps:$4 sm:$0xff]  }
 0x107   : > { %1121 = vmatprep.mubr.bf16.mxu0 %v4149_v28  ;;  %2116 = vmatpush1.bf16.msra.mxu1 %v4015_v43  ;;  %v1665_v43 = vld [vmem:[#allocation3 + $0x9] sm:$0xff] }
 0x108   : > { %2117 = vmatprep.subr.bf16.mxu1 %v4016_v47 }
 0x10e   : > { %1122 = vmatmul.mubr.bf16.gmra.mrb[20].mxu0 %v463_v46 }
 0x10f   : > { %1131 = vmatprep.mubr.bf16.mxu0 %v4149_v28 }
 0x116   : > { %1132 = vmatmul.mubr.bf16.gmra.mrb[24].mxu0 %v464_v49  ;;  %v4018_v49 = vld [vmem:[%s5956_s2 + $0x10] ss:$8 sps:$4 sm:$0xff]  }
 0x117   : > { %1141 = vmatprep.mubr.bf16.mxu0 %v4149_v28  ;;  %2118 = vmatpush1.bf16.msra.mxu1 %v4018_v49 }
 0x118   : > { %2119 = vmatprep.subr.bf16.mxu1 %v4019_v50 }
 0x11b   : > { %2120 = vmatpush1.bf16.msra.mxu1 %v4021_v51  ;;  %v1700_v51 = vpack.c.bf16 %v1665_v43, %v1664_v42 }
 0x11e   : > { %1142 = vmatmul.mubr.bf16.gmra.mrb[28].mxu0 %v465_v52 }
 0x11f   : > { %1151 = vmatprep.mubr.bf16.mxu0 %v4149_v28 }
 0x126   : > { %1152 = vmatmul.mubr.bf16.gmra.mrb[32].mxu0 %v466_v55  ;;  %v4022_v55 = vld [vmem:[%s5956_s2 + $0x34] ss:$8 sps:$4 sm:$0xff]  }
 0x127   : > { %1161 = vmatprep.mubr.bf16.mxu0 %v4149_v28  ;;  %2121 = vmatprep.subr.bf16.mxu1 %v4022_v55 }
 0x128   : > { %2122 = vmatpush1.bf16.msra.mxu1 %v4024_v57 }
 0x129   : > { %v4496_v58 = vpop.f32.mrb[0].mxu0 }
 0x12a   : > { %v872_v59 = vpop.f32.mrb[1].mxu0 }
 0x12b   : > { %v4498_v61 = vpop.f32.mrb[2].mxu0  ;;  %v4027_v59 = vld [vmem:[%s5956_s2 + $0x40] ss:$8 sps:$4 sm:$0xff]  }
 0x12c   : > { %v875_v62 = vpop.f32.mrb[3].mxu0 }
 0x12e   : > { %1162 = vmatmul.mubr.bf16.gmra.mrb[36].mxu0 %v467_v60 }
 0x12f   : > { %1171 = vmatprep.mubr.bf16.mxu0 %v4149_v28 }
 0x136   : > { %1172 = vmatmul.mubr.bf16.gmra.mrb[40].mxu0 %v468_v1  ;;  %v4030_v1 = vld [vmem:[%s5956_s2 + $0x50] ss:$8 sps:$4 sm:$0xff]  }
 0x137   : > { %1181 = vmatprep.mubr.bf16.mxu0 %v4149_v28 }
 0x13e   : > { %1182 = vmatmul.mubr.bf16.gmra.mrb[44].mxu0 %v469_v4 }
 0x13f   : > { %1191 = vmatprep.mubr.bf16.mxu0 %v4149_v28 }
 0x146   : > { %1192 = vmatmul.mubr.bf16.gmra.mrb[48].mxu0 %v470_v7  ;;  %v4034_v7 = vld [vmem:[%s5956_s2 + $0x74] ss:$8 sps:$4 sm:$0xff]  }
 0x147   : > { %1201 = vmatprep.mubr.bf16.mxu0 %v4149_v28 }
 0x14e   : > { %1202 = vmatmul.mubr.bf16.gmra.mrb[52].mxu0 %v471_v10  ;;  %v4037_v10 = vld [vmem:[%s5956_s2 + $0x84] ss:$8 sps:$4 sm:$0xff]  }
 0x14f   : > { %1211 = vmatprep.mubr.bf16.mxu0 %v4149_v28 }
 0x156   : > { %1212 = vmatmul.mubr.bf16.gmra.mrb[56].mxu0 %v472_v13 }
 0x157   : > { %1221 = vmatprep.mubr.bf16.mxu0 %v4149_v28 }
 0x15e   : > { %1222 = vmatmul.mubr.bf16.gmra.mrb[60].mxu0 %v473_v16 }
 0x15f   : > { %1231 = vmatprep.mubr.bf16.mxu0 %v4149_v28 }
 0x166   : > { %1232 = vmatmul.mubr.bf16.gmra.mrb[64].mxu0 %v474_v19  ;;  %v1593_v19 = vld [vmem:[#allocation3 + $0x8] sm:$0xff] }
 0x167   : > { %1241 = vmatprep.mubr.bf16.mxu0 %v4149_v28  ;;  %v1628_v21 = vpack.c.bf16 %v1593_v19, %v1592_v18 }
 0x169   : > { %1646 = vst.msk [vmem:[#allocation4] sm:$0xff] %vm1513_vm0, %v1628_v21 }
 0x16e   : > { %1242 = vmatmul.mubr.bf16.gmra.mrb[76].mxu0 %v475_v22  ;;  %v1810_v22 = vld [vmem:[#allocation3 + $0xa] sm:$0xff] }
 0x1b1   : > { %v1036_v24 = vpop.f32.mrb[68].mxu0 }
 0x1b2   : > { %v4564_v25 = vpop.f32.mrb[69].mxu0  ;;  %v1845_v24 = vpack.c.bf16 %v1810_v22, %v1809_v20 }
 0x1b3   : > { %v1039_v26 = vpop.f32.mrb[70].mxu0 }
 0x1b4   : > { %v4566_v27 = vpop.f32.mrb[71].mxu0  ;;  %v4045_v26 = vld [vmem:[%s5956_s2 + $0xa0] ss:$8 sps:$4 sm:$0xff]   ;;  %1863 = vst.msk [vmem:[#allocation4 + $0x8] sm:$0xff] %vm1513_vm0, %v1845_v24 }
 0x1b9   : > { %v1077_v28 = vpop.f32.mrb[72].mxu0 }
 0x1ba   : > { %v4569_v29 = vadd.f32 %v1077_v28, %v4496_v58  ;;  %v1079_v30 = vpop.f32.mrb[73].mxu0  ;;  %v4025_v58 = vld [vmem:[%s5956_s2 + $0x44] ss:$8 sps:$4 sm:$0xff]  }
 0x1bb   : > { %v1080_v31 = vpop.f32.mrb[74].mxu0  ;;  %2123 = vmatprep.subr.bf16.mxu1 %v4025_v58  ;;  %v1882_v47 = vld [vmem:[#allocation4 + $0x8] sm:$0xff] }
 0x1bc   : > { %v4572_v32 = vadd.f32 %v1080_v31, %v4498_v61  ;;  %v1082_v33 = vpop.f32.mrb[75].mxu0  ;;  %2124 = vmatpush1.bf16.msra.mxu1 %v4027_v59  ;;  %3764 = vmatprep.mubr.msk.bf16.mxu1 %vm1513_vm0, %v1882_v47  ;;  %2887 = vst.msk [vmem:[#allocation4 + $0x8] sm:$0xff] %vm1513_vm0, %v1845_v24 }
 0x1bd   : > { %2125 = vmatprep.subr.bf16.mxu1 %v4028_v63  ;;  %v4046_v33 = vld [vmem:[%s5956_s2 + $0xb4] ss:$8 sps:$4 sm:$0xff]  }
 0x1c0   : > { %2126 = vmatpush1.bf16.msra.mxu1 %v4030_v1 }
 0x1c1   : > { %v4574_v34 = vpop.f32.mrb[4].mxu0  ;;  %2127 = vmatprep.subr.bf16.mxu1 %v4031_v2 }
 0x1c2   : > { %1282 = vrot.lane.b32.xlu0 %v4574_v34, %s4151_s8  ;;  %v1087_v35 = vpop.f32.mrb[5].mxu0 }
 0x1c3   : > { %v4578_v36 = vpop.f32.mrb[6].mxu0 }
 0x1c4   : > { %v1090_v37 = vpop.f32.mrb[7].mxu0  ;;  %2128 = vmatpush1.bf16.msra.mxu1 %v4033_v3 }
 0x1c5   : > { %2129 = vmatprep.subr.bf16.mxu1 %v4034_v7  ;;  %v4048_v37 = vld [vmem:[%s5956_s2 + $0xb0] ss:$8 sps:$4 sm:$0xff]  }
 0x1c6   : > { %1284 = vrot.lane.b32.xlu0 %v4578_v36, %s4151_s8 }
 0x1c8   : > { %2130 = vmatpush1.bf16.msra.mxu1 %v4036_v9 }
 0x1c9   : > { %v4582_v38 = vpop.f32.mrb[8].mxu0  ;;  %2131 = vmatprep.subr.bf16.mxu1 %v4037_v10 }
 0x1ca   : > { %1286 = vrot.lane.b32.xlu1 %v4582_v38, %s4151_s8  ;;  %v4586_v39 = vpop.f32.mrb[9].mxu0 }
 0x1cb   : > { %v4588_v40 = vpop.f32.mrb[10].mxu0 }
 0x1cc   : > { %v4590_v41 = vpop.f32.mrb[11].mxu0  ;;  %2132 = vmatpush1.bf16.msra.mxu1 %v4039_v11 }
 0x1cd   : > { %2133 = vmatprep.subr.bf16.mxu1 %v4040_v15 }
 0x1ce   : > { %1288 = vrot.lane.b32.xlu1 %v4588_v40, %s4151_s8 }
 0x1d0   : > { %2134 = vmatpush1.bf16.msra.mxu1 %v4042_v17 }
 0x1d1   : > { %v4600_v44 = vpop.f32.mrb[12].mxu0  ;;  %2135 = vmatprep.subr.bf16.mxu1 %v4043_v23 }
 0x1d2   : > { %1290 = vrot.lane.b32.xlu0 %v4600_v44, %s4151_s8  ;;  %v4604_v45 = vpop.f32.mrb[13].mxu0 }
 0x1d3   : > { %v4606_v46 = vpop.f32.mrb[14].mxu0 }
 0x1d4   : > { %1292 = vrot.lane.b32.xlu1 %v4606_v46, %s4151_s8  ;;  %v4613_v48 = vpop.f32.mrb[15].mxu0  ;;  %2136 = vmatpush1.bf16.msra.mxu1 %v4045_v26 }
 0x1d5   : > { %2137 = vmatprep.subr.bf16.mxu1 %v4046_v33 }
 0x1d8   : > { %2138 = vmatpush1.bf16.msra.mxu1 %v4048_v37 }
 0x1d9   : > { %v4624_v52 = vpop.f32.mrb[16].mxu0 }
 0x1da   : > { %1294 = vrot.lane.b32.xlu0 %v4624_v52, %s4151_s8  ;;  %v4628_v53 = vpop.f32.mrb[17].mxu0 }
 0x1db   : > { %v4630_v54 = vpop.f32.mrb[18].mxu0 }
 0x1dc   : > { %1296 = vrot.lane.b32.xlu1 %v4630_v54, %s4151_s8  ;;  %v4637_v56 = vpop.f32.mrb[19].mxu0 }
 0x1e1   : > { %v4648_v60 = vpop.f32.mrb[20].mxu0 }
 0x1e2   : > { %1298 = vrot.lane.b32.xlu0 %v4648_v60, %s4151_s8  ;;  %v4652_v61 = vpop.f32.mrb[21].mxu0 }
 0x1e3   : > { %v4654_v62 = vpop.f32.mrb[22].mxu0 }
 0x1e4   : > { %1300 = vrot.lane.b32.xlu1 %v4654_v62, %s4151_s8  ;;  %v4661_v0 = vpop.f32.mrb[23].mxu0 }
 0x1e9   : > { %v4672_v4 = vpop.f32.mrb[24].mxu0 }
 0x1ea   : > { %1302 = vrot.lane.b32.xlu0 %v4672_v4, %s4151_s8  ;;  %v4676_v5 = vpop.f32.mrb[25].mxu0 }
 0x1eb   : > { %v4678_v6 = vpop.f32.mrb[26].mxu0 }
 0x1ec   : > { %1304 = vrot.lane.b32.xlu1 %v4678_v6, %s4151_s8  ;;  %v4685_v8 = vpop.f32.mrb[27].mxu0 }
 0x1f1   : > { %v4696_v12 = vpop.f32.mrb[28].mxu0 }
 0x1f2   : > { %1306 = vrot.lane.b32.xlu0 %v4696_v12, %s4151_s8  ;;  %v4700_v13 = vpop.f32.mrb[29].mxu0 }
 0x1f3   : > { %v4702_v14 = vpop.f32.mrb[30].mxu0 }
 0x1f4   : > { %1308 = vrot.lane.b32.xlu1 %v4702_v14, %s4151_s8  ;;  %v4709_v16 = vpop.f32.mrb[31].mxu0 }
 0x1f9   : > { %v4721_v28 = vpop.f32.mrb[32].mxu0 }
 0x1fa   : > { %1310 = vrot.lane.b32.xlu0 %v4721_v28, %s4151_s8  ;;  %v4726_v30 = vpop.f32.mrb[33].mxu0 }
 0x1fb   : > { %v4728_v31 = vpop.f32.mrb[34].mxu0 }
 0x1fc   : > { %1312 = vrot.lane.b32.xlu1 %v4728_v31, %s4151_s8  ;;  %v4735_v35 = vpop.f32.mrb[35].mxu0 }
 0x201   : > { %v4740_v49 = vpop.f32.mrb[36].mxu0 }
 0x202   : > { %1314 = vrot.lane.b32.xlu0 %v4740_v49, %s4151_s8  ;;  %v4746_v50 = vpop.f32.mrb[37].mxu0 }
 0x203   : > { %v4748_v55 = vpop.f32.mrb[38].mxu0 }
 0x204   : > { %1316 = vrot.lane.b32.xlu1 %v4748_v55, %s4151_s8  ;;  %v4752_v57 = vpop.f32.mrb[39].mxu0 }
 0x206   : > { %1736 = vrot.lane.b32.xlu0 %v1700_v51, %s4151_s8 }
 0x209   : > { %v4755_v58 = vpop.f32.mrb[40].mxu0 }
 0x20a   : > { %5967 = vst [vmem:[#allocation8_spill] sm:$0xff] %v4755_v58  ;;  %1318 = vrot.lane.b32.xlu1 %v4755_v58, %s4151_s8  ;;  %v4759_v59 = vpop.f32.mrb[41].mxu0 }
 0x20b   : > { %v4761_v63 = vpop.f32.mrb[42].mxu0 }
 0x20c   : > { %5968 = vst [vmem:[#allocation9_spill] sm:$0xff] %v4761_v63  ;;  %1320 = vrot.lane.b32.xlu0 %v4761_v63, %s4151_s8  ;;  %v4765_v1 = vpop.f32.mrb[43].mxu0 }
 0x211   : > { %v4767_v2 = vpop.f32.mrb[44].mxu0 }
 0x212   : > { %5969 = vst [vmem:[#allocation10_spill] sm:$0xff] %v4767_v2  ;;  %1322 = vrot.lane.b32.xlu0 %v4767_v2, %s4151_s8  ;;  %v4771_v3 = vpop.f32.mrb[45].mxu0 }
 0x213   : > { %v4773_v7 = vpop.f32.mrb[46].mxu0 }
 0x214   : > { %v4775_v9 = vpop.f32.mrb[47].mxu0 }
 0x219   : > { %v4777_v10 = vpop.f32.mrb[48].mxu0 }
 0x21a   : > { %v4779_v11 = vpop.f32.mrb[49].mxu0 }
 0x21b   : > { %5970 = vst [vmem:[#allocation11_spill] sm:$0xff] %v4779_v11  ;;  %v4781_v15 = vpop.f32.mrb[50].mxu0 }
 0x21c   : > { %v4783_v17 = vpop.f32.mrb[51].mxu0 }
 0x21d   : > { %5971 = vst [vmem:[#allocation12_spill] sm:$0xff] %v4783_v17 }
 0x221   : > { %v4785_v18 = vpop.f32.mrb[52].mxu0 }
 0x222   : > { %v4787_v19 = vpop.f32.mrb[53].mxu0 }
 0x223   : > { %5972 = vst [vmem:[#allocation13_spill] sm:$0xff] %v4787_v19  ;;  %v4789_v20 = vpop.f32.mrb[54].mxu0 }
 0x224   : > { %v4791_v21 = vpop.f32.mrb[55].mxu0 }
 0x225   : > { %5973 = vst [vmem:[#allocation14_spill] sm:$0xff] %v4791_v21  ;;  %v4813_v21 = vld [vmem:[%s5958_s4] ss:$0 sm:$0xff] }
 0x229   : > { %v4793_v22 = vpop.f32.mrb[56].mxu0 }
 0x22a   : > { %v4795_v23 = vpop.f32.mrb[57].mxu0 }
 0x22b   : > { %5974 = vst [vmem:[#allocation15_spill] sm:$0xff] %v4795_v23  ;;  %v4797_v24 = vpop.f32.mrb[58].mxu0 }
 0x22c   : > { %v4799_v26 = vpop.f32.mrb[59].mxu0 }
 0x22d   : > { %5975 = vst [vmem:[#allocation16_spill] sm:$0xff] %v4799_v26 }
 0x231   : > { %v4801_v33 = vpop.f32.mrb[60].mxu0 }
 0x232   : > { %v4803_v37 = vpop.f32.mrb[61].mxu0 }
 0x233   : > { %5976 = vst [vmem:[#allocation17_spill] sm:$0xff] %v4803_v37  ;;  %v4805_v42 = vpop.f32.mrb[62].mxu0 }
 0x234   : > { %v1283_v43 = vpop.permute.xlu0 %1282  ;;  %v4807_v47 = vpop.f32.mrb[63].mxu0 }
 0x235   : > { %5977 = vst [vmem:[#allocation18_spill] sm:$0xff] %v4807_v47  ;;  %v1378_v51 = vadd.f32 %v1283_v43, %v4569_v29 }
 0x237   : > { %v1410_v23 = vadd.f32 %v1378_v51, %v4586_v39 }
 0x238   : > { %v1285_v19 = vpop.permute.xlu0 %1284 }
 0x239   : > { %v1449_v26 = vadd.f32 %v4813_v21, %v1410_v23  ;;  %v1379_v2 = vadd.f32 %v1285_v19, %v4572_v32  ;;  %v4818_v37 = vpop.f32.mrb[64].mxu0 }
 0x23a   : > { %v4820_v17 = vpop.f32.mrb[65].mxu0 }
 0x23b   : > { %5978 = vst [vmem:[#allocation19_spill] sm:$0xff] %v4820_v17  ;;  %v1481_v63 = vmax.f32 %v1449_v26, 0.0  ;;  %v1411_v47 = vadd.f32 %v1379_v2, %v4590_v41  ;;  %v4823_v29 = vpop.f32.mrb[66].mxu0 }
 0x23c   : > { %v1287_v43 = vpop.permute.xlu1 %1286  ;;  %v4825_v11 = vpop.f32.mrb[67].mxu0 }
 0x23d   : > { %5979 = vst [vmem:[#allocation20_spill] sm:$0xff] %v4825_v11  ;;  %1560 = vst.msk [vmem:[#allocation3 + $0x19] sm:$0xff] %vm1513_vm0, %v1481_v63  ;;  %v1450_v39 = vadd.f32 %v4813_v21, %v1411_v47  ;;  %v1380_v23 = vadd.f32 %v1287_v43, %v4574_v34 }
 0x23f   : > { %v1482_v51 = vmax.f32 %v1450_v39, 0.0  ;;  %v1412_v32 = vadd.f32 %v1380_v23, %v4604_v45 }
 0x240   : > { %v1289_v19 = vpop.permute.xlu1 %1288 }
 0x241   : > { %1561 = vst.msk [vmem:[#allocation3 + $0x21] sm:$0xff] %vm1513_vm0, %v1482_v51  ;;  %v1451_v26 = vadd.f32 %v4813_v21, %v1412_v32  ;;  %v1381_v41 = vadd.f32 %v1289_v19, %v4578_v36  ;;  %v1243_v2 = vpop.f32.mrb[76].mxu0 }
 0x242   : > { %v1244_v17 = vpop.f32.mrb[77].mxu0 }
 0x243   : > { %v1483_v58 = vmax.f32 %v1451_v26, 0.0  ;;  %v1413_v11 = vadd.f32 %v1381_v41, %v4613_v48  ;;  %v4836_v63 = vadd.f32 %v1244_v17, %v4564_v25  ;;  %v1246_v47 = vpop.f32.mrb[78].mxu0 }
 0x244   : > { %v1291_v34 = vpop.permute.xlu0 %1290  ;;  %v1247_v43 = vpop.f32.mrb[79].mxu0  ;;  %v1666_v25 = vld [vmem:[#allocation3 + $0x19] sm:$0xff] }
 0x245   : > { %1562 = vst.msk [vmem:[#allocation3 + $0x31] sm:$0xff] %vm1513_vm0, %v1483_v58  ;;  %v1452_v45 = vadd.f32 %v4813_v21, %v1413_v11  ;;  %v1382_v39 = vadd.f32 %v1291_v34, %v4582_v38  ;;  %v4842_v23 = vadd.f32 %v1247_v43, %v4566_v27  ;;  %v1594_v27 = vld [vmem:[#allocation3 + $0x18] sm:$0xff] }
 0x246   : > { %v1293_v36 = vpop.permute.xlu1 %1292 }
 0x247   : > { %v1484_v51 = vmax.f32 %v1452_v45, 0.0  ;;  %v1414_v32 = vadd.f32 %v1382_v39, %v4628_v53  ;;  %v1383_v48 = vadd.f32 %v1293_v36, %v4588_v40 }
 0x248   : > { %v1667_v17 = vld [vmem:[#allocation3 + $0x21] sm:$0xff] }
 0x249   : > { %v1811_v19 = vld [vmem:[#allocation3 + $0x1a] sm:$0xff]  ;;  %v1812_v26 = vld [vmem:[#allocation3 + $0x22] sm:$0xff]  ;;  %1563 = vst.msk [vmem:[#allocation3 + $0x39] sm:$0xff] %vm1513_vm0, %v1484_v51  ;;  %v1453_v58 = vadd.f32 %v4813_v21, %v1414_v32  ;;  %v1415_v11 = vadd.f32 %v1383_v48, %v4637_v56  ;;  %v1701_v38 = vpack.c.bf16 %v1667_v17, %v1666_v25 }
 0x24a   : > { %v1846_v41 = vpack.c.bf16 %v1812_v26, %v1811_v19  ;;  %v1595_v2 = vld [vmem:[#allocation3 + $0x20] sm:$0xff] }
 0x24b   : > { %v1629_v47 = vpack.c.bf16 %v1595_v2, %v1594_v27  ;;  %v1485_v34 = vmax.f32 %v1453_v58, 0.0  ;;  %v1454_v53 = vadd.f32 %v4813_v21, %v1415_v11  ;;  %1738 = vrot.lane.b32.xlu1 %v1701_v38, %s4151_s8 }
 0x24c   : > { %1864 = vst.msk [vmem:[#allocation4 + $0x18] sm:$0xff] %vm1513_vm0, %v1846_v41  ;;  %v1295_v40 = vpop.permute.xlu0 %1294  ;;  %v1668_v51 = vld [vmem:[#allocation3 + $0x31] sm:$0xff] }
 0x24d   : > { %1647 = vst.msk [vmem:[#allocation4 + $0x10] sm:$0xff] %vm1513_vm0, %v1629_v47  ;;  %1564 = vst.msk [vmem:[#allocation3 + $0x49] sm:$0xff] %vm1513_vm0, %v1485_v34  ;;  %v1486_v43 = vmax.f32 %v1454_v53, 0.0  ;;  %v1384_v56 = vadd.f32 %v1295_v40, %v4600_v44  ;;  %v1596_v32 = vld [vmem:[#allocation3 + $0x30] sm:$0xff] }
 0x24e   : > { %v1297_v45 = vpop.permute.xlu1 %1296 }
 0x24f   : > { %1565 = vst.msk [vmem:[#allocation3 + $0x51] sm:$0xff] %vm1513_vm0, %v1486_v43  ;;  %v1416_v39 = vadd.f32 %v1384_v56, %v4652_v61  ;;  %v1385_v36 = vadd.f32 %v1297_v45, %v4606_v46  ;;  %1324 = vrot.lane.b32.xlu1 %v4773_v7, %s4151_s8 }
 0x250   : > { %v1669_v48 = vld [vmem:[#allocation3 + $0x39] sm:$0xff] }
 0x251   : > { %v1597_v25 = vld [vmem:[#allocation3 + $0x38] sm:$0xff]  ;;  %v1455_v19 = vadd.f32 %v4813_v21, %v1416_v39  ;;  %v1417_v26 = vadd.f32 %v1385_v36, %v4661_v0  ;;  %v1702_v44 = vpack.c.bf16 %v1669_v48, %v1668_v51 }
 0x252   : > { %v1813_v17 = vld [vmem:[#allocation3 + $0x32] sm:$0xff]  ;;  %v1630_v58 = vpack.c.bf16 %v1597_v25, %v1596_v32  ;;  %v1814_v11 = vld [vmem:[#allocation3 + $0x3a] sm:$0xff] }
 0x253   : > { %v1847_v38 = vpack.c.bf16 %v1814_v11, %v1813_v17  ;;  %v1487_v41 = vmax.f32 %v1455_v19, 0.0  ;;  %v1456_v61 = vadd.f32 %v4813_v21, %v1417_v26  ;;  %1740 = vrot.lane.b32.xlu0 %v1702_v44, %s4151_s8  ;;  %1326 = vrot.lane.b32.xlu1 %v4777_v10, %s4151_s8 }
 0x254   : > { %1648 = vst.msk [vmem:[#allocation4 + $0x20] sm:$0xff] %vm1513_vm0, %v1630_v58  ;;  %v1299_v46 = vpop.permute.xlu0 %1298  ;;  %v1670_v2 = vld [vmem:[#allocation3 + $0x49] sm:$0xff] }
 0x255   : > { %1865 = vst.msk [vmem:[#allocation4 + $0x28] sm:$0xff] %vm1513_vm0, %v1847_v38  ;;  %1566 = vst.msk [vmem:[#allocation3 + $0x61] sm:$0xff] %vm1513_vm0, %v1487_v41  ;;  %v1488_v0 = vmax.f32 %v1456_v61, 0.0  ;;  %v1386_v27 = vadd.f32 %v1299_v46, %v4624_v52  ;;  %v1598_v47 = vld [vmem:[#allocation3 + $0x48] sm:$0xff] }
 0x256   : > { %v1301_v34 = vpop.permute.xlu1 %1300  ;;  %v1671_v53 = vld [vmem:[#allocation3 + $0x51] sm:$0xff] }
 0x257   : > { %v1599_v40 = vld [vmem:[#allocation3 + $0x50] sm:$0xff]  ;;  %1567 = vst.msk [vmem:[#allocation3 + $0x69] sm:$0xff] %vm1513_vm0, %v1488_v0  ;;  %v1418_v56 = vadd.f32 %v1386_v27, %v4676_v5  ;;  %v1387_v45 = vadd.f32 %v1301_v34, %v4630_v54  ;;  %1328 = vrot.lane.b32.xlu0 %v4781_v15, %s4151_s8  ;;  %v1703_v39 = vpack.c.bf16 %v1671_v53, %v1670_v2 }
 0x258   : > { %v1815_v43 = vld [vmem:[#allocation3 + $0x4a] sm:$0xff]  ;;  %v1631_v36 = vpack.c.bf16 %v1599_v40, %v1598_v47  ;;  %v1816_v51 = vld [vmem:[#allocation3 + $0x52] sm:$0xff] }
 0x259   : > { %v1848_v32 = vpack.c.bf16 %v1816_v51, %v1815_v43  ;;  %v1457_v52 = vadd.f32 %v4813_v21, %v1418_v56  ;;  %v1419_v48 = vadd.f32 %v1387_v45, %v4685_v8  ;;  %1742 = vrot.lane.b32.xlu1 %v1703_v39, %s4151_s8 }
 0x25a   : > { %1649 = vst.msk [vmem:[#allocation4 + $0x30] sm:$0xff] %vm1513_vm0, %v1631_v36 }
 0x25b   : > { %1866 = vst.msk [vmem:[#allocation4 + $0x38] sm:$0xff] %vm1513_vm0, %v1848_v32  ;;  %v1489_v5 = vmax.f32 %v1457_v52, 0.0  ;;  %v1458_v54 = vadd.f32 %v4813_v21, %v1419_v48  ;;  %1330 = vrot.lane.b32.xlu0 %v4785_v18, %s4151_s8 }
 0x25c   : > { %v1303_v25 = vpop.permute.xlu0 %1302  ;;  %v1672_v8 = vld [vmem:[#allocation3 + $0x61] sm:$0xff] }
 0x25d   : > { %1568 = vst.msk [vmem:[#allocation3 + $0x79] sm:$0xff] %vm1513_vm0, %v1489_v5  ;;  %v1490_v17 = vmax.f32 %v1458_v54, 0.0  ;;  %v1388_v19 = vadd.f32 %v1303_v25, %v4648_v60  ;;  %1332 = vrot.lane.b32.xlu1 %v4789_v20, %s4151_s8  ;;  %v1600_v26 = vld [vmem:[#allocation3 + $0x60] sm:$0xff] }
 0x25e   : > { %v1305_v44 = vpop.permute.xlu1 %1304  ;;  %v1673_v58 = vld [vmem:[#allocation3 + $0x69] sm:$0xff] }
 0x25f   : > { %v1601_v11 = vld [vmem:[#allocation3 + $0x68] sm:$0xff]  ;;  %1569 = vst.msk [vmem:[#allocation3 + $0x81] sm:$0xff] %vm1513_vm0, %v1490_v17  ;;  %v1420_v41 = vadd.f32 %v1388_v19, %v4700_v13  ;;  %v1389_v61 = vadd.f32 %v1305_v44, %v4654_v62  ;;  %v1704_v46 = vpack.c.bf16 %v1673_v58, %v1672_v8 }
 0x260   : > { %v1817_v38 = vld [vmem:[#allocation3 + $0x62] sm:$0xff]  ;;  %v1632_v0 = vpack.c.bf16 %v1601_v11, %v1600_v26  ;;  %v1818_v27 = vld [vmem:[#allocation3 + $0x6a] sm:$0xff] }
 0x261   : > { %v1849_v2 = vpack.c.bf16 %v1818_v27, %v1817_v38  ;;  %v1459_v60 = vadd.f32 %v4813_v21, %v1420_v41  ;;  %v1421_v47 = vadd.f32 %v1389_v61, %v4709_v16  ;;  %1744 = vrot.lane.b32.xlu0 %v1704_v46, %s4151_s8  ;;  %1334 = vrot.lane.b32.xlu1 %v4793_v22, %s4151_s8 }
 0x262   : > { %1650 = vst.msk [vmem:[#allocation4 + $0x40] sm:$0xff] %vm1513_vm0, %v1632_v0 }
 0x263   : > { %1867 = vst.msk [vmem:[#allocation4 + $0x48] sm:$0xff] %vm1513_vm0, %v1849_v2  ;;  %v1491_v13 = vmax.f32 %v1459_v60, 0.0  ;;  %v1460_v62 = vadd.f32 %v4813_v21, %v1421_v47 }
 0x264   : > { %v1307_v34 = vpop.permute.xlu0 %1306  ;;  %v1674_v16 = vld [vmem:[#allocation3 + $0x79] sm:$0xff] }
 0x265   : > { %1570 = vst.msk [vmem:[#allocation3 + $0x91] sm:$0xff] %vm1513_vm0, %v1491_v13  ;;  %v1492_v53 = vmax.f32 %v1460_v62, 0.0  ;;  %v1390_v40 = vadd.f32 %v1307_v34, %v4672_v4  ;;  %1336 = vrot.lane.b32.xlu0 %v4797_v24, %s4151_s8  ;;  %v1602_v43 = vld [vmem:[#allocation3 + $0x78] sm:$0xff] }
 0x266   : > { %v1309_v56 = vpop.permute.xlu1 %1308  ;;  %v1675_v45 = vld [vmem:[#allocation3 + $0x81] sm:$0xff] }
 0x267   : > { %v1603_v39 = vld [vmem:[#allocation3 + $0x80] sm:$0xff]  ;;  %1571 = vst.msk [vmem:[#allocation3 + $0x99] sm:$0xff] %vm1513_vm0, %v1492_v53  ;;  %v1422_v51 = vadd.f32 %v1390_v40, %v4726_v30  ;;  %v1391_v32 = vadd.f32 %v1309_v56, %v4678_v6  ;;  %v1705_v52 = vpack.c.bf16 %v1675_v45, %v1674_v16 }
 0x268   : > { %v1819_v36 = vld [vmem:[#allocation3 + $0x7a] sm:$0xff]  ;;  %v1633_v48 = vpack.c.bf16 %v1603_v39, %v1602_v43  ;;  %v1820_v5 = vld [vmem:[#allocation3 + $0x82] sm:$0xff] }
 0x269   : > { %v1850_v54 = vpack.c.bf16 %v1820_v5, %v1819_v36  ;;  %v1461_v4 = vadd.f32 %v4813_v21, %v1422_v51  ;;  %v1423_v25 = vadd.f32 %v1391_v32, %v4735_v35  ;;  %1338 = vrot.lane.b32.xlu0 %v4801_v33, %s4151_s8  ;;  %1746 = vrot.lane.b32.xlu1 %v1705_v52, %s4151_s8 }
 0x26a   : > { %1651 = vst.msk [vmem:[#allocation4 + $0x50] sm:$0xff] %vm1513_vm0, %v1633_v48 }
 0x26b   : > { %1868 = vst.msk [vmem:[#allocation4 + $0x58] sm:$0xff] %vm1513_vm0, %v1850_v54  ;;  %v1493_v30 = vmax.f32 %v1461_v4, 0.0  ;;  %v1462_v6 = vadd.f32 %v4813_v21, %v1423_v25 }
 0x26c   : > { %v1311_v17 = vpop.permute.xlu0 %1310  ;;  %v1676_v35 = vld [vmem:[#allocation3 + $0x91] sm:$0xff] }
 0x26d   : > { %1572 = vst.msk [vmem:[#allocation3 + $0xa9] sm:$0xff] %vm1513_vm0, %v1493_v30  ;;  %v1494_v19 = vmax.f32 %v1462_v6, 0.0  ;;  %v1392_v8 = vadd.f32 %v1311_v17, %v4696_v12  ;;  %1340 = vrot.lane.b32.xlu1 %v4805_v42, %s4151_s8  ;;  %v1604_v26 = vld [vmem:[#allocation3 + $0x90] sm:$0xff] }
 0x26e   : > { %v1313_v44 = vpop.permute.xlu1 %1312  ;;  %v1677_v58 = vld [vmem:[#allocation3 + $0x99] sm:$0xff] }
 0x26f   : > { %v1605_v11 = vld [vmem:[#allocation3 + $0x98] sm:$0xff]  ;;  %1573 = vst.msk [vmem:[#allocation3 + $0xb1] sm:$0xff] %vm1513_vm0, %v1494_v19  ;;  %v1424_v41 = vadd.f32 %v1392_v8, %v4746_v50  ;;  %v1393_v61 = vadd.f32 %v1313_v44, %v4702_v14  ;;  %v1706_v46 = vpack.c.bf16 %v1677_v58, %v1676_v35 }
 0x270   : > { %v1821_v38 = vld [vmem:[#allocation3 + $0x92] sm:$0xff]  ;;  %v1634_v0 = vpack.c.bf16 %v1605_v11, %v1604_v26  ;;  %v1822_v27 = vld [vmem:[#allocation3 + $0x9a] sm:$0xff] }
 0x271   : > { %v1851_v2 = vpack.c.bf16 %v1822_v27, %v1821_v38  ;;  %v1463_v12 = vadd.f32 %v4813_v21, %v1424_v41  ;;  %v1425_v60 = vadd.f32 %v1393_v61, %v4752_v57  ;;  %1748 = vrot.lane.b32.xlu0 %v1706_v46, %s4151_s8  ;;  %1342 = vrot.lane.b32.xlu1 %v4818_v37, %s4151_s8  ;;  %v1884_v38 = vld [vmem:[#allocation4 + $0x18] sm:$0xff]  ;;  %v5980_v46 = vld [vmem:[#allocation8_spill] sm:$0xff] }
 0x272   : > { %1652 = vst.msk [vmem:[#allocation4 + $0x60] sm:$0xff] %vm1513_vm0, %v1634_v0 }
 0x273   : > { %1869 = vst.msk [vmem:[#allocation4 + $0x68] sm:$0xff] %vm1513_vm0, %v1851_v2  ;;  %v1495_v50 = vmax.f32 %v1463_v12, 0.0  ;;  %v1464_v14 = vadd.f32 %v4813_v21, %v1425_v60 }
 0x274   : > { %v1315_v47 = vpop.permute.xlu0 %1314  ;;  %v1678_v57 = vld [vmem:[#allocation3 + $0xa9] sm:$0xff] }
 0x275   : > { %1574 = vst.msk [vmem:[#allocation3 + $0xc1] sm:$0xff] %vm1513_vm0, %v1495_v50  ;;  %v1496_v13 = vmax.f32 %v1464_v14, 0.0  ;;  %v1394_v62 = vadd.f32 %v1315_v47, %v4721_v28  ;;  %1344 = vrot.lane.b32.xlu0 %v4823_v29, %s4151_s8  ;;  %v1606_v34 = vld [vmem:[#allocation3 + $0xa8] sm:$0xff] }
 0x276   : > { %v1317_v53 = vpop.permute.xlu1 %1316  ;;  %v1679_v37 = vld [vmem:[#allocation3 + $0xb1] sm:$0xff]  ;;  %v5981_v50 = vld [vmem:[#allocation11_spill] sm:$0xff] }
 0x277   : > { %v1607_v40 = vld [vmem:[#allocation3 + $0xb0] sm:$0xff]  ;;  %1575 = vst.msk [vmem:[#allocation3 + $0xc9] sm:$0xff] %vm1513_vm0, %v1496_v13  ;;  %v1426_v43 = vadd.f32 %v1394_v62, %v4759_v59  ;;  %v1395_v56 = vadd.f32 %v1317_v53, %v4728_v31  ;;  %v1707_v45 = vpack.c.bf16 %v1679_v37, %v1678_v57 }
 0x278   : > { %v1823_v16 = vld [vmem:[#allocation3 + $0xaa] sm:$0xff]  ;;  %v1635_v39 = vpack.c.bf16 %v1607_v40, %v1606_v34  ;;  %v1824_v36 = vld [vmem:[#allocation3 + $0xb2] sm:$0xff]  ;;  %v1737_v28 = vpop.permute.xlu0 %1736 }
 0x279   : > { %v1852_v51 = vpack.c.bf16 %v1824_v36, %v1823_v16  ;;  %v1465_v29 = vadd.f32 %v4813_v21, %v1426_v43  ;;  %v1427_v32 = vadd.f32 %v1395_v56, %v4765_v1  ;;  %1791 = vst.msk [vmem:[#allocation4] sm:$0xff] %vm1790_vm3, %v1737_v28  ;;  %1750 = vrot.lane.b32.xlu1 %v1707_v45, %s4151_s8 }
 0x27a   : > { %1653 = vst.msk [vmem:[#allocation4 + $0x70] sm:$0xff] %vm1513_vm0, %v1635_v39 }
 0x27b   : > { %1870 = vst.msk [vmem:[#allocation4 + $0x78] sm:$0xff] %vm1513_vm0, %v1852_v51  ;;  %v1497_v59 = vmax.f32 %v1465_v29, 0.0  ;;  %v1466_v31 = vadd.f32 %v4813_v21, %v1427_v32  ;;  %v5982_v32 = vld [vmem:[#allocation9_spill] sm:$0xff] }
 0x27c   : > { %v1319_v52 = vpop.permute.xlu1 %1318  ;;  %v1680_v54 = vld [vmem:[#allocation3 + $0xc1] sm:$0xff] }
 0x27d   : > { %1576 = vst.msk [vmem:[#allocation3 + $0xd9] sm:$0xff] %vm1513_vm0, %v1497_v59  ;;  %v1498_v48 = vmax.f32 %v1466_v31, 0.0  ;;  %v1396_v5 = vadd.f32 %v1319_v52, %v4740_v49  ;;  %v1608_v4 = vld [vmem:[#allocation3 + $0xc0] sm:$0xff]  ;;  %v5983_v31 = vld [vmem:[#allocation12_spill] sm:$0xff] }
 0x27e   : > { %v1321_v1 = vpop.permute.xlu0 %1320  ;;  %v1681_v25 = vld [vmem:[#allocation3 + $0xc9] sm:$0xff] }
 0x27f   : > { %v1609_v30 = vld [vmem:[#allocation3 + $0xc8] sm:$0xff]  ;;  %1577 = vst.msk [vmem:[#allocation3 + $0xe1] sm:$0xff] %vm1513_vm0, %v1498_v48  ;;  %v1428_v17 = vadd.f32 %v1396_v5, %v4771_v3  ;;  %v1397_v19 = vadd.f32 %v1321_v1, %v4748_v55  ;;  %v1708_v8 = vpack.c.bf16 %v1681_v25, %v1680_v54  ;;  %v5984_v1 = vld [vmem:[#allocation10_spill] sm:$0xff] }
 0x280   : > { %v1825_v6 = vld [vmem:[#allocation3 + $0xc2] sm:$0xff]  ;;  %v1636_v35 = vpack.c.bf16 %v1609_v30, %v1608_v4  ;;  %v1826_v26 = vld [vmem:[#allocation3 + $0xca] sm:$0xff]  ;;  %v1886_v30 = vld [vmem:[#allocation4 + $0x28] sm:$0xff] }
 0x281   : > { %v1881_v44 = vld [vmem:[#allocation4] sm:$0xff]  ;;  %v1853_v58 = vpack.c.bf16 %v1826_v26, %v1825_v6  ;;  %v1467_v11 = vadd.f32 %v4813_v21, %v1428_v17  ;;  %v1429_v49 = vadd.f32 %v1397_v19, %v4775_v9  ;;  %1752 = vrot.lane.b32.xlu0 %v1708_v8, %s4151_s8  ;;  %v5985_v17 = vld [vmem:[#allocation13_spill] sm:$0xff] }
 0x282   : > { %2148 = vmatmul.mubr.bf16.vlgmr.msra.gmra.mrb[0].mxu1 %v1881_v44  ;;  %1654 = vst.msk [vmem:[#allocation4 + $0x80] sm:$0xff] %vm1513_vm0, %v1636_v35 }
 0x283   : > { %3765 = vmatprep.mubr.msk.bf16.mxu1 %vm1513_vm0, %v1884_v38  ;;  %1871 = vst.msk [vmem:[#allocation4 + $0x88] sm:$0xff] %vm1513_vm0, %v1853_v58  ;;  %v1499_v55 = vmax.f32 %v1467_v11, 0.0  ;;  %v1468_v3 = vadd.f32 %v4813_v21, %v1429_v49  ;;  %v5986_v11 = vld [vmem:[#allocation14_spill] sm:$0xff] }
 0x284   : > { %v1323_v41 = vpop.permute.xlu0 %1322  ;;  %v1682_v9 = vld [vmem:[#allocation3 + $0xd9] sm:$0xff] }
 0x285   : > { %1578 = vst.msk [vmem:[#allocation3 + $0xf1] sm:$0xff] %vm1513_vm0, %v1499_v55  ;;  %v1500_v61 = vmax.f32 %v1468_v3, 0.0  ;;  %v1398_v0 = vadd.f32 %v1323_v41, %v5980_v46  ;;  %v1610_v27 = vld [vmem:[#allocation3 + $0xd8] sm:$0xff] }
 0x286   : > { %v1683_v2 = vld [vmem:[#allocation3 + $0xe1] sm:$0xff] }
 0x287   : > { %v1611_v12 = vld [vmem:[#allocation3 + $0xe0] sm:$0xff]  ;;  %1579 = vst.msk [vmem:[#allocation3 + $0xf9] sm:$0xff] %vm1513_vm0, %v1500_v61  ;;  %v1430_v14 = vadd.f32 %v1398_v0, %v5981_v50  ;;  %v1709_v47 = vpack.c.bf16 %v1683_v2, %v1682_v9  ;;  %v1888_v61 = vld [vmem:[#allocation4 + $0x38] sm:$0xff] }
 0x288   : > { %v1827_v60 = vld [vmem:[#allocation3 + $0xda] sm:$0xff]  ;;  %v1637_v13 = vpack.c.bf16 %v1611_v12, %v1610_v27  ;;  %v1828_v62 = vld [vmem:[#allocation3 + $0xe2] sm:$0xff] }
 0x289   : > { %v1854_v57 = vpack.c.bf16 %v1828_v62, %v1827_v60  ;;  %v1469_v34 = vadd.f32 %v4813_v21, %v1430_v14  ;;  %1754 = vrot.lane.b32.xlu1 %v1709_v47, %s4151_s8  ;;  %v5987_v0 = vld [vmem:[#allocation15_spill] sm:$0xff]  ;;  %v5988_v47 = vld [vmem:[#allocation16_spill] sm:$0xff] }
 0x28a   : > { %1655 = vst.msk [vmem:[#allocation4 + $0x90] sm:$0xff] %vm1513_vm0, %v1637_v13 }
 0x28b   : > { %1872 = vst.msk [vmem:[#allocation4 + $0x98] sm:$0xff] %vm1513_vm0, %v1854_v57  ;;  %v1501_v53 = vmax.f32 %v1469_v34, 0.0 }
 0x28c   : > { %v1684_v37 = vld [vmem:[#allocation3 + $0xf1] sm:$0xff] }
 0x28d   : > { %1580 = vst.msk [vmem:[#allocation3 + $0x109] sm:$0xff] %vm1513_vm0, %v1501_v53  ;;  %v1612_v40 = vld [vmem:[#allocation3 + $0xf0] sm:$0xff] }
 0x28e   : > { %v1685_v16 = vld [vmem:[#allocation3 + $0xf9] sm:$0xff] }
 0x28f   : > { %v1613_v43 = vld [vmem:[#allocation3 + $0xf8] sm:$0xff]  ;;  %v1710_v45 = vpack.c.bf16 %v1685_v16, %v1684_v37 }
 0x290   : > { %v1829_v56 = vld [vmem:[#allocation3 + $0xf2] sm:$0xff]  ;;  %v1638_v39 = vpack.c.bf16 %v1613_v43, %v1612_v40  ;;  %v1830_v36 = vld [vmem:[#allocation3 + $0xfa] sm:$0xff] }
 0x291   : > { %v1855_v28 = vpack.c.bf16 %v1830_v36, %v1829_v56  ;;  %1756 = vrot.lane.b32.xlu0 %v1710_v45, %s4151_s8 }
 0x292   : > { %1656 = vst.msk [vmem:[#allocation4 + $0xa0] sm:$0xff] %vm1513_vm0, %v1638_v39  ;;  %v5989_v39 = vld [vmem:[#allocation17_spill] sm:$0xff] }
 0x293   : > { %1873 = vst.msk [vmem:[#allocation4 + $0xa8] sm:$0xff] %vm1513_vm0, %v1855_v28  ;;  %v1890_v28 = vld [vmem:[#allocation4 + $0x48] sm:$0xff] }
 0x294   : > { %v1686_v2 = vld [vmem:[#allocation3 + $0x109] sm:$0xff] }
 0x295   : > { %v1614_v57 = vld [vmem:[#allocation3 + $0x108] sm:$0xff] }
 0x2bd   : > { %v1739_v51 = vpop.permute.xlu1 %1738 }
 0x2be   : > { %1792 = vst.msk [vmem:[#allocation4 + $0x10] sm:$0xff] %vm1790_vm3, %v1739_v51 }
 0x2c1   : > { %v1325_v29 = vpop.permute.xlu1 %1324 }
 0x2c2   : > { %v1399_v59 = vadd.f32 %v1325_v29, %v5982_v32 }
 0x2c4   : > { %v1431_v52 = vadd.f32 %v1399_v59, %v5983_v31 }
 0x2c5   : > { %v1741_v48 = vpop.permute.xlu0 %1740  ;;  %v1327_v5 = vpop.permute.xlu1 %1326  ;;  %v1883_v54 = vld [vmem:[#allocation4 + $0x10] sm:$0xff] }
 0x2c6   : > { %v1470_v4 = vadd.f32 %v4813_v21, %v1431_v52  ;;  %1793 = vst.msk [vmem:[#allocation4 + $0x20] sm:$0xff] %vm1790_vm3, %v1741_v48  ;;  %v1400_v25 = vadd.f32 %v1327_v5, %v5984_v1  ;;  %2156 = vmatmul.mubr.bf16.gmra.mrb[4].mxu1 %v1883_v54  ;;  %v5990_v54 = vld [vmem:[#allocation18_spill] sm:$0xff] }
 0x2c7   : > { %3766 = vmatprep.mubr.msk.bf16.mxu1 %vm1513_vm0, %v1886_v30 }
 0x2c8   : > { %v1502_v6 = vmax.f32 %v1470_v4, 0.0  ;;  %v1432_v19 = vadd.f32 %v1400_v25, %v5985_v17 }
 0x2c9   : > { %v1329_v8 = vpop.permute.xlu0 %1328 }
 0x2ca   : > { %1581 = vst.msk [vmem:[#allocation3 + $0x111] sm:$0xff] %vm1513_vm0, %v1502_v6  ;;  %v1471_v35 = vadd.f32 %v4813_v21, %v1432_v19  ;;  %v1401_v26 = vadd.f32 %v1329_v8, %v4773_v7 }
 0x2cb   : > { %v1743_v44 = vpop.permute.xlu1 %1742 }
 0x2cc   : > { %v1503_v58 = vmax.f32 %v1471_v35, 0.0  ;;  %v1433_v49 = vadd.f32 %v1401_v26, %v5986_v11  ;;  %1794 = vst.msk [vmem:[#allocation4 + $0x30] sm:$0xff] %vm1790_vm3, %v1743_v44  ;;  %v5991_v44 = vld [vmem:[#allocation19_spill] sm:$0xff] }
 0x2cd   : > { %v1331_v38 = vpop.permute.xlu0 %1330  ;;  %v1885_v55 = vld [vmem:[#allocation4 + $0x20] sm:$0xff]  ;;  %v1892_v11 = vld [vmem:[#allocation4 + $0x58] sm:$0xff] }
 0x2ce   : > { %1582 = vst.msk [vmem:[#allocation3 + $0x121] sm:$0xff] %vm1513_vm0, %v1503_v58  ;;  %v1472_v3 = vadd.f32 %v4813_v21, %v1433_v49  ;;  %v1402_v41 = vadd.f32 %v1331_v38, %v4777_v10  ;;  %2164 = vmatmul.mubr.bf16.gmra.mrb[8].mxu1 %v1885_v55 }
 0x2cf   : > { %v1333_v46 = vpop.permute.xlu1 %1332  ;;  %3767 = vmatprep.mubr.msk.bf16.mxu1 %vm1513_vm0, %v1888_v61 }
 0x2d0   : > { %v1504_v7 = vmax.f32 %v1472_v3, 0.0  ;;  %v1434_v9 = vadd.f32 %v1402_v41, %v5987_v0  ;;  %v1403_v27 = vadd.f32 %v1333_v46, %v4781_v15 }
 0x2d1   : > { %v1687_v12 = vld [vmem:[#allocation3 + $0x111] sm:$0xff] }
 0x2d2   : > { %v1831_v60 = vld [vmem:[#allocation3 + $0x10a] sm:$0xff]  ;;  %v1832_v50 = vld [vmem:[#allocation3 + $0x112] sm:$0xff]  ;;  %1583 = vst.msk [vmem:[#allocation3 + $0x129] sm:$0xff] %vm1513_vm0, %v1504_v7  ;;  %v1473_v14 = vadd.f32 %v4813_v21, %v1434_v9  ;;  %v1435_v10 = vadd.f32 %v1403_v27, %v5988_v47  ;;  %v1711_v13 = vpack.c.bf16 %v1687_v12, %v1686_v2 }
 0x2d3   : > { %v1856_v62 = vpack.c.bf16 %v1832_v50, %v1831_v60  ;;  %v1615_v34 = vld [vmem:[#allocation3 + $0x110] sm:$0xff]  ;;  %v1745_v53 = vpop.permute.xlu0 %1744  ;;  %v1335_v37 = vpop.permute.xlu1 %1334  ;;  %v1887_v56 = vld [vmem:[#allocation4 + $0x30] sm:$0xff] }
 0x2d4   : > { %v1639_v40 = vpack.c.bf16 %v1615_v34, %v1614_v57  ;;  %v1505_v16 = vmax.f32 %v1473_v14, 0.0  ;;  %v1474_v15 = vadd.f32 %v4813_v21, %v1435_v10  ;;  %1795 = vst.msk [vmem:[#allocation4 + $0x40] sm:$0xff] %vm1790_vm3, %v1745_v53  ;;  %v1404_v43 = vadd.f32 %v1335_v37, %v4785_v18  ;;  %1758 = vrot.lane.b32.xlu1 %v1711_v13, %s4151_s8  ;;  %v5992_v12 = vld [vmem:[#allocation20_spill] sm:$0xff]  ;;  %v1894_v57 = vld [vmem:[#allocation4 + $0x68] sm:$0xff] }
 0x2d5   : > { %1874 = vst.msk [vmem:[#allocation4 + $0xb8] sm:$0xff] %vm1513_vm0, %v1856_v62  ;;  %v1688_v32 = vld [vmem:[#allocation3 + $0x121] sm:$0xff] }
 0x2d6   : > { %1657 = vst.msk [vmem:[#allocation4 + $0xb0] sm:$0xff] %vm1513_vm0, %v1639_v40  ;;  %1584 = vst.msk [vmem:[#allocation3 + $0x139] sm:$0xff] %vm1513_vm0, %v1505_v16  ;;  %v1506_v45 = vmax.f32 %v1474_v15, 0.0  ;;  %v1436_v36 = vadd.f32 %v1404_v43, %v5989_v39  ;;  %2174 = vmatmul.mubr.bf16.gmra.mrb[12].mxu1 %v1887_v56  ;;  %v1616_v59 = vld [vmem:[#allocation3 + $0x120] sm:$0xff] }
 0x2d7   : > { %v1337_v51 = vpop.permute.xlu0 %1336  ;;  %3768 = vmatprep.mubr.msk.bf16.mxu1 %vm1513_vm0, %v1890_v28 }
 0x2d8   : > { %1585 = vst.msk [vmem:[#allocation3 + $0x141] sm:$0xff] %vm1513_vm0, %v1506_v45  ;;  %v1475_v18 = vadd.f32 %v4813_v21, %v1436_v36  ;;  %v1405_v29 = vadd.f32 %v1337_v51, %v4789_v20 }
 0x2d9   : > { %v1689_v31 = vld [vmem:[#allocation3 + $0x129] sm:$0xff] }
 0x2da   : > { %v1617_v52 = vld [vmem:[#allocation3 + $0x128] sm:$0xff]  ;;  %v1507_v5 = vmax.f32 %v1475_v18, 0.0  ;;  %v1437_v4 = vadd.f32 %v1405_v29, %v5990_v54  ;;  %v1712_v1 = vpack.c.bf16 %v1689_v31, %v1688_v32 }
 0x2db   : > { %v1833_v48 = vld [vmem:[#allocation3 + $0x122] sm:$0xff]  ;;  %v1640_v25 = vpack.c.bf16 %v1617_v52, %v1616_v59  ;;  %v1834_v30 = vld [vmem:[#allocation3 + $0x12a] sm:$0xff]  ;;  %v1339_v6 = vpop.permute.xlu0 %1338  ;;  %v1747_v17 = vpop.permute.xlu1 %1746 }
 0x2dc   : > { %v1857_v19 = vpack.c.bf16 %v1834_v30, %v1833_v48  ;;  %1586 = vst.msk [vmem:[#allocation3 + $0x151] sm:$0xff] %vm1513_vm0, %v1507_v5  ;;  %v1476_v8 = vadd.f32 %v4813_v21, %v1437_v4  ;;  %v1406_v20 = vadd.f32 %v1339_v6, %v4793_v22  ;;  %1760 = vrot.lane.b32.xlu0 %v1712_v1, %s4151_s8  ;;  %v1889_v35 = vld [vmem:[#allocation4 + $0x40] sm:$0xff]  ;;  %v1896_v29 = vld [vmem:[#allocation4 + $0x78] sm:$0xff] }
 0x2dd   : > { %1796 = vst.msk [vmem:[#allocation4 + $0x50] sm:$0xff] %vm1790_vm3, %v1747_v17  ;;  %v1690_v49 = vld [vmem:[#allocation3 + $0x139] sm:$0xff]  ;;  %v1699_v52 = vld [vmem:[#allocation3 + $0x1a1] sm:$0xff] }
 0x2de   : > { %1658 = vst.msk [vmem:[#allocation4 + $0xc0] sm:$0xff] %vm1513_vm0, %v1640_v25  ;;  %1875 = vst.msk [vmem:[#allocation4 + $0xc8] sm:$0xff] %vm1513_vm0, %v1857_v19  ;;  %v1508_v26 = vmax.f32 %v1476_v8, 0.0  ;;  %v1438_v58 = vadd.f32 %v1406_v20, %v5991_v44  ;;  %2184 = vmatmul.mubr.bf16.gmra.mrb[16].mxu1 %v1889_v35  ;;  %v1618_v38 = vld [vmem:[#allocation3 + $0x138] sm:$0xff] }
 0x2df   : > { %v1341_v55 = vpop.permute.xlu1 %1340  ;;  %3769 = vmatprep.mubr.msk.bf16.mxu1 %vm1513_vm0, %v1892_v11  ;;  %v1691_v22 = vld [vmem:[#allocation3 + $0x141] sm:$0xff]  ;;  %v1898_v19 = vld [vmem:[#allocation4 + $0x88] sm:$0xff] }
 0x2e0   : > { %v1619_v3 = vld [vmem:[#allocation3 + $0x140] sm:$0xff]  ;;  %1587 = vst.msk [vmem:[#allocation3 + $0x159] sm:$0xff] %vm1513_vm0, %v1508_v26  ;;  %v1477_v61 = vadd.f32 %v4813_v21, %v1438_v58  ;;  %v1407_v46 = vadd.f32 %v1341_v55, %v4797_v24  ;;  %v1713_v7 = vpack.c.bf16 %v1691_v22, %v1690_v49 }
 0x2e1   : > { %v1835_v41 = vld [vmem:[#allocation3 + $0x13a] sm:$0xff]  ;;  %v1641_v0 = vpack.c.bf16 %v1619_v3, %v1618_v38  ;;  %v1836_v9 = vld [vmem:[#allocation3 + $0x142] sm:$0xff] }
 0x2e2   : > { %v1858_v27 = vpack.c.bf16 %v1836_v9, %v1835_v41  ;;  %v1509_v2 = vmax.f32 %v1477_v61, 0.0  ;;  %v1439_v60 = vadd.f32 %v1407_v46, %v5992_v12  ;;  %1762 = vrot.lane.b32.xlu1 %v1713_v7, %s4151_s8  ;;  %v1900_v3 = vld [vmem:[#allocation4 + $0x98] sm:$0xff]  ;;  %v1902_v46 = vld [vmem:[#allocation4 + $0xa8] sm:$0xff] }
 0x2e3   : > { %1659 = vst.msk [vmem:[#allocation4 + $0xd0] sm:$0xff] %vm1513_vm0, %v1641_v0  ;;  %v1749_v50 = vpop.permute.xlu0 %1748  ;;  %v1343_v14 = vpop.permute.xlu1 %1342  ;;  %v1692_v34 = vld [vmem:[#allocation3 + $0x151] sm:$0xff]  ;;  %v1904_v0 = vld [vmem:[#allocation4 + $0xb8] sm:$0xff] }
 0x2e4   : > { %1876 = vst.msk [vmem:[#allocation4 + $0xd8] sm:$0xff] %vm1513_vm0, %v1858_v27  ;;  %1588 = vst.msk [vmem:[#allocation3 + $0x169] sm:$0xff] %vm1513_vm0, %v1509_v2  ;;  %v1478_v47 = vadd.f32 %v4813_v21, %v1439_v60  ;;  %v1408_v24 = vadd.f32 %v1343_v14, %v4801_v33  ;;  %v1891_v10 = vld [vmem:[#allocation4 + $0x50] sm:$0xff]  ;;  %v1620_v53 = vld [vmem:[#allocation3 + $0x150] sm:$0xff] }
 0x2e5   : > { %1797 = vst.msk [vmem:[#allocation4 + $0x60] sm:$0xff] %vm1790_vm3, %v1749_v50  ;;  %v1906_v12 = vld [vmem:[#allocation4 + $0xc8] sm:$0xff] }
 0x2e6   : > { %v1510_v13 = vmax.f32 %v1478_v47, 0.0  ;;  %v1440_v62 = vadd.f32 %v1408_v24, %v4836_v63  ;;  %2194 = vmatmul.mubr.bf16.gmra.mrb[20].mxu1 %v1891_v10 }
 0x2e7   : > { %v1345_v37 = vpop.permute.xlu0 %1344  ;;  %3770 = vmatprep.mubr.msk.bf16.mxu1 %vm1513_vm0, %v1894_v57  ;;  %v1693_v40 = vld [vmem:[#allocation3 + $0x159] sm:$0xff] }
 0x2e8   : > { %v1621_v16 = vld [vmem:[#allocation3 + $0x158] sm:$0xff]  ;;  %1589 = vst.msk [vmem:[#allocation3 + $0x171] sm:$0xff] %vm1513_vm0, %v1510_v13  ;;  %v1479_v43 = vadd.f32 %v4813_v21, %v1440_v62  ;;  %v1409_v33 = vadd.f32 %v1345_v37, %v4805_v42  ;;  %v1714_v56 = vpack.c.bf16 %v1693_v40, %v1692_v34  ;;  %v1627_v34 = vld [vmem:[#allocation3 + $0x1a0] sm:$0xff] }
 0x2e9   : > { %v1837_v15 = vld [vmem:[#allocation3 + $0x152] sm:$0xff]  ;;  %v1642_v45 = vpack.c.bf16 %v1621_v16, %v1620_v53  ;;  %v1838_v39 = vld [vmem:[#allocation3 + $0x15a] sm:$0xff]  ;;  %v1844_v16 = vld [vmem:[#allocation3 + $0x1a2] sm:$0xff] }
 0x2ea   : > { %v1859_v63 = vpack.c.bf16 %v1838_v39, %v1837_v15  ;;  %v1511_v36 = vmax.f32 %v1479_v43, 0.0  ;;  %v1441_v28 = vadd.f32 %v1409_v33, %v4842_v23  ;;  %1764 = vrot.lane.b32.xlu0 %v1714_v56, %s4151_s8  ;;  %v1698_v23 = vld [vmem:[#allocation3 + $0x199] sm:$0xff] }
 0x2eb   : > { %1660 = vst.msk [vmem:[#allocation4 + $0xe0] sm:$0xff] %vm1513_vm0, %v1642_v45  ;;  %v1751_v51 = vpop.permute.xlu1 %1750  ;;  %v1694_v32 = vld [vmem:[#allocation3 + $0x169] sm:$0xff]  ;;  %v1717_v30 = vpack.c.bf16 %v1699_v52, %v1698_v23  ;;  %v1626_v57 = vld [vmem:[#allocation3 + $0x198] sm:$0xff] }
 0x2ec   : > { %1877 = vst.msk [vmem:[#allocation4 + $0xe8] sm:$0xff] %vm1513_vm0, %v1859_v63  ;;  %1590 = vst.msk [vmem:[#allocation3 + $0x181] sm:$0xff] %vm1513_vm0, %v1511_v36  ;;  %v1480_v18 = vadd.f32 %v4813_v21, %v1441_v28  ;;  %v1893_v42 = vld [vmem:[#allocation4 + $0x60] sm:$0xff]  ;;  %v1622_v31 = vld [vmem:[#allocation3 + $0x168] sm:$0xff]  ;;  %v1645_v40 = vpack.c.bf16 %v1627_v34, %v1626_v57 }
 0x2ed   : > { %1798 = vst.msk [vmem:[#allocation4 + $0x70] sm:$0xff] %vm1790_vm3, %v1751_v51  ;;  %v1908_v10 = vld [vmem:[#allocation4 + $0xd8] sm:$0xff]  ;;  %v1843_v53 = vld [vmem:[#allocation3 + $0x19a] sm:$0xff] }
 0x2ee   : > { %v1512_v59 = vmax.f32 %v1480_v18, 0.0  ;;  %2204 = vmatmul.mubr.bf16.gmra.mrb[24].mxu1 %v1893_v42  ;;  %v1862_v43 = vpack.c.bf16 %v1844_v16, %v1843_v53  ;;  %1663 = vst.msk [vmem:[#allocation4 + $0x110] sm:$0xff] %vm1513_vm0, %v1645_v40  ;;  %v4078_v53 = vld [vmem:[%s5957_s3 + $0x94] ss:$8 sps:$4 sm:$0xff]   ;;  %v2617_v40 = vld [vmem:[#allocation3] sm:$0xff]  ;;  %v2618_v16 = vld [vmem:[#allocation3 + $0x8] sm:$0xff] }
 0x2ef   : > { %v1839_v48 = vld [vmem:[#allocation3 + $0x16a] sm:$0xff]  ;;  %3771 = vmatprep.mubr.msk.bf16.mxu1 %vm1513_vm0, %v1896_v29  ;;  %v1840_v21 = vld [vmem:[#allocation3 + $0x172] sm:$0xff] }
 0x2f0   : > { %v1695_v5 = vld [vmem:[#allocation3 + $0x171] sm:$0xff]  ;;  %1591 = vst.msk [vmem:[#allocation3 + $0x189] sm:$0xff] %vm1513_vm0, %v1512_v59  ;;  %v1860_v25 = vpack.c.bf16 %v1840_v21, %v1839_v48  ;;  %1880 = vst.msk [vmem:[#allocation4 + $0x118] sm:$0xff] %vm1513_vm0, %v1862_v43 }
 0x2f1   : > { %v1623_v54 = vld [vmem:[#allocation3 + $0x170] sm:$0xff]  ;;  %v1715_v4 = vpack.c.bf16 %v1695_v5, %v1694_v32 }
 0x2f2   : > { %v1643_v1 = vpack.c.bf16 %v1623_v54, %v1622_v31  ;;  %1878 = vst.msk [vmem:[#allocation4 + $0xf8] sm:$0xff] %vm1513_vm0, %v1860_v25  ;;  %v4051_v54 = vld [vmem:[%s5957_s3 + $0x4] ss:$8 sps:$4 sm:$0xff]  }
 0x2f3   : > { %1766 = vrot.lane.b32.xlu1 %v1715_v4, %s4151_s8  ;;  %v1753_v6 = vpop.permute.xlu0 %1752  ;;  %v1696_v8 = vld [vmem:[#allocation3 + $0x181] sm:$0xff]  ;;  %v1910_v15 = vld [vmem:[#allocation4 + $0xe8] sm:$0xff]  ;;  %3139 = vmatprep.subr.bf16.mxu1 %v4051_v54 }
 0x2f4   : > { %1661 = vst.msk [vmem:[#allocation4 + $0xf0] sm:$0xff] %vm1513_vm0, %v1643_v1  ;;  %v1895_v17 = vld [vmem:[#allocation4 + $0x70] sm:$0xff] }
 0x2f5   : > { %1799 = vst.msk [vmem:[#allocation4 + $0x80] sm:$0xff] %vm1790_vm3, %v1753_v6  ;;  %v1624_v20 = vld [vmem:[#allocation3 + $0x180] sm:$0xff]  ;;  %v4054_v6 = vld [vmem:[%s5957_s3 + $0x14] ss:$8 sps:$4 sm:$0xff]  }
 0x2f6   : > { %2214 = vmatmul.mubr.bf16.gmra.mrb[28].mxu1 %v1895_v17  ;;  %v4049_v1 = vld [vmem:[%s5957_s3] ss:$8 sps:$4 sm:$0xff]   ;;  %v4052_v17 = vld [vmem:[%s5957_s3 + $0x10] ss:$8 sps:$4 sm:$0xff]  }
 0x2f7   : > { %1770 = vrot.lane.b32.xlu1 %v1717_v30, %s4151_s8  ;;  %v1841_v35 = vld [vmem:[#allocation3 + $0x182] sm:$0xff]  ;;  %3772 = vmatprep.mubr.msk.bf16.mxu1 %vm1513_vm0, %v1898_v19  ;;  %v1842_v49 = vld [vmem:[#allocation3 + $0x18a] sm:$0xff] }
 0x2f8   : > { %v1697_v26 = vld [vmem:[#allocation3 + $0x189] sm:$0xff]  ;;  %v1861_v38 = vpack.c.bf16 %v1842_v49, %v1841_v35  ;;  %3140 = vmatpush1.bf16.msra.mxu1 %v4049_v1 }
 0x2f9   : > { %v1625_v44 = vld [vmem:[#allocation3 + $0x188] sm:$0xff]  ;;  %v1716_v58 = vpack.c.bf16 %v1697_v26, %v1696_v8  ;;  %3141 = vmatprep.subr.bf16.mxu1 %v4054_v6 }
 0x2fa   : > { %v1644_v11 = vpack.c.bf16 %v1625_v44, %v1624_v20  ;;  %1879 = vst.msk [vmem:[#allocation4 + $0x108] sm:$0xff] %vm1513_vm0, %v1861_v38  ;;  %v1912_v45 = vld [vmem:[#allocation4 + $0xf8] sm:$0xff] }
 0x2fb   : > { %1768 = vrot.lane.b32.xlu0 %v1716_v58, %s4151_s8  ;;  %v1755_v55 = vpop.permute.xlu1 %1754  ;;  %v1916_v63 = vld [vmem:[#allocation4 + $0x118] sm:$0xff]  ;;  %v4060_v58 = vld [vmem:[%s5957_s3 + $0x34] ss:$8 sps:$4 sm:$0xff]  }
 0x2fc   : > { %1662 = vst.msk [vmem:[#allocation4 + $0x100] sm:$0xff] %vm1513_vm0, %v1644_v11  ;;  %v1897_v22 = vld [vmem:[#allocation4 + $0x80] sm:$0xff]  ;;  %2904 = vst.msk [vmem:[#allocation4 + $0x118] sm:$0xff] %vm1513_vm0, %v1862_v43  ;;  %3142 = vmatpush1.bf16.msra.mxu1 %v4052_v17  ;;  %v4057_v19 = vld [vmem:[%s5957_s3 + $0x24] ss:$8 sps:$4 sm:$0xff]  }
 0x2fd   : > { %1800 = vst.msk [vmem:[#allocation4 + $0x90] sm:$0xff] %vm1790_vm3, %v1755_v55  ;;  %v4055_v20 = vld [vmem:[%s5957_s3 + $0x20] ss:$8 sps:$4 sm:$0xff]   ;;  %3143 = vmatprep.subr.bf16.mxu1 %v4057_v19  ;;  %v4058_v11 = vld [vmem:[%s5957_s3 + $0x30] ss:$8 sps:$4 sm:$0xff]  }
 0x2fe   : > { %2224 = vmatmul.mubr.bf16.gmra.mrb[32].mxu1 %v1897_v22  ;;  %v4063_v49 = vld [vmem:[%s5957_s3 + $0x44] ss:$8 sps:$4 sm:$0xff]   ;;  %v4061_v55 = vld [vmem:[%s5957_s3 + $0x40] ss:$8 sps:$4 sm:$0xff]  }
 0x2ff   : > { %3773 = vmatprep.mubr.msk.bf16.mxu1 %vm1513_vm0, %v1900_v3  ;;  %v4081_v43 = vld [vmem:[%s5957_s3 + $0xa4] ss:$8 sps:$4 sm:$0xff]  }
 0x300   : > { %3144 = vmatpush1.bf16.msra.mxu1 %v4055_v20 }
 0x301   : > { %v1914_v51 = vld [vmem:[#allocation4 + $0x108] sm:$0xff]  ;;  %3145 = vmatprep.subr.bf16.mxu1 %v4060_v58 }
 0x303   : > { %v1757_v41 = vpop.permute.xlu0 %1756 }
 0x304   : > { %1801 = vst.msk [vmem:[#allocation4 + $0xa0] sm:$0xff] %vm1790_vm3, %v1757_v41  ;;  %v1899_v61 = vld [vmem:[#allocation4 + $0x90] sm:$0xff]  ;;  %3146 = vmatpush1.bf16.msra.mxu1 %v4058_v11 }
 0x305   : > { %3147 = vmatprep.subr.bf16.mxu1 %v4063_v49 }
 0x306   : > { %2234 = vmatmul.mubr.bf16.gmra.mrb[36].mxu1 %v1899_v61  ;;  %v4066_v61 = vld [vmem:[%s5957_s3 + $0x54] ss:$8 sps:$4 sm:$0xff]  }
 0x307   : > { %3774 = vmatprep.mubr.msk.bf16.mxu1 %vm1513_vm0, %v1902_v46  ;;  %v4064_v46 = vld [vmem:[%s5957_s3 + $0x50] ss:$8 sps:$4 sm:$0xff]  }
 0x308   : > { %3148 = vmatpush1.bf16.msra.mxu1 %v4061_v55  ;;  %v5264_v55 = vld [vmem:[%s5959_s5] ss:$0 sm:$0xff] }
 0x309   : > { %3149 = vmatprep.subr.bf16.mxu1 %v4066_v61 }
 0x30b   : > { %v1901_v7 = vld [vmem:[#allocation4 + $0xa0] sm:$0xff] }
 0x30c   : > { %3150 = vmatpush1.bf16.msra.mxu1 %v4064_v46 }
 0x30e   : > { %2244 = vmatmul.mubr.bf16.gmra.mrb[40].mxu1 %v1901_v7  ;;  %v4069_v7 = vld [vmem:[%s5957_s3 + $0x64] ss:$8 sps:$4 sm:$0xff]  }
 0x30f   : > { %3775 = vmatprep.mubr.msk.bf16.mxu1 %vm1513_vm0, %v1904_v0  ;;  %3151 = vmatprep.subr.bf16.mxu1 %v4069_v7 }
 0x346   : > { %v1759_v9 = vpop.permute.xlu1 %1758 }
 0x347   : > { %1802 = vst.msk [vmem:[#allocation4 + $0xb0] sm:$0xff] %vm1790_vm3, %v1759_v9  ;;  %v4067_v9 = vld [vmem:[%s5957_s3 + $0x60] ss:$8 sps:$4 sm:$0xff]  }
 0x348   : > { %3152 = vmatpush1.bf16.msra.mxu1 %v4067_v9 }
 0x34e   : > { %v1761_v27 = vpop.permute.xlu0 %1760  ;;  %v1903_v2 = vld [vmem:[#allocation4 + $0xb0] sm:$0xff] }
 0x34f   : > { %1803 = vst.msk [vmem:[#allocation4 + $0xc0] sm:$0xff] %vm1790_vm3, %v1761_v27  ;;  %2254 = vmatmul.mubr.bf16.gmra.mrb[44].mxu1 %v1903_v2 }
 0x350   : > { %3776 = vmatprep.mubr.msk.bf16.mxu1 %vm1513_vm0, %v1906_v12 }
 0x354   : > { %v1763_v60 = vpop.permute.xlu1 %1762 }
 0x355   : > { %v5052_v50 = vpop.f32.mrb[0].mxu1  ;;  %1804 = vst.msk [vmem:[#allocation4 + $0xd0] sm:$0xff] %vm1790_vm3, %v1763_v60  ;;  %v4072_v60 = vld [vmem:[%s5957_s3 + $0x74] ss:$8 sps:$4 sm:$0xff]  }
 0x356   : > { %v2151_v14 = vpop.f32.mrb[1].mxu1  ;;  %v1905_v47 = vld [vmem:[#allocation4 + $0xc0] sm:$0xff]  ;;  %3153 = vmatprep.subr.bf16.mxu1 %v4072_v60 }
 0x357   : > { %v5055_v24 = vpop.f32.mrb[2].mxu1  ;;  %2264 = vmatmul.mubr.bf16.gmra.mrb[48].mxu1 %v1905_v47  ;;  %v4070_v14 = vld [vmem:[%s5957_s3 + $0x70] ss:$8 sps:$4 sm:$0xff]   ;;  %v4075_v47 = vld [vmem:[%s5957_s3 + $0x84] ss:$8 sps:$4 sm:$0xff]  }
 0x358   : > { %v2154_v13 = vpop.f32.mrb[3].mxu1  ;;  %3777 = vmatprep.mubr.msk.bf16.mxu1 %vm1513_vm0, %v1908_v10  ;;  %3154 = vmatpush1.bf16.msra.mxu1 %v4070_v14 }
 0x359   : > { %v4073_v13 = vld [vmem:[%s5957_s3 + $0x80] ss:$8 sps:$4 sm:$0xff]   ;;  %3155 = vmatprep.subr.bf16.mxu1 %v4075_v47 }
 0x35c   : > { %v1765_v62 = vpop.permute.xlu0 %1764  ;;  %v1907_v37 = vld [vmem:[#allocation4 + $0xd0] sm:$0xff]  ;;  %3156 = vmatpush1.bf16.msra.mxu1 %v4073_v13 }
 0x35d   : > { %1805 = vst.msk [vmem:[#allocation4 + $0xe0] sm:$0xff] %vm1790_vm3, %v1765_v62  ;;  %3157 = vmatprep.subr.bf16.mxu1 %v4078_v53 }
 0x35f   : > { %2274 = vmatmul.mubr.bf16.gmra.mrb[52].mxu1 %v1907_v37  ;;  %v4076_v37 = vld [vmem:[%s5957_s3 + $0x90] ss:$8 sps:$4 sm:$0xff]  }
 0x360   : > { %3778 = vmatprep.mubr.msk.bf16.mxu1 %vm1513_vm0, %v1910_v15  ;;  %3158 = vmatpush1.bf16.msra.mxu1 %v4076_v37  ;;  %v2653_v15 = vpack.c.bf16 %v2618_v16, %v2617_v40 }
 0x361   : > { %3159 = vmatprep.subr.bf16.mxu1 %v4081_v43 }
 0x362   : > { %2671 = vst.msk [vmem:[#allocation4] sm:$0xff] %vm1513_vm0, %v2653_v15 }
 0x364   : > { %v1909_v56 = vld [vmem:[#allocation4 + $0xe0] sm:$0xff] }
 0x365   : > { %v1767_v33 = vpop.permute.xlu1 %1766 }
 0x366   : > { %1806 = vst.msk [vmem:[#allocation4 + $0xf0] sm:$0xff] %vm1790_vm3, %v1767_v33 }
 0x367   : > { %2284 = vmatmul.mubr.bf16.gmra.mrb[56].mxu1 %v1909_v56  ;;  %v4079_v56 = vld [vmem:[%s5957_s3 + $0xa0] ss:$8 sps:$4 sm:$0xff]  }
 0x368   : > { %3779 = vmatprep.mubr.msk.bf16.mxu1 %vm1513_vm0, %v1912_v45  ;;  %3160 = vmatpush1.bf16.msra.mxu1 %v4079_v56 }
 0x369   : > { %v1771_v39 = vpop.permute.xlu1 %1770 }
 0x36a   : > { %1808 = vst.msk [vmem:[#allocation4 + $0x110] sm:$0xff] %vm1790_vm3, %v1771_v39 }
 0x36d   : > { %v1769_v36 = vpop.permute.xlu0 %1768  ;;  %v1911_v28 = vld [vmem:[#allocation4 + $0xf0] sm:$0xff] }
 0x36e   : > { %1807 = vst.msk [vmem:[#allocation4 + $0x100] sm:$0xff] %vm1790_vm3, %v1769_v36  ;;  %v4084_v36 = vld [vmem:[%s5957_s3 + $0xb4] ss:$8 sps:$4 sm:$0xff]  }
 0x36f   : > { %2294 = vmatmul.mubr.bf16.gmra.mrb[60].mxu1 %v1911_v28  ;;  %v4082_v28 = vld [vmem:[%s5957_s3 + $0xb0] ss:$8 sps:$4 sm:$0xff]   ;;  %3161 = vmatprep.subr.bf16.mxu1 %v4084_v36 }
 0x370   : > { %3780 = vmatprep.mubr.msk.bf16.mxu1 %vm1513_vm0, %v1914_v51  ;;  %v2689_v51 = vld [vmem:[#allocation3 + $0x1] sm:$0xff]  ;;  %3162 = vmatpush1.bf16.msra.mxu1 %v4082_v28 }
 0x371   : > { %v1915_v42 = vld [vmem:[#allocation4 + $0x110] sm:$0xff] }
 0x375   : > { %v1913_v18 = vld [vmem:[#allocation4 + $0x100] sm:$0xff] }
 0x377   : > { %2304 = vmatmul.mubr.bf16.gmra.mrb[64].mxu1 %v1913_v18  ;;  %v2690_v18 = vld [vmem:[#allocation3 + $0x9] sm:$0xff] }
 0x378   : > { %3781 = vmatprep.mubr.msk.bf16.mxu1 %vm1513_vm0, %v1916_v63  ;;  %v2725_v54 = vpack.c.bf16 %v2690_v18, %v2689_v51 }
 0x37f   : > { %2314 = vmatmul.mubr.bf16.gmra.mrb[68].mxu1 %v1915_v42  ;;  %v2906_v42 = vld [vmem:[#allocation4 + $0x8] sm:$0xff] }
 0x380   : > { %3807 = vmatprep.mubr.msk.bf16.mxu1 %vm1513_vm0, %v2906_v42 }
 0x399   : > { %v5069_v29 = vpop.f32.mrb[4].mxu1 }
 0x39a   : > { %2354 = vrot.lane.b32.xlu0 %v5069_v29, %s4151_s8  ;;  %v2159_v32 = vpop.f32.mrb[5].mxu1 }
 0x39b   : > { %v5073_v59 = vpop.f32.mrb[6].mxu1 }
 0x39c   : > { %2356 = vrot.lane.b32.xlu1 %v5073_v59, %s4151_s8  ;;  %v2162_v31 = vpop.f32.mrb[7].mxu1 }
 0x3a1   : > { %v5077_v23 = vpop.f32.mrb[8].mxu1 }
 0x3a2   : > { %2358 = vrot.lane.b32.xlu0 %v5077_v23, %s4151_s8  ;;  %v5081_v52 = vpop.f32.mrb[9].mxu1 }
 0x3a3   : > { %v5083_v48 = vpop.f32.mrb[10].mxu1 }
 0x3a4   : > { %2360 = vrot.lane.b32.xlu1 %v5083_v48, %s4151_s8  ;;  %v5087_v5 = vpop.f32.mrb[11].mxu1 }
 0x3a9   : > { %v5092_v4 = vpop.f32.mrb[12].mxu1 }
 0x3aa   : > { %2362 = vrot.lane.b32.xlu0 %v5092_v4, %s4151_s8  ;;  %v5099_v21 = vpop.f32.mrb[13].mxu1 }
 0x3ab   : > { %v5101_v25 = vpop.f32.mrb[14].mxu1 }
 0x3ac   : > { %2364 = vrot.lane.b32.xlu1 %v5101_v25, %s4151_s8  ;;  %v5105_v30 = vpop.f32.mrb[15].mxu1 }
 0x3b1   : > { %v5116_v8 = vpop.f32.mrb[16].mxu1 }
 0x3b2   : > { %2366 = vrot.lane.b32.xlu0 %v5116_v8, %s4151_s8  ;;  %v5123_v35 = vpop.f32.mrb[17].mxu1 }
 0x3b3   : > { %v5125_v26 = vpop.f32.mrb[18].mxu1 }
 0x3b4   : > { %2368 = vrot.lane.b32.xlu1 %v5125_v26, %s4151_s8  ;;  %v5129_v44 = vpop.f32.mrb[19].mxu1 }
 0x3b9   : > { %v5140_v38 = vpop.f32.mrb[20].mxu1 }
 0x3ba   : > { %2370 = vrot.lane.b32.xlu0 %v5140_v38, %s4151_s8  ;;  %v5147_v22 = vpop.f32.mrb[21].mxu1 }
 0x3bb   : > { %v5149_v3 = vpop.f32.mrb[22].mxu1 }
 0x3bc   : > { %2372 = vrot.lane.b32.xlu1 %v5149_v3, %s4151_s8  ;;  %v5153_v41 = vpop.f32.mrb[23].mxu1 }
 0x3c1   : > { %v5164_v0 = vpop.f32.mrb[24].mxu1 }
 0x3c2   : > { %2374 = vrot.lane.b32.xlu0 %v5164_v0, %s4151_s8  ;;  %v5171_v27 = vpop.f32.mrb[25].mxu1 }
 0x3c3   : > { %v5173_v2 = vpop.f32.mrb[26].mxu1 }
 0x3c4   : > { %2376 = vrot.lane.b32.xlu1 %v5173_v2, %s4151_s8  ;;  %v5177_v12 = vpop.f32.mrb[27].mxu1 }
 0x3c9   : > { %v5188_v10 = vpop.f32.mrb[28].mxu1 }
 0x3ca   : > { %2378 = vrot.lane.b32.xlu0 %v5188_v10, %s4151_s8  ;;  %v5195_v62 = vpop.f32.mrb[29].mxu1 }
 0x3cb   : > { %v5197_v57 = vpop.f32.mrb[30].mxu1 }
 0x3cc   : > { %2380 = vrot.lane.b32.xlu1 %v5197_v57, %s4151_s8  ;;  %v5201_v34 = vpop.f32.mrb[31].mxu1 }
 0x3d1   : > { %v5212_v33 = vpop.f32.mrb[32].mxu1 }
 0x3d2   : > { %2382 = vrot.lane.b32.xlu0 %v5212_v33, %s4151_s8  ;;  %v5220_v45 = vpop.f32.mrb[33].mxu1 }
 0x3d3   : > { %v5222_v39 = vpop.f32.mrb[34].mxu1 }
 0x3d4   : > { %2384 = vrot.lane.b32.xlu1 %v5222_v39, %s4151_s8  ;;  %v5226_v63 = vpop.f32.mrb[35].mxu1 }
 0x3d9   : > { %v5234_v32 = vpop.f32.mrb[36].mxu1 }
 0x3da   : > { %2386 = vrot.lane.b32.xlu0 %v5234_v32, %s4151_s8  ;;  %v5239_v31 = vpop.f32.mrb[37].mxu1 }
 0x3db   : > { %v5241_v1 = vpop.f32.mrb[38].mxu1 }
 0x3dc   : > { %2388 = vrot.lane.b32.xlu1 %v5241_v1, %s4151_s8  ;;  %v5245_v6 = vpop.f32.mrb[39].mxu1 }
 0x3de   : > { %2761 = vrot.lane.b32.xlu0 %v2725_v54, %s4151_s8 }
 0x3e1   : > { %v5248_v17 = vpop.f32.mrb[40].mxu1 }
 0x3e2   : > { %2390 = vrot.lane.b32.xlu1 %v5248_v17, %s4151_s8  ;;  %v5252_v19 = vpop.f32.mrb[41].mxu1 }
 0x3e3   : > { %v5254_v20 = vpop.f32.mrb[42].mxu1 }
 0x3e4   : > { %2392 = vrot.lane.b32.xlu0 %v5254_v20, %s4151_s8  ;;  %v5258_v58 = vpop.f32.mrb[43].mxu1 }
 0x40c   : > { %v2355_v11 = vpop.permute.xlu0 %2354 }
 0x40d   : > { %v2450_v49 = vadd.f32 %v2355_v11, %v5052_v50 }
 0x40e   : > { %v2357_v61 = vpop.permute.xlu1 %2356 }
 0x40f   : > { %v2482_v46 = vadd.f32 %v2450_v49, %v5081_v52  ;;  %v2451_v7 = vadd.f32 %v2357_v61, %v5055_v24 }
 0x411   : > { %v2521_v9 = vadd.f32 %v5264_v55, %v2482_v46  ;;  %v2483_v60 = vadd.f32 %v2451_v7, %v5087_v5 }
 0x413   : > { %v2553_v14 = vmax.f32 %v2521_v9, 0.0  ;;  %v2522_v47 = vadd.f32 %v5264_v55, %v2483_v60 }
 0x414   : > { %v2359_v13 = vpop.permute.xlu0 %2358 }
 0x415   : > { %2585 = vst.msk [vmem:[#allocation3 + $0x19] sm:$0xff] %vm1513_vm0, %v2553_v14  ;;  %v2554_v50 = vmax.f32 %v2522_v47, 0.0  ;;  %v2452_v53 = vadd.f32 %v2359_v13, %v5069_v29 }
 0x416   : > { %v2361_v37 = vpop.permute.xlu1 %2360 }
 0x417   : > { %2586 = vst.msk [vmem:[#allocation3 + $0x21] sm:$0xff] %vm1513_vm0, %v2554_v50  ;;  %v2484_v52 = vadd.f32 %v2452_v53, %v5099_v21  ;;  %v2453_v24 = vadd.f32 %v2361_v37, %v5073_v59 }
 0x419   : > { %v2523_v40 = vadd.f32 %v5264_v55, %v2484_v52  ;;  %v2485_v5 = vadd.f32 %v2453_v24, %v5105_v30 }
 0x41b   : > { %v2555_v16 = vmax.f32 %v2523_v40, 0.0  ;;  %v2524_v15 = vadd.f32 %v5264_v55, %v2485_v5 }
 0x41c   : > { %v2363_v43 = vpop.permute.xlu0 %2362  ;;  %v2691_v36 = vld [vmem:[#allocation3 + $0x19] sm:$0xff] }
 0x41d   : > { %2587 = vst.msk [vmem:[#allocation3 + $0x31] sm:$0xff] %vm1513_vm0, %v2555_v16  ;;  %v2556_v56 = vmax.f32 %v2524_v15, 0.0  ;;  %v2454_v29 = vadd.f32 %v2363_v43, %v5077_v23  ;;  %v2619_v11 = vld [vmem:[#allocation3 + $0x18] sm:$0xff] }
 0x41e   : > { %v2365_v28 = vpop.permute.xlu1 %2364  ;;  %v2692_v51 = vld [vmem:[#allocation3 + $0x21] sm:$0xff] }
 0x41f   : > { %v2835_v18 = vld [vmem:[#allocation3 + $0x1a] sm:$0xff]  ;;  %v2836_v21 = vld [vmem:[#allocation3 + $0x22] sm:$0xff]  ;;  %2588 = vst.msk [vmem:[#allocation3 + $0x39] sm:$0xff] %vm1513_vm0, %v2556_v56  ;;  %v2486_v59 = vadd.f32 %v2454_v29, %v5123_v35  ;;  %v2455_v30 = vadd.f32 %v2365_v28, %v5083_v48  ;;  %v2726_v42 = vpack.c.bf16 %v2692_v51, %v2691_v36 }
 0x420   : > { %v2870_v54 = vpack.c.bf16 %v2836_v21, %v2835_v18  ;;  %v2620_v49 = vld [vmem:[#allocation3 + $0x20] sm:$0xff] }
 0x421   : > { %v2654_v61 = vpack.c.bf16 %v2620_v49, %v2619_v11  ;;  %v2525_v46 = vadd.f32 %v5264_v55, %v2486_v59  ;;  %v2487_v23 = vadd.f32 %v2455_v30, %v5129_v44  ;;  %2763 = vrot.lane.b32.xlu1 %v2726_v42, %s4151_s8 }
 0x422   : > { %2888 = vst.msk [vmem:[#allocation4 + $0x18] sm:$0xff] %vm1513_vm0, %v2870_v54  ;;  %v5288_v7 = vpop.f32.mrb[44].mxu1 }
 0x423   : > { %2672 = vst.msk [vmem:[#allocation4 + $0x10] sm:$0xff] %vm1513_vm0, %v2654_v61  ;;  %v2557_v35 = vmax.f32 %v2525_v46, 0.0  ;;  %v2526_v48 = vadd.f32 %v5264_v55, %v2487_v23  ;;  %2394 = vrot.lane.b32.xlu0 %v5288_v7, %s4151_s8  ;;  %v5294_v9 = vpop.f32.mrb[45].mxu1 }
 0x424   : > { %v2367_v60 = vpop.permute.xlu0 %2366  ;;  %v5296_v14 = vpop.f32.mrb[46].mxu1  ;;  %v2693_v50 = vld [vmem:[#allocation3 + $0x31] sm:$0xff] }
 0x425   : > { %2589 = vst.msk [vmem:[#allocation3 + $0x49] sm:$0xff] %vm1513_vm0, %v2557_v35  ;;  %v2558_v44 = vmax.f32 %v2526_v48, 0.0  ;;  %v2456_v47 = vadd.f32 %v2367_v60, %v5092_v4  ;;  %2396 = vrot.lane.b32.xlu1 %v5296_v14, %s4151_s8  ;;  %v5302_v13 = vpop.f32.mrb[47].mxu1  ;;  %v2621_v53 = vld [vmem:[#allocation3 + $0x30] sm:$0xff] }
 0x426   : > { %v2369_v37 = vpop.permute.xlu1 %2368  ;;  %v2694_v52 = vld [vmem:[#allocation3 + $0x39] sm:$0xff] }
 0x427   : > { %v2622_v24 = vld [vmem:[#allocation3 + $0x38] sm:$0xff]  ;;  %2590 = vst.msk [vmem:[#allocation3 + $0x51] sm:$0xff] %vm1513_vm0, %v2558_v44  ;;  %v2488_v5 = vadd.f32 %v2456_v47, %v5147_v22  ;;  %v2457_v16 = vadd.f32 %v2369_v37, %v5101_v25  ;;  %v2727_v15 = vpack.c.bf16 %v2694_v52, %v2693_v50 }
 0x428   : > { %v2837_v40 = vld [vmem:[#allocation3 + $0x32] sm:$0xff]  ;;  %v2655_v43 = vpack.c.bf16 %v2622_v24, %v2621_v53  ;;  %v2838_v4 = vld [vmem:[#allocation3 + $0x3a] sm:$0xff] }
 0x429   : > { %v2871_v56 = vpack.c.bf16 %v2838_v4, %v2837_v40  ;;  %v2527_v29 = vadd.f32 %v5264_v55, %v2488_v5  ;;  %v2489_v36 = vadd.f32 %v2457_v16, %v5153_v41  ;;  %2765 = vrot.lane.b32.xlu0 %v2727_v15, %s4151_s8 }
 0x42a   : > { %2673 = vst.msk [vmem:[#allocation4 + $0x20] sm:$0xff] %vm1513_vm0, %v2655_v43  ;;  %v5311_v28 = vpop.f32.mrb[48].mxu1 }
 0x42b   : > { %2889 = vst.msk [vmem:[#allocation4 + $0x28] sm:$0xff] %vm1513_vm0, %v2871_v56  ;;  %v2559_v51 = vmax.f32 %v2527_v29, 0.0  ;;  %v2528_v22 = vadd.f32 %v5264_v55, %v2489_v36  ;;  %2398 = vrot.lane.b32.xlu1 %v5311_v28, %s4151_s8  ;;  %v5317_v25 = vpop.f32.mrb[49].mxu1 }
 0x42c   : > { %v2371_v18 = vpop.permute.xlu0 %2370  ;;  %v5319_v21 = vpop.f32.mrb[50].mxu1  ;;  %v2695_v42 = vld [vmem:[#allocation3 + $0x49] sm:$0xff] }
 0x42d   : > { %2591 = vst.msk [vmem:[#allocation3 + $0x61] sm:$0xff] %vm1513_vm0, %v2559_v51  ;;  %v2560_v41 = vmax.f32 %v2528_v22, 0.0  ;;  %v2458_v59 = vadd.f32 %v2371_v18, %v5116_v8  ;;  %2400 = vrot.lane.b32.xlu0 %v5319_v21, %s4151_s8  ;;  %v5325_v30 = vpop.f32.mrb[51].mxu1  ;;  %v2623_v54 = vld [vmem:[#allocation3 + $0x48] sm:$0xff] }
 0x42e   : > { %v2373_v11 = vpop.permute.xlu1 %2372  ;;  %v2696_v49 = vld [vmem:[#allocation3 + $0x51] sm:$0xff] }
 0x42f   : > { %v2624_v61 = vld [vmem:[#allocation3 + $0x50] sm:$0xff]  ;;  %2592 = vst.msk [vmem:[#allocation3 + $0x69] sm:$0xff] %vm1513_vm0, %v2560_v41  ;;  %v2490_v23 = vadd.f32 %v2458_v59, %v5171_v27  ;;  %v2459_v35 = vadd.f32 %v2373_v11, %v5125_v26  ;;  %v2728_v48 = vpack.c.bf16 %v2696_v49, %v2695_v42 }
 0x430   : > { %v2839_v46 = vld [vmem:[#allocation3 + $0x4a] sm:$0xff]  ;;  %v2656_v60 = vpack.c.bf16 %v2624_v61, %v2623_v54  ;;  %v2840_v8 = vld [vmem:[#allocation3 + $0x52] sm:$0xff] }
 0x431   : > { %v2872_v44 = vpack.c.bf16 %v2840_v8, %v2839_v46  ;;  %v2529_v47 = vadd.f32 %v5264_v55, %v2490_v23  ;;  %v2491_v50 = vadd.f32 %v2459_v35, %v5177_v12  ;;  %2767 = vrot.lane.b32.xlu1 %v2728_v48, %s4151_s8 }
 0x432   : > { %2674 = vst.msk [vmem:[#allocation4 + $0x30] sm:$0xff] %vm1513_vm0, %v2656_v60  ;;  %v5334_v53 = vpop.f32.mrb[52].mxu1 }
 0x433   : > { %2890 = vst.msk [vmem:[#allocation4 + $0x38] sm:$0xff] %vm1513_vm0, %v2872_v44  ;;  %v2561_v37 = vmax.f32 %v2529_v47, 0.0  ;;  %v2530_v27 = vadd.f32 %v5264_v55, %v2491_v50  ;;  %2402 = vrot.lane.b32.xlu0 %v5334_v53, %s4151_s8  ;;  %v5340_v26 = vpop.f32.mrb[53].mxu1 }
 0x434   : > { %v2375_v52 = vpop.permute.xlu0 %2374  ;;  %v5342_v24 = vpop.f32.mrb[54].mxu1  ;;  %v2697_v16 = vld [vmem:[#allocation3 + $0x61] sm:$0xff] }
 0x435   : > { %2593 = vst.msk [vmem:[#allocation3 + $0x79] sm:$0xff] %vm1513_vm0, %v2561_v37  ;;  %v2562_v12 = vmax.f32 %v2530_v27, 0.0  ;;  %v2460_v40 = vadd.f32 %v2375_v52, %v5140_v38  ;;  %2404 = vrot.lane.b32.xlu1 %v5342_v24, %s4151_s8  ;;  %v5348_v5 = vpop.f32.mrb[55].mxu1  ;;  %v2625_v15 = vld [vmem:[#allocation3 + $0x60] sm:$0xff] }
 0x436   : > { %v2377_v43 = vpop.permute.xlu1 %2376  ;;  %v2698_v4 = vld [vmem:[#allocation3 + $0x69] sm:$0xff] }
 0x437   : > { %v2626_v56 = vld [vmem:[#allocation3 + $0x68] sm:$0xff]  ;;  %2594 = vst.msk [vmem:[#allocation3 + $0x81] sm:$0xff] %vm1513_vm0, %v2562_v12  ;;  %v2492_v36 = vadd.f32 %v2460_v40, %v5195_v62  ;;  %v2461_v51 = vadd.f32 %v2377_v43, %v5149_v3  ;;  %v2729_v22 = vpack.c.bf16 %v2698_v4, %v2697_v16 }
 0x438   : > { %v2841_v29 = vld [vmem:[#allocation3 + $0x62] sm:$0xff]  ;;  %v2657_v18 = vpack.c.bf16 %v2626_v56, %v2625_v15  ;;  %v2842_v38 = vld [vmem:[#allocation3 + $0x6a] sm:$0xff] }
 0x439   : > { %v2873_v41 = vpack.c.bf16 %v2842_v38, %v2841_v29  ;;  %v2531_v59 = vadd.f32 %v5264_v55, %v2492_v36  ;;  %v2493_v42 = vadd.f32 %v2461_v51, %v5201_v34  ;;  %2769 = vrot.lane.b32.xlu0 %v2729_v22, %s4151_s8 }
 0x43a   : > { %2675 = vst.msk [vmem:[#allocation4 + $0x40] sm:$0xff] %vm1513_vm0, %v2657_v18  ;;  %v5357_v54 = vpop.f32.mrb[56].mxu1 }
 0x43b   : > { %2891 = vst.msk [vmem:[#allocation4 + $0x48] sm:$0xff] %vm1513_vm0, %v2873_v41  ;;  %v2563_v11 = vmax.f32 %v2531_v59, 0.0  ;;  %v2532_v62 = vadd.f32 %v5264_v55, %v2493_v42  ;;  %2406 = vrot.lane.b32.xlu1 %v5357_v54, %s4151_s8  ;;  %v5363_v3 = vpop.f32.mrb[57].mxu1 }
 0x43c   : > { %v2379_v49 = vpop.permute.xlu0 %2378  ;;  %v5365_v61 = vpop.f32.mrb[58].mxu1  ;;  %v2699_v35 = vld [vmem:[#allocation3 + $0x79] sm:$0xff] }
 0x43d   : > { %2595 = vst.msk [vmem:[#allocation3 + $0x91] sm:$0xff] %vm1513_vm0, %v2563_v11  ;;  %v2564_v34 = vmax.f32 %v2532_v62, 0.0  ;;  %v2462_v46 = vadd.f32 %v2379_v49, %v5164_v0  ;;  %2408 = vrot.lane.b32.xlu0 %v5365_v61, %s4151_s8  ;;  %v5371_v23 = vpop.f32.mrb[59].mxu1  ;;  %v2627_v48 = vld [vmem:[#allocation3 + $0x78] sm:$0xff] }
 0x43e   : > { %v2381_v60 = vpop.permute.xlu1 %2380  ;;  %v2700_v8 = vld [vmem:[#allocation3 + $0x81] sm:$0xff] }
 0x43f   : > { %v2628_v44 = vld [vmem:[#allocation3 + $0x80] sm:$0xff]  ;;  %2596 = vst.msk [vmem:[#allocation3 + $0x99] sm:$0xff] %vm1513_vm0, %v2564_v34  ;;  %v2494_v50 = vadd.f32 %v2462_v46, %v5220_v45  ;;  %v2463_v37 = vadd.f32 %v2381_v60, %v5173_v2  ;;  %v2730_v27 = vpack.c.bf16 %v2700_v8, %v2699_v35 }
 0x440   : > { %v2843_v47 = vld [vmem:[#allocation3 + $0x7a] sm:$0xff]  ;;  %v2658_v52 = vpack.c.bf16 %v2628_v44, %v2627_v48  ;;  %v2844_v0 = vld [vmem:[#allocation3 + $0x82] sm:$0xff] }
 0x441   : > { %v2874_v12 = vpack.c.bf16 %v2844_v0, %v2843_v47  ;;  %v2533_v40 = vadd.f32 %v5264_v55, %v2494_v50  ;;  %v2495_v16 = vadd.f32 %v2463_v37, %v5226_v63  ;;  %2771 = vrot.lane.b32.xlu1 %v2730_v27, %s4151_s8 }
 0x442   : > { %2676 = vst.msk [vmem:[#allocation4 + $0x50] sm:$0xff] %vm1513_vm0, %v2658_v52  ;;  %v5380_v15 = vpop.f32.mrb[60].mxu1 }
 0x443   : > { %2892 = vst.msk [vmem:[#allocation4 + $0x58] sm:$0xff] %vm1513_vm0, %v2874_v12  ;;  %v2565_v43 = vmax.f32 %v2533_v40, 0.0  ;;  %v2534_v45 = vadd.f32 %v5264_v55, %v2495_v16  ;;  %2410 = vrot.lane.b32.xlu0 %v5380_v15, %s4151_s8  ;;  %v5386_v2 = vpop.f32.mrb[61].mxu1 }
 0x444   : > { %v2383_v4 = vpop.permute.xlu0 %2382  ;;  %v5388_v56 = vpop.f32.mrb[62].mxu1  ;;  %v2701_v51 = vld [vmem:[#allocation3 + $0x91] sm:$0xff] }
 0x445   : > { %2597 = vst.msk [vmem:[#allocation3 + $0xa9] sm:$0xff] %vm1513_vm0, %v2565_v43  ;;  %v2566_v63 = vmax.f32 %v2534_v45, 0.0  ;;  %v2464_v29 = vadd.f32 %v2383_v4, %v5188_v10  ;;  %2412 = vrot.lane.b32.xlu1 %v5388_v56, %s4151_s8  ;;  %v5394_v36 = vpop.f32.mrb[63].mxu1  ;;  %v2629_v22 = vld [vmem:[#allocation3 + $0x90] sm:$0xff] }
 0x446   : > { %v2385_v18 = vpop.permute.xlu1 %2384  ;;  %v2702_v38 = vld [vmem:[#allocation3 + $0x99] sm:$0xff] }
 0x447   : > { %v2630_v41 = vld [vmem:[#allocation3 + $0x98] sm:$0xff]  ;;  %2598 = vst.msk [vmem:[#allocation3 + $0xb1] sm:$0xff] %vm1513_vm0, %v2566_v63  ;;  %v2496_v42 = vadd.f32 %v2464_v29, %v5239_v31  ;;  %v2465_v11 = vadd.f32 %v2385_v18, %v5197_v57  ;;  %v2731_v62 = vpack.c.bf16 %v2702_v38, %v2701_v51 }
 0x448   : > { %v2845_v59 = vld [vmem:[#allocation3 + $0x92] sm:$0xff]  ;;  %v2659_v49 = vpack.c.bf16 %v2630_v41, %v2629_v22  ;;  %v2846_v10 = vld [vmem:[#allocation3 + $0x9a] sm:$0xff] }
 0x449   : > { %v2875_v34 = vpack.c.bf16 %v2846_v10, %v2845_v59  ;;  %v2535_v46 = vadd.f32 %v5264_v55, %v2496_v42  ;;  %v2497_v35 = vadd.f32 %v2465_v11, %v5245_v6  ;;  %2773 = vrot.lane.b32.xlu0 %v2731_v62, %s4151_s8 }
 0x44a   : > { %2677 = vst.msk [vmem:[#allocation4 + $0x60] sm:$0xff] %vm1513_vm0, %v2659_v49  ;;  %v2305_v48 = vpop.f32.mrb[64].mxu1 }
 0x44b   : > { %2893 = vst.msk [vmem:[#allocation4 + $0x68] sm:$0xff] %vm1513_vm0, %v2875_v34  ;;  %v2567_v60 = vmax.f32 %v2535_v46, 0.0  ;;  %v2536_v31 = vadd.f32 %v5264_v55, %v2497_v35  ;;  %2414 = vrot.lane.b32.xlu1 %v2305_v48, %s4151_s8  ;;  %v5406_v57 = vpop.f32.mrb[65].mxu1 }
 0x44c   : > { %v2387_v8 = vpop.permute.xlu0 %2386  ;;  %v2309_v44 = vpop.f32.mrb[66].mxu1  ;;  %v2703_v37 = vld [vmem:[#allocation3 + $0xa9] sm:$0xff] }
 0x44d   : > { %2599 = vst.msk [vmem:[#allocation3 + $0xc1] sm:$0xff] %vm1513_vm0, %v2567_v60  ;;  %v2568_v47 = vmax.f32 %v2536_v31, 0.0  ;;  %v2466_v6 = vadd.f32 %v2387_v8, %v5212_v33  ;;  %2416 = vrot.lane.b32.xlu0 %v2309_v44, %s4151_s8  ;;  %v5411_v50 = vpop.f32.mrb[67].mxu1  ;;  %v2631_v27 = vld [vmem:[#allocation3 + $0xa8] sm:$0xff] }
 0x44e   : > { %v2389_v52 = vpop.permute.xlu1 %2388  ;;  %v2704_v0 = vld [vmem:[#allocation3 + $0xb1] sm:$0xff] }
 0x44f   : > { %v2632_v12 = vld [vmem:[#allocation3 + $0xb0] sm:$0xff]  ;;  %2600 = vst.msk [vmem:[#allocation3 + $0xc9] sm:$0xff] %vm1513_vm0, %v2568_v47  ;;  %v2498_v16 = vadd.f32 %v2466_v6, %v5252_v19  ;;  %v2467_v43 = vadd.f32 %v2389_v52, %v5222_v39  ;;  %v2732_v45 = vpack.c.bf16 %v2704_v0, %v2703_v37 }
 0x450   : > { %v2847_v40 = vld [vmem:[#allocation3 + $0xaa] sm:$0xff]  ;;  %v2660_v4 = vpack.c.bf16 %v2632_v12, %v2631_v27  ;;  %v2848_v63 = vld [vmem:[#allocation3 + $0xb2] sm:$0xff]  ;;  %v2762_v33 = vpop.permute.xlu0 %2761 }
 0x451   : > { %v2876_v29 = vpack.c.bf16 %v2848_v63, %v2847_v40  ;;  %v2537_v51 = vadd.f32 %v5264_v55, %v2498_v16  ;;  %v2499_v22 = vadd.f32 %v2467_v43, %v5258_v58  ;;  %2815 = vst.msk [vmem:[#allocation4] sm:$0xff] %vm1790_vm3, %v2762_v33  ;;  %2775 = vrot.lane.b32.xlu1 %v2732_v45, %s4151_s8  ;;  %v2908_v27 = vld [vmem:[#allocation4 + $0x18] sm:$0xff] }
 0x452   : > { %2678 = vst.msk [vmem:[#allocation4 + $0x70] sm:$0xff] %vm1513_vm0, %v2660_v4  ;;  %v2315_v18 = vpop.f32.mrb[68].mxu1 }
 0x453   : > { %2894 = vst.msk [vmem:[#allocation4 + $0x78] sm:$0xff] %vm1513_vm0, %v2876_v29  ;;  %v2569_v19 = vmax.f32 %v2537_v51, 0.0  ;;  %v2538_v39 = vadd.f32 %v5264_v55, %v2499_v22  ;;  %v5423_v38 = vpop.f32.mrb[69].mxu1 }
 0x454   : > { %v2391_v41 = vpop.permute.xlu1 %2390  ;;  %v2318_v59 = vpop.f32.mrb[70].mxu1  ;;  %v2705_v11 = vld [vmem:[#allocation3 + $0xc1] sm:$0xff] }
 0x455   : > { %2601 = vst.msk [vmem:[#allocation3 + $0xd9] sm:$0xff] %vm1513_vm0, %v2569_v19  ;;  %v2570_v42 = vmax.f32 %v2538_v39, 0.0  ;;  %v2468_v58 = vadd.f32 %v2391_v41, %v5234_v32  ;;  %v5427_v62 = vpop.f32.mrb[71].mxu1  ;;  %v2633_v49 = vld [vmem:[#allocation3 + $0xc0] sm:$0xff] }
 0x456   : > { %v2393_v10 = vpop.permute.xlu0 %2392  ;;  %v2706_v34 = vld [vmem:[#allocation3 + $0xc9] sm:$0xff] }
 0x457   : > { %v2634_v46 = vld [vmem:[#allocation3 + $0xc8] sm:$0xff]  ;;  %2602 = vst.msk [vmem:[#allocation3 + $0xe1] sm:$0xff] %vm1513_vm0, %v2570_v42  ;;  %v2500_v48 = vadd.f32 %v2468_v58, %v5294_v9  ;;  %v2469_v60 = vadd.f32 %v2393_v10, %v5241_v1  ;;  %v2733_v31 = vpack.c.bf16 %v2706_v34, %v2705_v11 }
 0x458   : > { %v2849_v35 = vld [vmem:[#allocation3 + $0xc2] sm:$0xff]  ;;  %v2661_v8 = vpack.c.bf16 %v2634_v46, %v2633_v49  ;;  %v2850_v44 = vld [vmem:[#allocation3 + $0xca] sm:$0xff] }
 0x459   : > { %v2905_v47 = vld [vmem:[#allocation4] sm:$0xff]  ;;  %v2877_v6 = vpack.c.bf16 %v2850_v44, %v2849_v35  ;;  %v2539_v32 = vadd.f32 %v5264_v55, %v2500_v48  ;;  %v2501_v37 = vadd.f32 %v2469_v60, %v5302_v13  ;;  %2777 = vrot.lane.b32.xlu0 %v2733_v31, %s4151_s8  ;;  %v2910_v44 = vld [vmem:[#allocation4 + $0x28] sm:$0xff] }
 0x45a   : > { %3172 = vmatmul.mubr.bf16.vlgmr.msra.gmra.mrb[72].mxu1 %v2905_v47  ;;  %2679 = vst.msk [vmem:[#allocation4 + $0x80] sm:$0xff] %vm1513_vm0, %v2661_v8 }
 0x45b   : > { %3808 = vmatprep.mubr.msk.bf16.mxu1 %vm1513_vm0, %v2908_v27  ;;  %2895 = vst.msk [vmem:[#allocation4 + $0x88] sm:$0xff] %vm1513_vm0, %v2877_v6  ;;  %v2571_v1 = vmax.f32 %v2539_v32, 0.0  ;;  %v2540_v9 = vadd.f32 %v5264_v55, %v2501_v37 }
 0x45c   : > { %v2707_v0 = vld [vmem:[#allocation3 + $0xd9] sm:$0xff] }
 0x45d   : > { %2603 = vst.msk [vmem:[#allocation3 + $0xf1] sm:$0xff] %vm1513_vm0, %v2571_v1  ;;  %v2572_v52 = vmax.f32 %v2540_v9, 0.0  ;;  %v2635_v12 = vld [vmem:[#allocation3 + $0xd8] sm:$0xff] }
 0x45e   : > { %v2708_v40 = vld [vmem:[#allocation3 + $0xe1] sm:$0xff] }
 0x45f   : > { %v2636_v13 = vld [vmem:[#allocation3 + $0xe0] sm:$0xff]  ;;  %2604 = vst.msk [vmem:[#allocation3 + $0xf9] sm:$0xff] %vm1513_vm0, %v2572_v52  ;;  %v2734_v43 = vpack.c.bf16 %v2708_v40, %v2707_v0 }
 0x460   : > { %v2851_v16 = vld [vmem:[#allocation3 + $0xda] sm:$0xff]  ;;  %v2662_v45 = vpack.c.bf16 %v2636_v13, %v2635_v12  ;;  %v2852_v4 = vld [vmem:[#allocation3 + $0xe2] sm:$0xff] }
 0x461   : > { %v2878_v63 = vpack.c.bf16 %v2852_v4, %v2851_v16  ;;  %2779 = vrot.lane.b32.xlu1 %v2734_v43, %s4151_s8 }
 0x462   : > { %2680 = vst.msk [vmem:[#allocation4 + $0x90] sm:$0xff] %vm1513_vm0, %v2662_v45 }
 0x463   : > { %2896 = vst.msk [vmem:[#allocation4 + $0x98] sm:$0xff] %vm1513_vm0, %v2878_v63 }
 0x464   : > { %v2709_v33 = vld [vmem:[#allocation3 + $0xf1] sm:$0xff] }
 0x465   : > { %v2637_v29 = vld [vmem:[#allocation3 + $0xf0] sm:$0xff] }
 0x466   : > { %v2710_v51 = vld [vmem:[#allocation3 + $0xf9] sm:$0xff] }
 0x467   : > { %v2638_v22 = vld [vmem:[#allocation3 + $0xf8] sm:$0xff]  ;;  %v2735_v19 = vpack.c.bf16 %v2710_v51, %v2709_v33 }
 0x468   : > { %v2853_v18 = vld [vmem:[#allocation3 + $0xf2] sm:$0xff]  ;;  %v2663_v39 = vpack.c.bf16 %v2638_v22, %v2637_v29  ;;  %v2854_v41 = vld [vmem:[#allocation3 + $0xfa] sm:$0xff] }
 0x469   : > { %v2879_v59 = vpack.c.bf16 %v2854_v41, %v2853_v18  ;;  %2781 = vrot.lane.b32.xlu0 %v2735_v19, %s4151_s8 }
 0x46a   : > { %2681 = vst.msk [vmem:[#allocation4 + $0xa0] sm:$0xff] %vm1513_vm0, %v2663_v39  ;;  %v2914_v39 = vld [vmem:[#allocation4 + $0x48] sm:$0xff] }
 0x46b   : > { %2897 = vst.msk [vmem:[#allocation4 + $0xa8] sm:$0xff] %vm1513_vm0, %v2879_v59 }
 0x493   : > { %v2764_v42 = vpop.permute.xlu1 %2763 }
 0x494   : > { %2816 = vst.msk [vmem:[#allocation4 + $0x10] sm:$0xff] %vm1790_vm3, %v2764_v42 }
 0x495   : > { %v2395_v58 = vpop.permute.xlu0 %2394 }
 0x496   : > { %v2470_v11 = vadd.f32 %v2395_v58, %v5248_v17 }
 0x497   : > { %v2397_v49 = vpop.permute.xlu1 %2396 }
 0x498   : > { %v2502_v10 = vadd.f32 %v2470_v11, %v5317_v25  ;;  %v2471_v34 = vadd.f32 %v2397_v49, %v5254_v20 }
 0x49a   : > { %v2541_v46 = vadd.f32 %v5264_v55, %v2502_v10  ;;  %v2503_v35 = vadd.f32 %v2471_v34, %v5325_v30 }
 0x49b   : > { %v2766_v48 = vpop.permute.xlu0 %2765  ;;  %v2907_v60 = vld [vmem:[#allocation4 + $0x10] sm:$0xff] }
 0x49c   : > { %v2573_v31 = vmax.f32 %v2541_v46, 0.0  ;;  %v2542_v8 = vadd.f32 %v5264_v55, %v2503_v35  ;;  %2817 = vst.msk [vmem:[#allocation4 + $0x20] sm:$0xff] %vm1790_vm3, %v2766_v48  ;;  %3180 = vmatmul.mubr.bf16.gmra.mrb[76].mxu1 %v2907_v60 }
 0x49d   : > { %3809 = vmatprep.mubr.msk.bf16.mxu1 %vm1513_vm0, %v2910_v44  ;;  %v2399_v17 = vpop.permute.xlu1 %2398 }
 0x49e   : > { %2605 = vst.msk [vmem:[#allocation3 + $0x109] sm:$0xff] %vm1513_vm0, %v2573_v31  ;;  %v2574_v25 = vmax.f32 %v2542_v8, 0.0  ;;  %v2472_v20 = vadd.f32 %v2399_v17, %v5288_v7  ;;  %v2912_v7 = vld [vmem:[#allocation4 + $0x38] sm:$0xff] }
 0x49f   : > { %v2401_v47 = vpop.permute.xlu0 %2400 }
 0x4a0   : > { %2606 = vst.msk [vmem:[#allocation3 + $0x111] sm:$0xff] %vm1513_vm0, %v2574_v25  ;;  %v2504_v30 = vadd.f32 %v2472_v20, %v5340_v26  ;;  %v2473_v6 = vadd.f32 %v2401_v47, %v5296_v14 }
 0x4a2   : > { %v2543_v32 = vadd.f32 %v5264_v55, %v2504_v30  ;;  %v2505_v37 = vadd.f32 %v2473_v6, %v5348_v5 }
 0x4a3   : > { %v2768_v27 = vpop.permute.xlu1 %2767  ;;  %v2909_v1 = vld [vmem:[#allocation4 + $0x20] sm:$0xff] }
 0x4a4   : > { %v2575_v9 = vmax.f32 %v2543_v32, 0.0  ;;  %v2544_v52 = vadd.f32 %v5264_v55, %v2505_v37  ;;  %2818 = vst.msk [vmem:[#allocation4 + $0x30] sm:$0xff] %vm1790_vm3, %v2768_v27  ;;  %3188 = vmatmul.mubr.bf16.gmra.mrb[80].mxu1 %v2909_v1 }
 0x4a5   : > { %3810 = vmatprep.mubr.msk.bf16.mxu1 %vm1513_vm0, %v2912_v7  ;;  %v2403_v0 = vpop.permute.xlu0 %2402  ;;  %v2711_v12 = vld [vmem:[#allocation3 + $0x109] sm:$0xff] }
 0x4a6   : > { %2607 = vst.msk [vmem:[#allocation3 + $0x121] sm:$0xff] %vm1513_vm0, %v2575_v9  ;;  %v2576_v26 = vmax.f32 %v2544_v52, 0.0  ;;  %v2474_v14 = vadd.f32 %v2403_v0, %v5311_v28  ;;  %v2639_v33 = vld [vmem:[#allocation3 + $0x108] sm:$0xff] }
 0x4a7   : > { %v2405_v40 = vpop.permute.xlu1 %2404  ;;  %v2712_v5 = vld [vmem:[#allocation3 + $0x111] sm:$0xff] }
 0x4a8   : > { %v2855_v13 = vld [vmem:[#allocation3 + $0x10a] sm:$0xff]  ;;  %v2856_v16 = vld [vmem:[#allocation3 + $0x112] sm:$0xff]  ;;  %2608 = vst.msk [vmem:[#allocation3 + $0x129] sm:$0xff] %vm1513_vm0, %v2576_v26  ;;  %v2506_v43 = vadd.f32 %v2474_v14, %v5363_v3  ;;  %v2475_v45 = vadd.f32 %v2405_v40, %v5319_v21  ;;  %v2736_v4 = vpack.c.bf16 %v2712_v5, %v2711_v12 }
 0x4a9   : > { %v2880_v63 = vpack.c.bf16 %v2856_v16, %v2855_v13  ;;  %v2640_v29 = vld [vmem:[#allocation3 + $0x110] sm:$0xff] }
 0x4aa   : > { %v2664_v51 = vpack.c.bf16 %v2640_v29, %v2639_v33  ;;  %v2545_v22 = vadd.f32 %v5264_v55, %v2506_v43  ;;  %v2507_v28 = vadd.f32 %v2475_v45, %v5371_v23  ;;  %2783 = vrot.lane.b32.xlu1 %v2736_v4, %s4151_s8 }
 0x4ab   : > { %2898 = vst.msk [vmem:[#allocation4 + $0xb8] sm:$0xff] %vm1513_vm0, %v2880_v63  ;;  %v2770_v18 = vpop.permute.xlu0 %2769  ;;  %v2911_v19 = vld [vmem:[#allocation4 + $0x30] sm:$0xff] }
 0x4ac   : > { %2682 = vst.msk [vmem:[#allocation4 + $0xb0] sm:$0xff] %vm1513_vm0, %v2664_v51  ;;  %v2577_v3 = vmax.f32 %v2545_v22, 0.0  ;;  %v2546_v21 = vadd.f32 %v5264_v55, %v2507_v28  ;;  %3198 = vmatmul.mubr.bf16.gmra.mrb[84].mxu1 %v2911_v19 }
 0x4ad   : > { %2819 = vst.msk [vmem:[#allocation4 + $0x40] sm:$0xff] %vm1790_vm3, %v2770_v18  ;;  %3811 = vmatprep.mubr.msk.bf16.mxu1 %vm1513_vm0, %v2914_v39  ;;  %v2407_v41 = vpop.permute.xlu1 %2406  ;;  %v2713_v42 = vld [vmem:[#allocation3 + $0x121] sm:$0xff] }
 0x4ae   : > { %2609 = vst.msk [vmem:[#allocation3 + $0x139] sm:$0xff] %vm1513_vm0, %v2577_v3  ;;  %v2578_v23 = vmax.f32 %v2546_v21, 0.0  ;;  %v2476_v59 = vadd.f32 %v2407_v41, %v5334_v53  ;;  %v2641_v58 = vld [vmem:[#allocation3 + $0x120] sm:$0xff] }
 0x4af   : > { %v2409_v11 = vpop.permute.xlu0 %2408  ;;  %v2714_v49 = vld [vmem:[#allocation3 + $0x129] sm:$0xff] }
 0x4b0   : > { %v2642_v10 = vld [vmem:[#allocation3 + $0x128] sm:$0xff]  ;;  %2610 = vst.msk [vmem:[#allocation3 + $0x141] sm:$0xff] %vm1513_vm0, %v2578_v23  ;;  %v2508_v46 = vadd.f32 %v2476_v59, %v5386_v2  ;;  %v2477_v35 = vadd.f32 %v2409_v11, %v5342_v24  ;;  %v2737_v48 = vpack.c.bf16 %v2714_v49, %v2713_v42 }
 0x4b1   : > { %v2857_v34 = vld [vmem:[#allocation3 + $0x122] sm:$0xff]  ;;  %v2665_v60 = vpack.c.bf16 %v2642_v10, %v2641_v58  ;;  %v2858_v31 = vld [vmem:[#allocation3 + $0x12a] sm:$0xff]  ;;  %v2723_v58 = vld [vmem:[#allocation3 + $0x199] sm:$0xff] }
 0x4b2   : > { %v2881_v8 = vpack.c.bf16 %v2858_v31, %v2857_v34  ;;  %v2547_v44 = vadd.f32 %v5264_v55, %v2508_v46  ;;  %v2509_v53 = vadd.f32 %v2477_v35, %v5394_v36  ;;  %2785 = vrot.lane.b32.xlu0 %v2737_v48, %s4151_s8  ;;  %v2916_v24 = vld [vmem:[#allocation4 + $0x58] sm:$0xff] }
 0x4b3   : > { %2683 = vst.msk [vmem:[#allocation4 + $0xc0] sm:$0xff] %vm1513_vm0, %v2665_v60  ;;  %v2772_v17 = vpop.permute.xlu1 %2771  ;;  %v2724_v10 = vld [vmem:[#allocation3 + $0x1a1] sm:$0xff] }
 0x4b4   : > { %v2913_v25 = vld [vmem:[#allocation4 + $0x40] sm:$0xff]  ;;  %2899 = vst.msk [vmem:[#allocation4 + $0xc8] sm:$0xff] %vm1513_vm0, %v2881_v8  ;;  %v2579_v20 = vmax.f32 %v2547_v44, 0.0  ;;  %v2548_v2 = vadd.f32 %v5264_v55, %v2509_v53  ;;  %v2742_v8 = vpack.c.bf16 %v2724_v10, %v2723_v58 }
 0x4b5   : > { %2820 = vst.msk [vmem:[#allocation4 + $0x50] sm:$0xff] %vm1790_vm3, %v2772_v17  ;;  %3208 = vmatmul.mubr.bf16.gmra.mrb[88].mxu1 %v2913_v25  ;;  %v2411_v47 = vpop.permute.xlu0 %2410  ;;  %v2715_v6 = vld [vmem:[#allocation3 + $0x139] sm:$0xff] }
 0x4b6   : > { %3812 = vmatprep.mubr.msk.bf16.mxu1 %vm1513_vm0, %v2916_v24  ;;  %2611 = vst.msk [vmem:[#allocation3 + $0x151] sm:$0xff] %vm1513_vm0, %v2579_v20  ;;  %v2580_v36 = vmax.f32 %v2548_v2, 0.0  ;;  %v2478_v30 = vadd.f32 %v2411_v47, %v5357_v54  ;;  %v2643_v32 = vld [vmem:[#allocation3 + $0x138] sm:$0xff] }
 0x4b7   : > { %v2413_v37 = vpop.permute.xlu1 %2412  ;;  %v2716_v27 = vld [vmem:[#allocation3 + $0x141] sm:$0xff]  ;;  %v2922_v17 = vld [vmem:[#allocation4 + $0x88] sm:$0xff] }
 0x4b8   : > { %v2644_v1 = vld [vmem:[#allocation3 + $0x140] sm:$0xff]  ;;  %2612 = vst.msk [vmem:[#allocation3 + $0x159] sm:$0xff] %vm1513_vm0, %v2580_v36  ;;  %v2510_v52 = vadd.f32 %v2478_v30, %v5406_v57  ;;  %v2479_v7 = vadd.f32 %v2413_v37, %v5365_v61  ;;  %v2738_v0 = vpack.c.bf16 %v2716_v27, %v2715_v6  ;;  %v2918_v61 = vld [vmem:[#allocation4 + $0x68] sm:$0xff] }
 0x4b9   : > { %v2859_v9 = vld [vmem:[#allocation3 + $0x13a] sm:$0xff]  ;;  %v2666_v26 = vpack.c.bf16 %v2644_v1, %v2643_v32  ;;  %v2860_v14 = vld [vmem:[#allocation3 + $0x142] sm:$0xff] }
 0x4ba   : > { %v2882_v12 = vpack.c.bf16 %v2860_v14, %v2859_v9  ;;  %v2549_v40 = vadd.f32 %v5264_v55, %v2510_v52  ;;  %v2511_v54 = vadd.f32 %v2479_v7, %v5411_v50  ;;  %2787 = vrot.lane.b32.xlu1 %v2738_v0, %s4151_s8  ;;  %v2924_v1 = vld [vmem:[#allocation4 + $0x98] sm:$0xff]  ;;  %v2926_v7 = vld [vmem:[#allocation4 + $0xa8] sm:$0xff] }
 0x4bb   : > { %2684 = vst.msk [vmem:[#allocation4 + $0xd0] sm:$0xff] %vm1513_vm0, %v2666_v26  ;;  %v2774_v5 = vpop.permute.xlu0 %2773  ;;  %v2928_v26 = vld [vmem:[#allocation4 + $0xb8] sm:$0xff] }
 0x4bc   : > { %v2915_v13 = vld [vmem:[#allocation4 + $0x50] sm:$0xff]  ;;  %2900 = vst.msk [vmem:[#allocation4 + $0xd8] sm:$0xff] %vm1513_vm0, %v2882_v12  ;;  %v2581_v16 = vmax.f32 %v2549_v40, 0.0  ;;  %v2550_v57 = vadd.f32 %v5264_v55, %v2511_v54  ;;  %v2930_v54 = vld [vmem:[#allocation4 + $0xc8] sm:$0xff] }
 0x4bd   : > { %2821 = vst.msk [vmem:[#allocation4 + $0x60] sm:$0xff] %vm1790_vm3, %v2774_v5  ;;  %3218 = vmatmul.mubr.bf16.gmra.mrb[92].mxu1 %v2915_v13  ;;  %v2415_v43 = vpop.permute.xlu1 %2414  ;;  %v2717_v4 = vld [vmem:[#allocation3 + $0x151] sm:$0xff] }
 0x4be   : > { %3813 = vmatprep.mubr.msk.bf16.mxu1 %vm1513_vm0, %v2918_v61  ;;  %2613 = vst.msk [vmem:[#allocation3 + $0x169] sm:$0xff] %vm1513_vm0, %v2581_v16  ;;  %v2582_v50 = vmax.f32 %v2550_v57, 0.0  ;;  %v2480_v45 = vadd.f32 %v2415_v43, %v5380_v15  ;;  %v2645_v63 = vld [vmem:[#allocation3 + $0x150] sm:$0xff] }
 0x4bf   : > { %v2417_v33 = vpop.permute.xlu0 %2416  ;;  %v2718_v29 = vld [vmem:[#allocation3 + $0x159] sm:$0xff] }
 0x4c0   : > { %v2646_v51 = vld [vmem:[#allocation3 + $0x158] sm:$0xff]  ;;  %2614 = vst.msk [vmem:[#allocation3 + $0x171] sm:$0xff] %vm1513_vm0, %v2582_v50  ;;  %v2512_v28 = vadd.f32 %v2480_v45, %v5423_v38  ;;  %v2481_v18 = vadd.f32 %v2417_v33, %v5388_v56  ;;  %v2739_v19 = vpack.c.bf16 %v2718_v29, %v2717_v4  ;;  %v2920_v56 = vld [vmem:[#allocation4 + $0x78] sm:$0xff]  ;;  %v2652_v4 = vld [vmem:[#allocation3 + $0x1a0] sm:$0xff] }
 0x4c1   : > { %v2861_v22 = vld [vmem:[#allocation3 + $0x152] sm:$0xff]  ;;  %v2667_v3 = vpack.c.bf16 %v2646_v51, %v2645_v63  ;;  %v2862_v21 = vld [vmem:[#allocation3 + $0x15a] sm:$0xff] }
 0x4c2   : > { %v2883_v39 = vpack.c.bf16 %v2862_v21, %v2861_v22  ;;  %v2551_v41 = vadd.f32 %v5264_v55, %v2512_v28  ;;  %v2513_v15 = vadd.f32 %v2481_v18, %v5427_v62  ;;  %2789 = vrot.lane.b32.xlu0 %v2739_v19, %s4151_s8  ;;  %v2651_v45 = vld [vmem:[#allocation3 + $0x198] sm:$0xff] }
 0x4c3   : > { %2685 = vst.msk [vmem:[#allocation4 + $0xe0] sm:$0xff] %vm1513_vm0, %v2667_v3  ;;  %v2776_v23 = vpop.permute.xlu1 %2775  ;;  %v2932_v57 = vld [vmem:[#allocation4 + $0xd8] sm:$0xff]  ;;  %v2670_v63 = vpack.c.bf16 %v2652_v4, %v2651_v45 }
 0x4c4   : > { %v2917_v59 = vld [vmem:[#allocation4 + $0x60] sm:$0xff]  ;;  %2901 = vst.msk [vmem:[#allocation4 + $0xe8] sm:$0xff] %vm1513_vm0, %v2883_v39  ;;  %v2583_v42 = vmax.f32 %v2551_v41, 0.0  ;;  %v2552_v38 = vadd.f32 %v5264_v55, %v2513_v15  ;;  %v2940_v41 = vld [vmem:[#allocation4 + $0x118] sm:$0xff] }
 0x4c5   : > { %2822 = vst.msk [vmem:[#allocation4 + $0x70] sm:$0xff] %vm1790_vm3, %v2776_v23  ;;  %3228 = vmatmul.mubr.bf16.gmra.mrb[96].mxu1 %v2917_v59  ;;  %v2719_v11 = vld [vmem:[#allocation3 + $0x169] sm:$0xff] }
 0x4c6   : > { %3814 = vmatprep.mubr.msk.bf16.mxu1 %vm1513_vm0, %v2920_v56  ;;  %2615 = vst.msk [vmem:[#allocation3 + $0x181] sm:$0xff] %vm1513_vm0, %v2583_v42  ;;  %v2584_v62 = vmax.f32 %v2552_v38, 0.0  ;;  %v2647_v49 = vld [vmem:[#allocation3 + $0x168] sm:$0xff]  ;;  %2688 = vst.msk [vmem:[#allocation4 + $0x110] sm:$0xff] %vm1513_vm0, %v2670_v63 }
 0x4c7   : > { %v2720_v34 = vld [vmem:[#allocation3 + $0x171] sm:$0xff] }
 0x4c8   : > { %v2648_v46 = vld [vmem:[#allocation3 + $0x170] sm:$0xff]  ;;  %2616 = vst.msk [vmem:[#allocation3 + $0x189] sm:$0xff] %vm1513_vm0, %v2584_v62  ;;  %v2740_v48 = vpack.c.bf16 %v2720_v34, %v2719_v11 }
 0x4c9   : > { %v2863_v35 = vld [vmem:[#allocation3 + $0x16a] sm:$0xff]  ;;  %v2668_v55 = vpack.c.bf16 %v2648_v46, %v2647_v49  ;;  %v2864_v60 = vld [vmem:[#allocation3 + $0x172] sm:$0xff] }
 0x4ca   : > { %v2884_v31 = vpack.c.bf16 %v2864_v60, %v2863_v35  ;;  %2791 = vrot.lane.b32.xlu1 %v2740_v48, %s4151_s8 }
 0x4cb   : > { %2686 = vst.msk [vmem:[#allocation4 + $0xf0] sm:$0xff] %vm1513_vm0, %v2668_v55  ;;  %v2778_v44 = vpop.permute.xlu0 %2777  ;;  %v2934_v51 = vld [vmem:[#allocation4 + $0xe8] sm:$0xff] }
 0x4cc   : > { %v2919_v53 = vld [vmem:[#allocation4 + $0x70] sm:$0xff]  ;;  %2902 = vst.msk [vmem:[#allocation4 + $0xf8] sm:$0xff] %vm1513_vm0, %v2884_v31 }
 0x4cd   : > { %2823 = vst.msk [vmem:[#allocation4 + $0x80] sm:$0xff] %vm1790_vm3, %v2778_v44  ;;  %3238 = vmatmul.mubr.bf16.gmra.mrb[100].mxu1 %v2919_v53  ;;  %v2721_v25 = vld [vmem:[#allocation3 + $0x181] sm:$0xff] }
 0x4ce   : > { %3815 = vmatprep.mubr.msk.bf16.mxu1 %vm1513_vm0, %v2922_v17  ;;  %2795 = vrot.lane.b32.xlu1 %v2742_v8, %s4151_s8  ;;  %v2649_v20 = vld [vmem:[#allocation3 + $0x180] sm:$0xff] }
 0x4cf   : > { %v2722_v2 = vld [vmem:[#allocation3 + $0x189] sm:$0xff] }
 0x4d0   : > { %v2650_v24 = vld [vmem:[#allocation3 + $0x188] sm:$0xff]  ;;  %v2741_v36 = vpack.c.bf16 %v2722_v2, %v2721_v25 }
 0x4d1   : > { %v2865_v47 = vld [vmem:[#allocation3 + $0x182] sm:$0xff]  ;;  %v2669_v30 = vpack.c.bf16 %v2650_v24, %v2649_v20  ;;  %v2866_v6 = vld [vmem:[#allocation3 + $0x18a] sm:$0xff] }
 0x4d2   : > { %v2885_v32 = vpack.c.bf16 %v2866_v6, %v2865_v47  ;;  %2793 = vrot.lane.b32.xlu0 %v2741_v36, %s4151_s8 }
 0x4d3   : > { %2687 = vst.msk [vmem:[#allocation4 + $0x100] sm:$0xff] %vm1513_vm0, %v2669_v30  ;;  %v2780_v37 = vpop.permute.xlu1 %2779  ;;  %v2936_v18 = vld [vmem:[#allocation4 + $0xf8] sm:$0xff] }
 0x4d4   : > { %v2921_v27 = vld [vmem:[#allocation4 + $0x80] sm:$0xff]  ;;  %2903 = vst.msk [vmem:[#allocation4 + $0x108] sm:$0xff] %vm1513_vm0, %v2885_v32 }
 0x4d5   : > { %2824 = vst.msk [vmem:[#allocation4 + $0x90] sm:$0xff] %vm1790_vm3, %v2780_v37  ;;  %3248 = vmatmul.mubr.bf16.gmra.mrb[104].mxu1 %v2921_v27 }
 0x4d6   : > { %3816 = vmatprep.mubr.msk.bf16.mxu1 %vm1513_vm0, %v2924_v1 }
 0x4db   : > { %v2782_v9 = vpop.permute.xlu0 %2781  ;;  %v2938_v39 = vld [vmem:[#allocation4 + $0x108] sm:$0xff] }
 0x4dc   : > { %v2923_v52 = vld [vmem:[#allocation4 + $0x90] sm:$0xff]  ;;  %2825 = vst.msk [vmem:[#allocation4 + $0xa0] sm:$0xff] %vm1790_vm3, %v2782_v9 }
 0x4dd   : > { %3258 = vmatmul.mubr.bf16.gmra.mrb[108].mxu1 %v2923_v52 }
 0x4de   : > { %3817 = vmatprep.mubr.msk.bf16.mxu1 %vm1513_vm0, %v2926_v7 }
 0x4e3   : > { %v2925_v0 = vld [vmem:[#allocation4 + $0xa0] sm:$0xff] }
 0x4e5   : > { %3268 = vmatmul.mubr.bf16.gmra.mrb[112].mxu1 %v2925_v0 }
 0x4e6   : > { %3818 = vmatprep.mubr.msk.bf16.mxu1 %vm1513_vm0, %v2928_v26 }
 0x51c   : > { %v2784_v14 = vpop.permute.xlu1 %2783 }
 0x51d   : > { %2826 = vst.msk [vmem:[#allocation4 + $0xb0] sm:$0xff] %vm1790_vm3, %v2784_v14 }
 0x524   : > { %v2786_v12 = vpop.permute.xlu0 %2785  ;;  %v2927_v40 = vld [vmem:[#allocation4 + $0xb0] sm:$0xff] }
 0x525   : > { %2827 = vst.msk [vmem:[#allocation4 + $0xc0] sm:$0xff] %vm1790_vm3, %v2786_v12  ;;  %3278 = vmatmul.mubr.bf16.gmra.mrb[116].mxu1 %v2927_v40 }
 0x526   : > { %3819 = vmatprep.mubr.msk.bf16.mxu1 %vm1513_vm0, %v2930_v54 }
 0x52c   : > { %v2788_v5 = vpop.permute.xlu1 %2787  ;;  %v2929_v13 = vld [vmem:[#allocation4 + $0xc0] sm:$0xff] }
 0x52d   : > { %v5537_v16 = vpop.f32.mrb[72].mxu1  ;;  %2828 = vst.msk [vmem:[#allocation4 + $0xd0] sm:$0xff] %vm1790_vm3, %v2788_v5  ;;  %3288 = vmatmul.mubr.bf16.gmra.mrb[120].mxu1 %v2929_v13  ;;  %v5671_v13 = vld [vmem:[%s5960_s6] ss:$0 sm:$0xff] }
 0x52e   : > { %v3175_v61 = vpop.f32.mrb[73].mxu1  ;;  %3820 = vmatprep.mubr.msk.bf16.mxu1 %vm1513_vm0, %v2932_v57 }
 0x52f   : > { %v5541_v43 = vpop.f32.mrb[74].mxu1 }
 0x530   : > { %v3178_v50 = vpop.f32.mrb[75].mxu1 }
 0x534   : > { %v2790_v33 = vpop.permute.xlu0 %2789  ;;  %v2931_v29 = vld [vmem:[#allocation4 + $0xd0] sm:$0xff] }
 0x535   : > { %2829 = vst.msk [vmem:[#allocation4 + $0xe0] sm:$0xff] %vm1790_vm3, %v2790_v33  ;;  %3298 = vmatmul.mubr.bf16.gmra.mrb[124].mxu1 %v2931_v29 }
 0x536   : > { %3821 = vmatprep.mubr.msk.bf16.mxu1 %vm1513_vm0, %v2934_v51 }
 0x53c   : > { %v2792_v22 = vpop.permute.xlu1 %2791  ;;  %v2933_v28 = vld [vmem:[#allocation4 + $0xe0] sm:$0xff] }
 0x53d   : > { %2830 = vst.msk [vmem:[#allocation4 + $0xf0] sm:$0xff] %vm1790_vm3, %v2792_v22  ;;  %3308 = vmatmul.mubr.bf16.gmra.mrb[128].mxu1 %v2933_v28 }
 0x53e   : > { %3822 = vmatprep.mubr.msk.bf16.mxu1 %vm1513_vm0, %v2936_v18 }
 0x540   : > { %v2796_v19 = vpop.permute.xlu1 %2795 }
 0x541   : > { %2832 = vst.msk [vmem:[#allocation4 + $0x110] sm:$0xff] %vm1790_vm3, %v2796_v19 }
 0x544   : > { %v2794_v3 = vpop.permute.xlu0 %2793  ;;  %v2935_v21 = vld [vmem:[#allocation4 + $0xf0] sm:$0xff] }
 0x545   : > { %2831 = vst.msk [vmem:[#allocation4 + $0x100] sm:$0xff] %vm1790_vm3, %v2794_v3  ;;  %3318 = vmatmul.mubr.bf16.gmra.mrb[132].mxu1 %v2935_v21 }
 0x546   : > { %3823 = vmatprep.mubr.msk.bf16.mxu1 %vm1513_vm0, %v2938_v39 }
 0x548   : > { %v2939_v23 = vld [vmem:[#allocation4 + $0x110] sm:$0xff] }
 0x54c   : > { %v2937_v15 = vld [vmem:[#allocation4 + $0x100] sm:$0xff] }
 0x54d   : > { %3328 = vmatmul.mubr.bf16.gmra.mrb[136].mxu1 %v2937_v15 }
 0x54e   : > { %3824 = vmatprep.mubr.msk.bf16.mxu1 %vm1513_vm0, %v2940_v41 }
 0x555   : > { %3338 = vmatmul.mubr.bf16.gmra.mrb[140].mxu1 %v2939_v23 }
 0x56f   : > { %v5552_v59 = vpop.f32.mrb[76].mxu1 }
 0x570   : > { %v3183_v42 = vpop.f32.mrb[77].mxu1  ;;  %3378 = vrot.lane.b32.xlu0 %v5552_v59, %s4151_s8 }
 0x571   : > { %v5556_v38 = vpop.f32.mrb[78].mxu1 }
 0x572   : > { %3380 = vrot.lane.b32.xlu1 %v5556_v38, %s4151_s8  ;;  %v3186_v56 = vpop.f32.mrb[79].mxu1 }
 0x577   : > { %v5560_v58 = vpop.f32.mrb[80].mxu1 }
 0x578   : > { %v3191_v62 = vpop.f32.mrb[81].mxu1  ;;  %3382 = vrot.lane.b32.xlu0 %v5560_v58, %s4151_s8 }
 0x579   : > { %v5564_v11 = vpop.f32.mrb[82].mxu1 }
 0x57a   : > { %3384 = vrot.lane.b32.xlu1 %v5564_v11, %s4151_s8  ;;  %v3195_v49 = vpop.f32.mrb[83].mxu1 }
 0x57f   : > { %v5568_v10 = vpop.f32.mrb[84].mxu1 }
 0x580   : > { %v5570_v34 = vpop.f32.mrb[85].mxu1  ;;  %3386 = vrot.lane.b32.xlu0 %v5568_v10, %s4151_s8 }
 0x581   : > { %v5574_v46 = vpop.f32.mrb[86].mxu1 }
 0x582   : > { %3388 = vrot.lane.b32.xlu1 %v5574_v46, %s4151_s8  ;;  %v5578_v35 = vpop.f32.mrb[87].mxu1 }
 0x588   : > { %v5580_v48 = vpop.f32.mrb[88].mxu1 }
 0x589   : > { %v5582_v55 = vpop.f32.mrb[89].mxu1  ;;  %3390 = vrot.lane.b32.xlu0 %v5580_v48, %s4151_s8 }
 0x58a   : > { %v5586_v60 = vpop.f32.mrb[90].mxu1 }
 0x58b   : > { %3392 = vrot.lane.b32.xlu1 %v5586_v60, %s4151_s8  ;;  %v5590_v31 = vpop.f32.mrb[91].mxu1 }
 0x590   : > { %v5592_v8 = vpop.f32.mrb[92].mxu1 }
 0x591   : > { %v5594_v44 = vpop.f32.mrb[93].mxu1  ;;  %3394 = vrot.lane.b32.xlu0 %v5592_v8, %s4151_s8 }
 0x592   : > { %v5598_v53 = vpop.f32.mrb[94].mxu1 }
 0x593   : > { %3396 = vrot.lane.b32.xlu1 %v5598_v53, %s4151_s8  ;;  %v5602_v17 = vpop.f32.mrb[95].mxu1 }
 0x598   : > { %v5604_v25 = vpop.f32.mrb[96].mxu1 }
 0x599   : > { %v5606_v20 = vpop.f32.mrb[97].mxu1  ;;  %3398 = vrot.lane.b32.xlu0 %v5604_v25, %s4151_s8 }
 0x59a   : > { %v5610_v2 = vpop.f32.mrb[98].mxu1 }
 0x59b   : > { %3400 = vrot.lane.b32.xlu1 %v5610_v2, %s4151_s8  ;;  %v5614_v24 = vpop.f32.mrb[99].mxu1 }
 0x5a0   : > { %v5616_v47 = vpop.f32.mrb[100].mxu1 }
 0x5a1   : > { %v5618_v36 = vpop.f32.mrb[101].mxu1  ;;  %3402 = vrot.lane.b32.xlu0 %v5616_v47, %s4151_s8 }
 0x5a2   : > { %v5622_v30 = vpop.f32.mrb[102].mxu1 }
 0x5a3   : > { %3404 = vrot.lane.b32.xlu1 %v5622_v30, %s4151_s8  ;;  %v5626_v6 = vpop.f32.mrb[103].mxu1 }
 0x5a8   : > { %v5628_v32 = vpop.f32.mrb[104].mxu1 }
 0x5a9   : > { %v5630_v37 = vpop.f32.mrb[105].mxu1  ;;  %3406 = vrot.lane.b32.xlu0 %v5628_v32, %s4151_s8 }
 0x5aa   : > { %v5634_v27 = vpop.f32.mrb[106].mxu1 }
 0x5ab   : > { %3408 = vrot.lane.b32.xlu1 %v5634_v27, %s4151_s8  ;;  %v5638_v1 = vpop.f32.mrb[107].mxu1 }
 0x5b0   : > { %v5640_v9 = vpop.f32.mrb[108].mxu1 }
 0x5b1   : > { %v5642_v52 = vpop.f32.mrb[109].mxu1  ;;  %3410 = vrot.lane.b32.xlu0 %v5640_v9, %s4151_s8 }
 0x5b2   : > { %v5646_v7 = vpop.f32.mrb[110].mxu1 }
 0x5b3   : > { %3412 = vrot.lane.b32.xlu1 %v5646_v7, %s4151_s8  ;;  %v5650_v0 = vpop.f32.mrb[111].mxu1 }
 0x5b8   : > { %v5652_v26 = vpop.f32.mrb[112].mxu1 }
 0x5b9   : > { %v5654_v14 = vpop.f32.mrb[113].mxu1  ;;  %3414 = vrot.lane.b32.xlu0 %v5652_v26, %s4151_s8 }
 0x5ba   : > { %v5658_v12 = vpop.f32.mrb[114].mxu1 }
 0x5bb   : > { %3416 = vrot.lane.b32.xlu1 %v5658_v12, %s4151_s8  ;;  %v5662_v40 = vpop.f32.mrb[115].mxu1 }
 0x5e2   : > { %v3379_v54 = vpop.permute.xlu0 %3378 }
 0x5e3   : > { %v3474_v5 = vadd.f32 %v3379_v54, %v5537_v16 }
 0x5e4   : > { %v3381_v57 = vpop.permute.xlu1 %3380 }
 0x5e5   : > { %v3506_v61 = vadd.f32 %v3474_v5, %v3191_v62  ;;  %v3475_v50 = vadd.f32 %v3381_v57, %v5541_v43 }
 0x5e7   : > { %v3545_v45 = vadd.f32 %v5671_v13, %v3506_v61  ;;  %v3507_v4 = vadd.f32 %v3475_v50, %v3195_v49 }
 0x5e9   : > { %3577 = vst.msk [vmem:[%s5675_s21] sm:$0xff] %vm1513_vm0, %v3545_v45  ;;  %v3546_v16 = vadd.f32 %v5671_v13, %v3507_v4 }
 0x5ea   : > { %v3383_v63 = vpop.permute.xlu0 %3382 }
 0x5eb   : > { %3578 = vst.msk [vmem:[%s5675_s21 + $0x8] sm:$0xff] %vm1513_vm0, %v3546_v16  ;;  %v3476_v33 = vadd.f32 %v3383_v63, %v5552_v59 }
 0x5ec   : > { %v3385_v29 = vpop.permute.xlu1 %3384 }
 0x5ed   : > { %v3508_v43 = vadd.f32 %v3476_v33, %v5570_v34  ;;  %v3477_v51 = vadd.f32 %v3385_v29, %v5556_v38 }
 0x5ef   : > { %v3547_v22 = vadd.f32 %v5671_v13, %v3508_v43  ;;  %v3509_v28 = vadd.f32 %v3477_v51, %v5578_v35 }
 0x5f1   : > { %3579 = vst.msk [vmem:[%s5675_s21 + $0x10] sm:$0xff] %vm1513_vm0, %v3547_v22  ;;  %v3548_v18 = vadd.f32 %v5671_v13, %v3509_v28 }
 0x5f2   : > { %v3387_v19 = vpop.permute.xlu0 %3386 }
 0x5f3   : > { %3580 = vst.msk [vmem:[%s5675_s21 + $0x18] sm:$0xff] %vm1513_vm0, %v3548_v18  ;;  %v3478_v3 = vadd.f32 %v3387_v19, %v5560_v58 }
 0x5f4   : > { %v3389_v21 = vpop.permute.xlu1 %3388 }
 0x5f5   : > { %v3510_v39 = vadd.f32 %v3478_v3, %v5582_v55  ;;  %v3479_v41 = vadd.f32 %v3389_v21, %v5564_v11 }
 0x5f7   : > { %v3549_v15 = vadd.f32 %v5671_v13, %v3510_v39  ;;  %v3511_v23 = vadd.f32 %v3479_v41, %v5590_v31 }
 0x5f8   : > { %v5697_v59 = vpop.f32.mrb[116].mxu1 }
 0x5f9   : > { %3581 = vst.msk [vmem:[%s5675_s21 + $0x20] sm:$0xff] %vm1513_vm0, %v3549_v15  ;;  %v3550_v42 = vadd.f32 %v5671_v13, %v3511_v23  ;;  %v5702_v38 = vpop.f32.mrb[117].mxu1  ;;  %3418 = vrot.lane.b32.xlu0 %v5697_v59, %s4151_s8 }
 0x5fa   : > { %v5706_v56 = vpop.f32.mrb[118].mxu1 }
 0x5fb   : > { %v3391_v58 = vpop.permute.xlu0 %3390  ;;  %3582 = vst.msk [vmem:[%s5675_s21 + $0x28] sm:$0xff] %vm1513_vm0, %v3550_v42  ;;  %3420 = vrot.lane.b32.xlu1 %v5706_v56, %s4151_s8  ;;  %v5713_v11 = vpop.f32.mrb[119].mxu1 }
 0x5fc   : > { %v3480_v62 = vadd.f32 %v3391_v58, %v5568_v10 }
 0x5fd   : > { %v3393_v49 = vpop.permute.xlu1 %3392 }
 0x5fe   : > { %v3512_v34 = vadd.f32 %v3480_v62, %v5594_v44  ;;  %v3481_v35 = vadd.f32 %v3393_v49, %v5574_v46 }
 0x600   : > { %v3551_v55 = vadd.f32 %v5671_v13, %v3512_v34  ;;  %v3513_v31 = vadd.f32 %v3481_v35, %v5602_v17  ;;  %v5719_v54 = vpop.f32.mrb[120].mxu1 }
 0x601   : > { %v5724_v5 = vpop.f32.mrb[121].mxu1  ;;  %3422 = vrot.lane.b32.xlu0 %v5719_v54, %s4151_s8 }
 0x602   : > { %3583 = vst.msk [vmem:[%s5675_s21 + $0x30] sm:$0xff] %vm1513_vm0, %v3551_v55  ;;  %v3552_v10 = vadd.f32 %v5671_v13, %v3513_v31  ;;  %v5728_v57 = vpop.f32.mrb[122].mxu1 }
 0x603   : > { %v3395_v44 = vpop.permute.xlu0 %3394  ;;  %3424 = vrot.lane.b32.xlu1 %v5728_v57, %s4151_s8  ;;  %v5735_v17 = vpop.f32.mrb[123].mxu1 }
 0x604   : > { %3584 = vst.msk [vmem:[%s5675_s21 + $0x38] sm:$0xff] %vm1513_vm0, %v3552_v10  ;;  %v3482_v46 = vadd.f32 %v3395_v44, %v5580_v48 }
 0x605   : > { %v3397_v61 = vpop.permute.xlu1 %3396 }
 0x606   : > { %v3514_v50 = vadd.f32 %v3482_v46, %v5606_v20  ;;  %v3483_v45 = vadd.f32 %v3397_v61, %v5586_v60 }
 0x608   : > { %v3553_v4 = vadd.f32 %v5671_v13, %v3514_v50  ;;  %v3515_v16 = vadd.f32 %v3483_v45, %v5614_v24  ;;  %v5741_v63 = vpop.f32.mrb[124].mxu1 }
 0x609   : > { %v5746_v33 = vpop.f32.mrb[125].mxu1  ;;  %3426 = vrot.lane.b32.xlu0 %v5741_v63, %s4151_s8 }
 0x60a   : > { %3585 = vst.msk [vmem:[%s5675_s21 + $0x40] sm:$0xff] %vm1513_vm0, %v3553_v4  ;;  %v3554_v48 = vadd.f32 %v5671_v13, %v3515_v16  ;;  %v5750_v29 = vpop.f32.mrb[126].mxu1 }
 0x60b   : > { %v3399_v20 = vpop.permute.xlu0 %3398  ;;  %3428 = vrot.lane.b32.xlu1 %v5750_v29, %s4151_s8  ;;  %v5757_v24 = vpop.f32.mrb[127].mxu1 }
 0x60c   : > { %3586 = vst.msk [vmem:[%s5675_s21 + $0x48] sm:$0xff] %vm1513_vm0, %v3554_v48  ;;  %v3484_v60 = vadd.f32 %v3399_v20, %v5592_v8 }
 0x60d   : > { %v3401_v43 = vpop.permute.xlu1 %3400 }
 0x60e   : > { %v3516_v51 = vadd.f32 %v3484_v60, %v5618_v36  ;;  %v3485_v22 = vadd.f32 %v3401_v43, %v5598_v53 }
 0x610   : > { %v3555_v28 = vadd.f32 %v5671_v13, %v3516_v51  ;;  %v3517_v18 = vadd.f32 %v3485_v22, %v5626_v6  ;;  %v5763_v19 = vpop.f32.mrb[128].mxu1 }
 0x611   : > { %v5768_v3 = vpop.f32.mrb[129].mxu1  ;;  %3430 = vrot.lane.b32.xlu0 %v5763_v19, %s4151_s8 }
 0x612   : > { %3587 = vst.msk [vmem:[%s5675_s21 + $0x50] sm:$0xff] %vm1513_vm0, %v3555_v28  ;;  %v3556_v8 = vadd.f32 %v5671_v13, %v3517_v18  ;;  %v5772_v21 = vpop.f32.mrb[130].mxu1 }
 0x613   : > { %v3403_v36 = vpop.permute.xlu0 %3402  ;;  %3432 = vrot.lane.b32.xlu1 %v5772_v21, %s4151_s8  ;;  %v5779_v6 = vpop.f32.mrb[131].mxu1 }
 0x614   : > { %3588 = vst.msk [vmem:[%s5675_s21 + $0x58] sm:$0xff] %vm1513_vm0, %v3556_v8  ;;  %v3486_v53 = vadd.f32 %v3403_v36, %v5604_v25 }
 0x615   : > { %v3405_v39 = vpop.permute.xlu1 %3404 }
 0x616   : > { %v3518_v41 = vadd.f32 %v3486_v53, %v5630_v37  ;;  %v3487_v15 = vadd.f32 %v3405_v39, %v5610_v2 }
 0x618   : > { %v3557_v23 = vadd.f32 %v5671_v13, %v3518_v41  ;;  %v3519_v42 = vadd.f32 %v3487_v15, %v5638_v1  ;;  %v5785_v58 = vpop.f32.mrb[132].mxu1 }
 0x619   : > { %v5790_v62 = vpop.f32.mrb[133].mxu1  ;;  %3434 = vrot.lane.b32.xlu0 %v5785_v58, %s4151_s8 }
 0x61a   : > { %3589 = vst.msk [vmem:[%s5675_s21 + $0x60] sm:$0xff] %vm1513_vm0, %v3557_v23  ;;  %v3558_v25 = vadd.f32 %v5671_v13, %v3519_v42  ;;  %v5794_v49 = vpop.f32.mrb[134].mxu1 }
 0x61b   : > { %v3407_v37 = vpop.permute.xlu0 %3406  ;;  %3436 = vrot.lane.b32.xlu1 %v5794_v49, %s4151_s8  ;;  %v5801_v1 = vpop.f32.mrb[135].mxu1 }
 0x61c   : > { %3590 = vst.msk [vmem:[%s5675_s21 + $0x68] sm:$0xff] %vm1513_vm0, %v3558_v25  ;;  %v3488_v2 = vadd.f32 %v3407_v37, %v5616_v47 }
 0x61d   : > { %v3409_v34 = vpop.permute.xlu1 %3408 }
 0x61e   : > { %v3520_v35 = vadd.f32 %v3488_v2, %v5642_v52  ;;  %v3489_v55 = vadd.f32 %v3409_v34, %v5622_v30 }
 0x620   : > { %v3559_v31 = vadd.f32 %v5671_v13, %v3520_v35  ;;  %v3521_v10 = vadd.f32 %v3489_v55, %v5650_v0  ;;  %v3329_v44 = vpop.f32.mrb[136].mxu1 }
 0x621   : > { %3438 = vrot.lane.b32.xlu0 %v3329_v44, %s4151_s8  ;;  %v5811_v46 = vpop.f32.mrb[137].mxu1 }
 0x622   : > { %3591 = vst.msk [vmem:[%s5675_s21 + $0x70] sm:$0xff] %vm1513_vm0, %v3559_v31  ;;  %v3560_v47 = vadd.f32 %v5671_v13, %v3521_v10  ;;  %v3333_v50 = vpop.f32.mrb[138].mxu1 }
 0x623   : > { %v3411_v61 = vpop.permute.xlu0 %3410  ;;  %3440 = vrot.lane.b32.xlu1 %v3333_v50, %s4151_s8  ;;  %v5817_v52 = vpop.f32.mrb[139].mxu1  ;;  %s3831_s8 = sshll.u32 %s4216_s28, 12  ;;  %s5913_s28 = scalar_lea.sflag [#allocation6], %s269_s17 }
 0x624   : > { %3592 = vst.msk [vmem:[%s5675_s21 + $0x78] sm:$0xff] %vm1513_vm0, %v3560_v47  ;;  %v3490_v30 = vadd.f32 %v3411_v61, %v5628_v32  ;;  %s5902_s9 = scalar_lea.hbm %s5961_s7, %s3831_s8 }
 0x625   : > { %v3413_v0 = vpop.permute.xlu1 %3412 }
 0x626   : > { %v3522_v45 = vadd.f32 %v3490_v30, %v5654_v14  ;;  %v3491_v4 = vadd.f32 %v3413_v0, %v5634_v27 }
 0x628   : > { %v3561_v16 = vadd.f32 %v5671_v13, %v3522_v45  ;;  %v3523_v48 = vadd.f32 %v3491_v4, %v5662_v40  ;;  %v3339_v20 = vpop.f32.mrb[140].mxu1 }
 0x629   : > { %v5826_v60 = vpop.f32.mrb[141].mxu1 }
 0x62a   : > { %3593 = vst.msk [vmem:[%s5675_s21 + $0x80] sm:$0xff] %vm1513_vm0, %v3561_v16  ;;  %v3562_v32 = vadd.f32 %v5671_v13, %v3523_v48  ;;  %v3342_v51 = vpop.f32.mrb[142].mxu1 }
 0x62b   : > { %v3415_v43 = vpop.permute.xlu0 %3414  ;;  %v5831_v27 = vpop.f32.mrb[143].mxu1 }
 0x62c   : > { %3594 = vst.msk [vmem:[%s5675_s21 + $0x88] sm:$0xff] %vm1513_vm0, %v3562_v32  ;;  %v3492_v14 = vadd.f32 %v3415_v43, %v5640_v9 }
 0x62d   : > { %v3417_v22 = vpop.permute.xlu1 %3416 }
 0x62e   : > { %v3524_v40 = vadd.f32 %v3492_v14, %v5702_v38  ;;  %v3493_v28 = vadd.f32 %v3417_v22, %v5646_v7 }
 0x630   : > { %v3563_v18 = vadd.f32 %v5671_v13, %v3524_v40  ;;  %v3525_v8 = vadd.f32 %v3493_v28, %v5713_v11 }
 0x632   : > { %3595 = vst.msk [vmem:[%s5675_s21 + $0x90] sm:$0xff] %vm1513_vm0, %v3563_v18  ;;  %v3564_v36 = vadd.f32 %v5671_v13, %v3525_v8 }
 0x634   : > { %3596 = vst.msk [vmem:[%s5675_s21 + $0x98] sm:$0xff] %vm1513_vm0, %v3564_v36 }
 0x66b   : > { %v3419_v9 = vpop.permute.xlu0 %3418 }
 0x66c   : > { %v3494_v53 = vadd.f32 %v3419_v9, %v5652_v26 }
 0x66d   : > { %v3421_v39 = vpop.permute.xlu1 %3420 }
 0x66e   : > { %v3526_v38 = vadd.f32 %v3494_v53, %v5724_v5  ;;  %v3495_v7 = vadd.f32 %v3421_v39, %v5658_v12 }
 0x670   : > { %v3565_v41 = vadd.f32 %v5671_v13, %v3526_v38  ;;  %v3527_v11 = vadd.f32 %v3495_v7, %v5735_v17 }
 0x672   : > { %3597 = vst.msk [vmem:[%s5675_s21 + $0xa0] sm:$0xff] %vm1513_vm0, %v3565_v41  ;;  %v3566_v15 = vadd.f32 %v5671_v13, %v3527_v11 }
 0x673   : > { %v3423_v23 = vpop.permute.xlu0 %3422 }
 0x674   : > { %3598 = vst.msk [vmem:[%s5675_s21 + $0xa8] sm:$0xff] %vm1513_vm0, %v3566_v15  ;;  %v3496_v26 = vadd.f32 %v3423_v23, %v5697_v59 }
 0x675   : > { %v3425_v42 = vpop.permute.xlu1 %3424 }
 0x676   : > { %v3528_v5 = vadd.f32 %v3496_v26, %v5746_v33  ;;  %v3497_v12 = vadd.f32 %v3425_v42, %v5706_v56 }
 0x678   : > { %v3567_v25 = vadd.f32 %v5671_v13, %v3528_v5  ;;  %v3529_v17 = vadd.f32 %v3497_v12, %v5757_v24 }
 0x67a   : > { %3599 = vst.msk [vmem:[%s5675_s21 + $0xb0] sm:$0xff] %vm1513_vm0, %v3567_v25  ;;  %v3568_v37 = vadd.f32 %v5671_v13, %v3529_v17 }
 0x67b   : > { %v3427_v2 = vpop.permute.xlu0 %3426 }
 0x67c   : > { %3600 = vst.msk [vmem:[%s5675_s21 + $0xb8] sm:$0xff] %vm1513_vm0, %v3568_v37  ;;  %v3498_v59 = vadd.f32 %v3427_v2, %v5719_v54 }
 0x67d   : > { %v3429_v34 = vpop.permute.xlu1 %3428 }
 0x67e   : > { %v3530_v33 = vadd.f32 %v3498_v59, %v5768_v3  ;;  %v3499_v56 = vadd.f32 %v3429_v34, %v5728_v57 }
 0x680   : > { %v3569_v35 = vadd.f32 %v5671_v13, %v3530_v33  ;;  %v3531_v24 = vadd.f32 %v3499_v56, %v5779_v6 }
 0x682   : > { %3601 = vst.msk [vmem:[%s5675_s21 + $0xc0] sm:$0xff] %vm1513_vm0, %v3569_v35  ;;  %v3570_v55 = vadd.f32 %v5671_v13, %v3531_v24 }
 0x683   : > { %v3431_v31 = vpop.permute.xlu0 %3430 }
 0x684   : > { %3602 = vst.msk [vmem:[%s5675_s21 + $0xc8] sm:$0xff] %vm1513_vm0, %v3570_v55  ;;  %v3500_v54 = vadd.f32 %v3431_v31, %v5741_v63 }
 0x685   : > { %v3433_v10 = vpop.permute.xlu1 %3432 }
 0x686   : > { %v3532_v3 = vadd.f32 %v3500_v54, %v5790_v62  ;;  %v3501_v57 = vadd.f32 %v3433_v10, %v5750_v29 }
 0x688   : > { %v3571_v44 = vadd.f32 %v5671_v13, %v3532_v3  ;;  %v3533_v6 = vadd.f32 %v3501_v57, %v5801_v1 }
 0x68a   : > { %3603 = vst.msk [vmem:[%s5675_s21 + $0xd0] sm:$0xff] %vm1513_vm0, %v3571_v44  ;;  %v3572_v47 = vadd.f32 %v5671_v13, %v3533_v6 }
 0x68b   : > { %v3435_v61 = vpop.permute.xlu0 %3434 }
 0x68c   : > { %3604 = vst.msk [vmem:[%s5675_s21 + $0xd8] sm:$0xff] %vm1513_vm0, %v3572_v47  ;;  %v3502_v63 = vadd.f32 %v3435_v61, %v5763_v19 }
 0x68d   : > { %v3437_v50 = vpop.permute.xlu1 %3436 }
 0x68e   : > { %v3534_v62 = vadd.f32 %v3502_v63, %v5811_v46  ;;  %v3503_v29 = vadd.f32 %v3437_v50, %v5772_v21 }
 0x690   : > { %v3573_v30 = vadd.f32 %v5671_v13, %v3534_v62  ;;  %v3535_v1 = vadd.f32 %v3503_v29, %v5817_v52 }
 0x692   : > { %3605 = vst.msk [vmem:[%s5675_s21 + $0xe0] sm:$0xff] %vm1513_vm0, %v3573_v30  ;;  %v3574_v0 = vadd.f32 %v5671_v13, %v3535_v1 }
 0x693   : > { %v3439_v45 = vpop.permute.xlu0 %3438 }
 0x694   : > { %3606 = vst.msk [vmem:[%s5675_s21 + $0xe8] sm:$0xff] %vm1513_vm0, %v3574_v0  ;;  %v3504_v19 = vadd.f32 %v3439_v45, %v5785_v58 }
 0x695   : > { %v3441_v46 = vpop.permute.xlu1 %3440 }
 0x696   : > { %v3536_v21 = vadd.f32 %v3504_v19, %v5826_v60  ;;  %v3505_v4 = vadd.f32 %v3441_v46, %v5794_v49 }
 0x698   : > { %v3575_v52 = vadd.f32 %v5671_v13, %v3536_v21  ;;  %v3537_v16 = vadd.f32 %v3505_v4, %v5831_v27 }
 0x69a   : > { %3607 = vst.msk [vmem:[%s5675_s21 + $0xf0] sm:$0xff] %vm1513_vm0, %v3575_v52  ;;  %v3576_v58 = vadd.f32 %v5671_v13, %v3537_v16 }
 0x69c   : > { %3608 = vst.msk [vmem:[%s5675_s21 + $0xf8] sm:$0xff] %vm1513_vm0, %v3576_v58 }
 0x69d   : > { %4098 = shalt.err (!%p4095_p3)
}
 0x69e   : > { %s4099_s17 = scalar_lea.hbm %s5902_s9, 4096  ;;  %s4103_s20 = scalar_lea.hbm %s5961_s7, 8192 }
 0x69f   : > { %p4100_p4 = scmp.ne.s32.totalorder %s5902_s9, %s4099_s17  ;;  %p4104_p9 = scmp.lt.u32.totalorder %s5902_s9, %s5961_s7 }
 0x6a0   : > { %p4105_p10 = scmp.lt.u32.totalorder %s4103_s20, %s4099_s17  ;;  %p4107_p12 = scmp.lt.u32.totalorder %s4099_s17, %s5902_s9 }
 0x6a1   : > { %p4101_p7 = pnand %p4100_p4, %p4233_p5 }
 0x6a2   : > { %p4106_p11 = por %p4105_p10, %p4104_p9 }
 0x6a3   : > { %p4102_p8 = pneg %p4101_p7 }
 0x6a4   : > { %p4108_p13 = por %p4107_p12, %p4106_p11 }
 0x6a6   : > { %p4109_p0 = pnand %p4108_p13, %p4102_p8 }
 0x6a8   : > { %4112 = shalt.err (!%p4109_p0)
}
 0x6a9   : > { %s4153_s23 = smov 128   ;;  %s4154_s29 = smov 8  }
 0x6aa   : > { %3897 = dma.vmem_to_hbm [thread:$0]  (%p4233_p5), %s5904_s22, 4096, %s5902_s9, %s5913_s28, %s4153_s23, %s4153_s23, %s4154_s29  }
 0x6ab PF: > { %p3903_p1 = scmp.ge.s32.totalorder %s4147_s27, 2  ;;  %s3638_s13 = sand.u32 1, %s4135_s24  }
 0x6ac   : > { %s3639_s14 = scalar_lea.sflag [#allocation6], %s3638_s13 }
 0x6ad   : > { %p3900_p2 = pnand %p3903_p1, %p4237_p6 }
 0x6af   : > { %4130 = dma.done.wait (!%p3900_p2), %s3639_s14, 4096  }
 0x6b0   : > { %4132 = vsyncadd (!%p3900_p2), %s3639_s14, 4294963200  ;;  %p17_p3 = scmp.ge.s32.totalorder %s4220_s30, 4   ;;  %s5993_s24 = smov %s4139_s25 }
 0x6b1   : > { %s5994_s25 = smov %s4143_s26  ;;  %s5995_s26 = smov %s4231_s10 }
 0x6b2   : > { %s5996_s27 = smov %s4220_s30  ;;  %19 = sbr.rel (!%p17_p3) target bundleno = 3 (0x3), region = 85 }
 0x6b9   :  { %3644 = vsyncpa [#allocation6], 1 }
 0x6ba   :  { %3646 = vsyncpa [#allocation6 + $0x1], 1 }

</bundles_post_ra>
